<compile_context>
chip_gen: v6e
topology: v6e:2x2x1
jax: 0.10.0
libtpu: 0.0.40
codegen_flags: <defaults>
</compile_context>

<pallas_src>
import numpy as np
import jax
import jax.numpy as jnp
from jax import lax
from jax.experimental import pallas as pl
from jax.experimental.pallas import tpu as pltpu


def _tracker_kernel(scal_ref, par_ref, nid_ref, det_ref, emb_ref, tid_ref,
                    act_ref, last_ref,
                    ids_out_ref, emb_out_ref, tid_out_ref, act_out_ref,
                    last_out_ref, nid_out_ref):
    n_pad, _ = det_ref.shape
    m = tid_ref.shape[1]

    n = scal_ref[0]        # number of valid detections
    frame = scal_ref[1]    # current frame index
    thr = par_ref[0]       # association threshold
    ema = par_ref[1]       # EMA momentum for matched-track embedding update

    # --- association scores: cosine similarity on the MXU -------------------
    det = det_ref[...]                                           # (n_pad, D)
    det_n = det * lax.rsqrt(jnp.sum(det * det, axis=-1, keepdims=True) + 1e-12)
    emb = emb_ref[...]                                           # (M, D), unit-norm
    sim = lax.dot_general(det_n, emb, (((1,), (1,)), ((), ())),
                          preferred_element_type=jnp.float32)    # (n_pad, M)

    # Fused (value, argmax) key: quantise sim to ~21 bits, pack the inverted
    # column index in the low 7 bits -> one max-reduction per detection gives
    # both the best score and its column (lowest column wins ties).
    col = lax.broadcasted_iota(jnp.int32, (1, m), 1)
    q = (jnp.clip(sim, -1.0, 1.0) * 1048576.0).astype(jnp.int32)
    keys = q * 128 + (127 - col)
    active = act_ref[...]                                        # (1, M) flags
    keys = jnp.where(active > 0.0, keys, -(2 ** 30))             # inactive -> never match
    thr_key = ((jnp.zeros_like(sim[:1, :1]) + thr) * 1048576.0).astype(jnp.int32) * 128

    lane_n = lax.broadcasted_iota(jnp.int32, (1, n_pad), 1)
    valid_row = lane_n < n                                       # padded rows masked
    row_sl = lax.broadcasted_iota(jnp.int32, (m, 1), 0)

    tids = tid_ref[...]                                          # (1, M) tracklet ids
    last = last_ref[...]                                         # (1, M) last-seen frame
    nid = nid_ref[...]                                           # (1, 1) next fresh id
    frame_v = jnp.zeros_like(nid) + frame                        # (1, 1)
    touched = jnp.zeros_like(active)                             # matched/alloc'd this frame
    out_ids = jnp.zeros_like(lane_n)                             # (1, n_pad) assigned ids

    # --- greedy assignment, fully unrolled; all state stays in vregs --------
    for i in range(n_pad):
        valid = valid_row[:, i:i + 1]                            # (1, 1)
        best = jnp.max(keys[i:i + 1, :], axis=1, keepdims=True)  # fused max+argmax
        is_match = valid & (best >= thr_key)
        j_match = 127 - (best & 127)                             # argmax column

        # id of the matched tracklet: vector compare + select + lane sum.
        match_sel = col == j_match
        existing = jnp.sum(jnp.where(match_sel, tids, 0), axis=1, keepdims=True)

        # slot for a new tracklet: free slots (lowest index) beat occupied LRU
        # slots, which beat slots already touched this frame (eviction policy).
        slot_key = jnp.where(
            touched > 0.0, 2 ** 30,
            jnp.where(active > 0.0,
                      2 ** 24 + jnp.clip(last, 0, 32767) * 128 + col,
                      col))
        j_new = jnp.min(slot_key, axis=1, keepdims=True) & 127
        slot = jnp.where(is_match, j_match, j_new)               # (1, 1)
        slot_sel = (col == slot) & valid                         # (1, M)

        # embedding write-back: EMA + renormalise for matches, normalised
        # detection embedding for freshly allocated tracklets.
        row_sel = row_sl == slot                                 # (M, 1)
        old_row = jnp.sum(jnp.where(row_sel, emb, 0.0), axis=0, keepdims=True)
        det_i = det_n[i:i + 1, :]                                # (1, D)
        mixed = ema * old_row + (1.0 - ema) * det_i
        mixed = mixed * lax.rsqrt(jnp.sum(mixed * mixed, axis=-1, keepdims=True) + 1e-12)
        new_row = jnp.where(is_match, mixed, det_i)
        emb = jnp.where(row_sel & valid, new_row, emb)

        # bookkeeping (all lane-wise selects, no scalar stores).
        new_tid = jnp.where(is_match, existing, nid)             # (1, 1)
        out_ids = jnp.where((lane_n == i) & valid, new_tid, out_ids)
        tids = jnp.where(slot_sel, new_tid, tids)
        active = jnp.where(slot_sel, 1.0, active)
        last = jnp.where(slot_sel, frame_v, last)
        touched = jnp.where(slot_sel, 1.0, touched)
        keys = jnp.where(slot_sel & is_match, -(2 ** 30), keys)  # dedup matched column
        nid = nid + jnp.where(valid & jnp.logical_not(is_match), 1, 0)

    # --- single lane-dense store of the results ------------------------------
    ids_out_ref[...] = out_ids
    emb_out_ref[...] = emb
    tid_out_ref[...] = tids
    act_out_ref[...] = active
    last_out_ref[...] = last
    nid_out_ref[...] = nid


def _make_step(n_pad, m, feat):
    call = pl.pallas_call(
        _tracker_kernel,
        out_shape=(
            jax.ShapeDtypeStruct((1, n_pad), jnp.int32),   # assigned ids
            jax.ShapeDtypeStruct((m, feat), jnp.float32),  # memory.emb (unit-norm)
            jax.ShapeDtypeStruct((1, m), jnp.int32),       # memory.ids
            jax.ShapeDtypeStruct((1, m), jnp.float32),     # memory.active
            jax.ShapeDtypeStruct((1, m), jnp.int32),       # memory.last_frame
            jax.ShapeDtypeStruct((1, 1), jnp.int32),       # memory.next_id
        ),
        in_specs=[
            pl.BlockSpec(memory_space=pltpu.MemorySpace.SMEM),   # [n, frame]
            pl.BlockSpec(memory_space=pltpu.MemorySpace.SMEM),   # [threshold, ema]
            pl.BlockSpec(memory_space=pltpu.MemorySpace.VMEM),   # next_id (1, 1)
            pl.BlockSpec(memory_space=pltpu.MemorySpace.VMEM),   # det (n_pad, D)
            pl.BlockSpec(memory_space=pltpu.MemorySpace.VMEM),   # emb (M, D)
            pl.BlockSpec(memory_space=pltpu.MemorySpace.VMEM),   # ids (1, M)
            pl.BlockSpec(memory_space=pltpu.MemorySpace.VMEM),   # active (1, M)
            pl.BlockSpec(memory_space=pltpu.MemorySpace.VMEM),   # last_frame (1, M)
        ],
        out_specs=(
            pl.BlockSpec(memory_space=pltpu.MemorySpace.VMEM),
            pl.BlockSpec(memory_space=pltpu.MemorySpace.VMEM),
            pl.BlockSpec(memory_space=pltpu.MemorySpace.VMEM),
            pl.BlockSpec(memory_space=pltpu.MemorySpace.VMEM),
            pl.BlockSpec(memory_space=pltpu.MemorySpace.VMEM),
            pl.BlockSpec(memory_space=pltpu.MemorySpace.VMEM),
        ),
        # tracker memory is updated in place on device.
        input_output_aliases={2: 5, 4: 1, 5: 2, 6: 3, 7: 4},
    )
    return jax.jit(call)


class StatefulTracker:
    """JAX/Pallas analogue of unitrack.StatefulTracker.

    Per-sequence (`key`) tracklet memory mirrors buffers_unique_map but as
    device-resident jnp arrays; each frame one Pallas kernel reads the memory,
    associates the detections and writes the memory back in place.
    """

    def __init__(self, max_tracks=16, dim=32, threshold=0.3, ema=0.9,
                 det_bucket=8):
        self.M = int(max_tracks)
        self.D = int(dim)
        self.det_bucket = max(8, int(det_bucket))
        # deterministic "memory parameters" shared across sequences
        self._params = jnp.asarray([threshold, ema], jnp.float32)
        self._mem = {}      # key -> per-sequence device buffers
        self._steps = {}    # padded detection bucket -> jitted pallas step

    def _get_mem(self, key):
        if key not in self._mem:
            self._mem[key] = {
                "memory.emb": jnp.zeros((self.M, self.D), jnp.float32),
                "memory.ids": jnp.zeros((1, self.M), jnp.int32),
                "memory.active": jnp.zeros((1, self.M), jnp.float32),
                "memory.last_frame": jnp.full((1, self.M), -1, jnp.int32),
                "memory.next_id": jnp.ones((1, 1), jnp.int32),
            }
        return self._mem[key]

    def _get_step(self, n):
        bucket = max(self.det_bucket, 8 * ((int(n) + 7) // 8))
        if bucket not in self._steps:
            self._steps[bucket] = _make_step(bucket, self.M, self.D)
        return bucket, self._steps[bucket]

    def __call__(self, x, n, key, frame):
        mem = self._get_mem(key)                    # memory.read(frame) state
        bucket, step = self._get_step(n)

        det = jnp.asarray(x["embeddings"], jnp.float32)[:n]
        if det.shape[0] != bucket:                  # pad to the fixed bucket
            det = jnp.concatenate(
                [det, jnp.zeros((bucket - det.shape[0], self.D), jnp.float32)],
                axis=0)

        ids_full, emb, tids, active, last, nid = step(
            jnp.asarray([n, frame], jnp.int32),
            self._params,
            mem["memory.next_id"],
            det,
            mem["memory.emb"],
            mem["memory.ids"],
            mem["memory.active"],
            mem["memory.last_frame"],
        )

        # memory.write(ctx, obs, new): buffers stay resident on device.
        mem["memory.emb"] = emb
        mem["memory.ids"] = tids
        mem["memory.active"] = active
        mem["memory.last_frame"] = last
        mem["memory.next_id"] = nid

        ids = ids_full[0, :n]
        if int(ids.shape[0]) != n:
            raise ValueError(f"Expected {n} IDs to be returned, got {ids.shape[0]}!")
        return ids


if __name__ == "__main__":
    N, D, M = 8, 32, 16
    tracker = StatefulTracker(max_tracks=M, dim=D, threshold=0.3, ema=0.9)

    rng = jax.random.PRNGKey(0)
    k0, k1 = jax.random.split(rng)
    det0 = jax.random.normal(k0, (N, D), jnp.float32)

    # frame 0, sequence "seq0": empty memory -> all detections get new IDs
    ids0 = tracker({"embeddings": det0}, N, key="seq0", frame=0)

    # frame 1, same sequence: slightly perturbed embeddings -> re-identified
    det1 = det0 + 0.01 * jax.random.normal(k1, (N, D), jnp.float32)
    ids1 = tracker({"embeddings": det1}, N, key="seq0", frame=1)

    # different sequence key -> fresh per-sequence memory, IDs restart
    ids_other = tracker({"embeddings": det0}, N, key="seq1", frame=0)

    ids0, ids1, ids_other = (np.asarray(v) for v in
                             jax.block_until_ready((ids0, ids1, ids_other)))

    assert ids0.shape == (N,) and ids1.shape == (N,) and ids_other.shape == (N,)
    assert np.array_equal(ids0, np.arange(1, N + 1)), ids0
    assert np.array_equal(ids1, ids0), (ids0, ids1)          # re-identification
    assert np.array_equal(ids_other, np.arange(1, N + 1)), ids_other

    print("KERNEL_OK")
</pallas_src>

<mosaic_0001>
module attributes {stable_mosaic.version = 11 : i64} {
  func.func @_tracker_kernel(%arg0: memref<2xi32, #tpu.memory_space<smem>>, %arg1: memref<2xf32, #tpu.memory_space<smem>>, %arg2: memref<1x1xi32, #tpu.memory_space<vmem>>, %arg3: memref<8x32xf32, #tpu.memory_space<vmem>>, %arg4: memref<16x32xf32, #tpu.memory_space<vmem>>, %arg5: memref<1x16xi32, #tpu.memory_space<vmem>>, %arg6: memref<1x16xf32, #tpu.memory_space<vmem>>, %arg7: memref<1x16xi32, #tpu.memory_space<vmem>>, %arg8: memref<1x8xi32, #tpu.memory_space<vmem>>, %arg9: memref<16x32xf32, #tpu.memory_space<vmem>>, %arg10: memref<1x16xi32, #tpu.memory_space<vmem>>, %arg11: memref<1x16xf32, #tpu.memory_space<vmem>>, %arg12: memref<1x16xi32, #tpu.memory_space<vmem>>, %arg13: memref<1x1xi32, #tpu.memory_space<vmem>>) attributes {dimension_semantics = [], scalar_prefetch = 0 : i64, scratch_operands = 0 : i64, tpu.core_type = #tpu.core_type<tc>} {
    %c0 = arith.constant 0 : index
    %0 = memref.load %arg0[%c0] : memref<2xi32, #tpu.memory_space<smem>>
    %c1 = arith.constant 1 : index
    %1 = memref.load %arg0[%c1] : memref<2xi32, #tpu.memory_space<smem>>
    %c0_0 = arith.constant 0 : index
    %2 = memref.load %arg1[%c0_0] : memref<2xf32, #tpu.memory_space<smem>>
    %c1_1 = arith.constant 1 : index
    %3 = memref.load %arg1[%c1_1] : memref<2xf32, #tpu.memory_space<smem>>
    %c0_2 = arith.constant 0 : index
    %c0_3 = arith.constant 0 : index
    %4 = vector.load %arg3[%c0_2, %c0_3] : memref<8x32xf32, #tpu.memory_space<vmem>>, vector<8x32xf32>
    %5 = arith.mulf %4, %4 : vector<8x32xf32>
    %cst = arith.constant dense<0.000000e+00> : vector<8xf32>
    %6 = vector.multi_reduction <add>, %5, %cst [1] : vector<8x32xf32> to vector<8xf32>
    %7 = vector.shape_cast %6 : vector<8xf32> to vector<8x1xf32>
    %cst_4 = arith.constant 9.99999996E-13 : f32
    %8 = vector.broadcast %cst_4 : f32 to vector<8x1xf32>
    %9 = arith.addf %7, %8 : vector<8x1xf32>
    %10 = math.rsqrt %9 : vector<8x1xf32>
    %11 = vector.broadcast %10 : vector<8x1xf32> to vector<8x32xf32>
    %12 = arith.mulf %4, %11 : vector<8x32xf32>
    %c0_5 = arith.constant 0 : index
    %c0_6 = arith.constant 0 : index
    %13 = vector.load %arg4[%c0_5, %c0_6] : memref<16x32xf32, #tpu.memory_space<vmem>>, vector<16x32xf32>
    %cst_7 = arith.constant dense<0.000000e+00> : vector<8x16xf32>
    %14 = tpu.matmul %12, %13, %cst_7 {dimension_numbers = #tpu.dot_dimension_numbers<[1], [1], [0], [0], [0, 0, 1, 0], [], []>} : vector<8x32xf32>, vector<16x32xf32>, vector<8x16xf32> -> vector<8x16xf32>
    %15 = tpu.iota {dimensions = array<i32: 1>} : vector<1x16xi32>
    %cst_8 = arith.constant -1.000000e+00 : f32
    %cst_9 = arith.constant 1.000000e+00 : f32
    %16 = vector.broadcast %cst_8 : f32 to vector<8x16xf32>
    %17 = arith.maximumf %16, %14 : vector<8x16xf32>
    %18 = vector.broadcast %cst_9 : f32 to vector<8x16xf32>
    %19 = arith.minimumf %18, %17 : vector<8x16xf32>
    %cst_10 = arith.constant 0x49800000 : f32
    %20 = vector.broadcast %cst_10 : f32 to vector<8x16xf32>
    %21 = arith.mulf %19, %20 : vector<8x16xf32>
    %22 = arith.fptosi %21 : vector<8x16xf32> to vector<8x16xi32>
    %c128_i32 = arith.constant 128 : i32
    %23 = vector.broadcast %c128_i32 : i32 to vector<8x16xi32>
    %24 = arith.muli %22, %23 : vector<8x16xi32>
    %c127_i32 = arith.constant 127 : i32
    %25 = vector.broadcast %c127_i32 : i32 to vector<1x16xi32>
    %26 = arith.subi %25, %15 : vector<1x16xi32>
    %27 = vector.broadcast %26 : vector<1x16xi32> to vector<8x16xi32>
    %28 = arith.addi %24, %27 : vector<8x16xi32>
    %c0_11 = arith.constant 0 : index
    %c0_12 = arith.constant 0 : index
    %29 = vector.load %arg6[%c0_11, %c0_12] : memref<1x16xf32, #tpu.memory_space<vmem>>, vector<1x16xf32>
    %cst_13 = arith.constant 0.000000e+00 : f32
    %30 = vector.broadcast %cst_13 : f32 to vector<1x16xf32>
    %31 = arith.cmpf ogt, %29, %30 : vector<1x16xf32>
    %c-1073741824_i32 = arith.constant -1073741824 : i32
    %32 = vector.shape_cast %31 : vector<1x16xi1> to vector<1x16xi1>
    %33 = vector.broadcast %32 : vector<1x16xi1> to vector<8x16xi1>
    %34 = vector.broadcast %c-1073741824_i32 : i32 to vector<8x16xi32>
    %35 = arith.select %33, %28, %34 : vector<8x16xi1>, vector<8x16xi32>
    %cst_14 = arith.constant 0.000000e+00 : f32
    %36 = vector.broadcast %cst_14 : f32 to vector<1x1xf32>
    %37 = vector.broadcast %2 : f32 to vector<1x1xf32>
    %38 = arith.addf %36, %37 : vector<1x1xf32>
    %cst_15 = arith.constant 0x49800000 : f32
    %39 = vector.broadcast %cst_15 : f32 to vector<1x1xf32>
    %40 = arith.mulf %38, %39 : vector<1x1xf32>
    %41 = arith.fptosi %40 : vector<1x1xf32> to vector<1x1xi32>
    %c128_i32_16 = arith.constant 128 : i32
    %42 = vector.broadcast %c128_i32_16 : i32 to vector<1x1xi32>
    %43 = arith.muli %41, %42 : vector<1x1xi32>
    %44 = tpu.iota {dimensions = array<i32: 1>} : vector<1x8xi32>
    %45 = vector.broadcast %0 : i32 to vector<1x8xi32>
    %46 = arith.cmpi slt, %44, %45 : vector<1x8xi32>
    %47 = tpu.iota {dimensions = array<i32: 0>} : vector<16x1xi32>
    %c0_17 = arith.constant 0 : index
    %c0_18 = arith.constant 0 : index
    %48 = vector.load %arg5[%c0_17, %c0_18] : memref<1x16xi32, #tpu.memory_space<vmem>>, vector<1x16xi32>
    %c0_19 = arith.constant 0 : index
    %c0_20 = arith.constant 0 : index
    %49 = vector.load %arg7[%c0_19, %c0_20] : memref<1x16xi32, #tpu.memory_space<vmem>>, vector<1x16xi32>
    %c0_21 = arith.constant 0 : index
    %c0_22 = arith.constant 0 : index
    %50 = vector.load %arg2[%c0_21, %c0_22] : memref<1x1xi32, #tpu.memory_space<vmem>>, vector<1x1xi32>
    %c0_i32 = arith.constant 0 : i32
    %51 = vector.broadcast %c0_i32 : i32 to vector<1x1xi32>
    %52 = vector.broadcast %1 : i32 to vector<1x1xi32>
    %53 = arith.addi %51, %52 : vector<1x1xi32>
    %cst_23 = arith.constant 0.000000e+00 : f32
    %54 = vector.broadcast %cst_23 : f32 to vector<1x16xf32>
    %c0_i32_24 = arith.constant 0 : i32
    %55 = vector.broadcast %c0_i32_24 : i32 to vector<1x8xi32>
    %56 = vector.extract_strided_slice %46 {offsets = [0, 0], sizes = [1, 1], strides = [1, 1]} : vector<1x8xi1> to vector<1x1xi1>
    %57 = vector.extract_strided_slice %35 {offsets = [0, 0], sizes = [1, 16], strides = [1, 1]} : vector<8x16xi32> to vector<1x16xi32>
    %cst_25 = arith.constant dense<-2147483648> : vector<1xi32>
    %58 = vector.multi_reduction <maxsi>, %57, %cst_25 [1] : vector<1x16xi32> to vector<1xi32>
    %59 = vector.shape_cast %58 : vector<1xi32> to vector<1x1xi32>
    %60 = arith.cmpi sge, %59, %43 : vector<1x1xi32>
    %61 = arith.andi %56, %60 : vector<1x1xi1>
    %c127_i32_26 = arith.constant 127 : i32
    %62 = vector.broadcast %c127_i32_26 : i32 to vector<1x1xi32>
    %63 = arith.andi %59, %62 : vector<1x1xi32>
    %c127_i32_27 = arith.constant 127 : i32
    %64 = vector.broadcast %c127_i32_27 : i32 to vector<1x1xi32>
    %65 = arith.subi %64, %63 : vector<1x1xi32>
    %66 = vector.broadcast %65 : vector<1x1xi32> to vector<1x16xi32>
    %67 = arith.cmpi eq, %15, %66 : vector<1x16xi32>
    %c0_i32_28 = arith.constant 0 : i32
    %68 = vector.broadcast %c0_i32_28 : i32 to vector<1x16xi32>
    %69 = arith.select %67, %48, %68 : vector<1x16xi1>, vector<1x16xi32>
    %cst_29 = arith.constant dense<0> : vector<1xi32>
    %70 = vector.multi_reduction <add>, %69, %cst_29 [1] : vector<1x16xi32> to vector<1xi32>
    %71 = vector.shape_cast %70 : vector<1xi32> to vector<1x1xi32>
    %cst_30 = arith.constant 0.000000e+00 : f32
    %72 = vector.broadcast %cst_30 : f32 to vector<1x16xf32>
    %73 = arith.cmpf ogt, %54, %72 : vector<1x16xf32>
    %cst_31 = arith.constant 0.000000e+00 : f32
    %74 = vector.broadcast %cst_31 : f32 to vector<1x16xf32>
    %75 = arith.cmpf ogt, %29, %74 : vector<1x16xf32>
    %c0_i32_32 = arith.constant 0 : i32
    %c32767_i32 = arith.constant 32767 : i32
    %76 = vector.broadcast %c0_i32_32 : i32 to vector<1x16xi32>
    %77 = arith.maxsi %76, %49 : vector<1x16xi32>
    %78 = vector.broadcast %c32767_i32 : i32 to vector<1x16xi32>
    %79 = arith.minsi %78, %77 : vector<1x16xi32>
    %c128_i32_33 = arith.constant 128 : i32
    %80 = vector.broadcast %c128_i32_33 : i32 to vector<1x16xi32>
    %81 = arith.muli %79, %80 : vector<1x16xi32>
    %c16777216_i32 = arith.constant 16777216 : i32
    %82 = vector.broadcast %c16777216_i32 : i32 to vector<1x16xi32>
    %83 = arith.addi %82, %81 : vector<1x16xi32>
    %84 = arith.addi %83, %15 : vector<1x16xi32>
    %85 = arith.select %75, %84, %15 : vector<1x16xi1>, vector<1x16xi32>
    %c1073741824_i32 = arith.constant 1073741824 : i32
    %86 = vector.broadcast %c1073741824_i32 : i32 to vector<1x16xi32>
    %87 = arith.select %73, %86, %85 : vector<1x16xi1>, vector<1x16xi32>
    %cst_34 = arith.constant dense<2147483647> : vector<1xi32>
    %88 = vector.multi_reduction <minsi>, %87, %cst_34 [1] : vector<1x16xi32> to vector<1xi32>
    %89 = vector.shape_cast %88 : vector<1xi32> to vector<1x1xi32>
    %c127_i32_35 = arith.constant 127 : i32
    %90 = vector.broadcast %c127_i32_35 : i32 to vector<1x1xi32>
    %91 = arith.andi %89, %90 : vector<1x1xi32>
    %92 = arith.select %61, %65, %91 : vector<1x1xi1>, vector<1x1xi32>
    %93 = vector.broadcast %92 : vector<1x1xi32> to vector<1x16xi32>
    %94 = arith.cmpi eq, %15, %93 : vector<1x16xi32>
    %95 = vector.broadcast %56 : vector<1x1xi1> to vector<1x16xi1>
    %96 = arith.andi %94, %95 : vector<1x16xi1>
    %97 = vector.broadcast %92 : vector<1x1xi32> to vector<16x1xi32>
    %98 = arith.cmpi eq, %47, %97 : vector<16x1xi32>
    %cst_36 = arith.constant 0.000000e+00 : f32
    %99 = vector.shape_cast %98 : vector<16x1xi1> to vector<16x1xi1>
    %100 = vector.broadcast %99 : vector<16x1xi1> to vector<16x32xi1>
    %101 = vector.broadcast %cst_36 : f32 to vector<16x32xf32>
    %102 = arith.select %100, %13, %101 : vector<16x32xi1>, vector<16x32xf32>
    %cst_37 = arith.constant dense<0.000000e+00> : vector<32xf32>
    %103 = vector.multi_reduction <add>, %102, %cst_37 [0] : vector<16x32xf32> to vector<32xf32>
    %104 = vector.shape_cast %103 : vector<32xf32> to vector<1x32xf32>
    %105 = vector.extract_strided_slice %12 {offsets = [0, 0], sizes = [1, 32], strides = [1, 1]} : vector<8x32xf32> to vector<1x32xf32>
    %106 = vector.broadcast %3 : f32 to vector<1x32xf32>
    %107 = arith.mulf %106, %104 : vector<1x32xf32>
    %cst_38 = arith.constant 1.000000e+00 : f32
    %108 = arith.subf %cst_38, %3 : f32
    %109 = vector.broadcast %108 : f32 to vector<1x32xf32>
    %110 = arith.mulf %109, %105 : vector<1x32xf32>
    %111 = arith.addf %107, %110 : vector<1x32xf32>
    %112 = arith.mulf %111, %111 : vector<1x32xf32>
    %cst_39 = arith.constant dense<0.000000e+00> : vector<1xf32>
    %113 = vector.multi_reduction <add>, %112, %cst_39 [1] : vector<1x32xf32> to vector<1xf32>
    %114 = vector.shape_cast %113 : vector<1xf32> to vector<1x1xf32>
    %cst_40 = arith.constant 9.99999996E-13 : f32
    %115 = vector.broadcast %cst_40 : f32 to vector<1x1xf32>
    %116 = arith.addf %114, %115 : vector<1x1xf32>
    %117 = math.rsqrt %116 : vector<1x1xf32>
    %118 = vector.broadcast %117 : vector<1x1xf32> to vector<1x32xf32>
    %119 = arith.mulf %111, %118 : vector<1x32xf32>
    %120 = vector.shape_cast %61 : vector<1x1xi1> to vector<1x1xi1>
    %121 = vector.broadcast %120 : vector<1x1xi1> to vector<1x32xi1>
    %122 = arith.select %121, %119, %105 : vector<1x32xi1>, vector<1x32xf32>
    %123 = vector.broadcast %56 : vector<1x1xi1> to vector<16x1xi1>
    %124 = arith.andi %98, %123 : vector<16x1xi1>
    %125 = vector.shape_cast %124 : vector<16x1xi1> to vector<16x1xi1>
    %126 = vector.broadcast %125 : vector<16x1xi1> to vector<16x32xi1>
    %127 = vector.shape_cast %122 : vector<1x32xf32> to vector<1x32xf32>
    %128 = vector.broadcast %127 : vector<1x32xf32> to vector<16x32xf32>
    %129 = arith.select %126, %128, %13 : vector<16x32xi1>, vector<16x32xf32>
    %130 = arith.select %61, %71, %50 : vector<1x1xi1>, vector<1x1xi32>
    %c0_i32_41 = arith.constant 0 : i32
    %131 = vector.broadcast %c0_i32_41 : i32 to vector<1x8xi32>
    %132 = arith.cmpi eq, %44, %131 : vector<1x8xi32>
    %133 = vector.broadcast %56 : vector<1x1xi1> to vector<1x8xi1>
    %134 = arith.andi %132, %133 : vector<1x8xi1>
    %135 = vector.shape_cast %130 : vector<1x1xi32> to vector<1x1xi32>
    %136 = vector.broadcast %135 : vector<1x1xi32> to vector<1x8xi32>
    %137 = arith.select %134, %136, %55 : vector<1x8xi1>, vector<1x8xi32>
    %138 = vector.shape_cast %130 : vector<1x1xi32> to vector<1x1xi32>
    %139 = vector.broadcast %138 : vector<1x1xi32> to vector<1x16xi32>
    %140 = arith.select %96, %139, %48 : vector<1x16xi1>, vector<1x16xi32>
    %cst_42 = arith.constant 1.000000e+00 : f32
    %141 = vector.broadcast %cst_42 : f32 to vector<1x16xf32>
    %142 = arith.select %96, %141, %29 : vector<1x16xi1>, vector<1x16xf32>
    %143 = vector.shape_cast %53 : vector<1x1xi32> to vector<1x1xi32>
    %144 = vector.broadcast %143 : vector<1x1xi32> to vector<1x16xi32>
    %145 = arith.select %96, %144, %49 : vector<1x16xi1>, vector<1x16xi32>
    %cst_43 = arith.constant 1.000000e+00 : f32
    %146 = vector.broadcast %cst_43 : f32 to vector<1x16xf32>
    %147 = arith.select %96, %146, %54 : vector<1x16xi1>, vector<1x16xf32>
    %148 = vector.broadcast %61 : vector<1x1xi1> to vector<1x16xi1>
    %149 = arith.andi %96, %148 : vector<1x16xi1>
    %c-1073741824_i32_44 = arith.constant -1073741824 : i32
    %150 = vector.shape_cast %149 : vector<1x16xi1> to vector<1x16xi1>
    %151 = vector.broadcast %150 : vector<1x16xi1> to vector<8x16xi1>
    %152 = vector.broadcast %c-1073741824_i32_44 : i32 to vector<8x16xi32>
    %153 = arith.select %151, %152, %35 : vector<8x16xi1>, vector<8x16xi32>
    %cst_45 = arith.constant dense<true> : vector<1x1xi1>
    %154 = arith.xori %61, %cst_45 : vector<1x1xi1>
    %155 = arith.andi %56, %154 : vector<1x1xi1>
    %c1_i32 = arith.constant 1 : i32
    %c0_i32_46 = arith.constant 0 : i32
    %156 = vector.broadcast %c1_i32 : i32 to vector<1x1xi32>
    %157 = vector.broadcast %c0_i32_46 : i32 to vector<1x1xi32>
    %158 = arith.select %155, %156, %157 : vector<1x1xi1>, vector<1x1xi32>
    %159 = arith.addi %50, %158 : vector<1x1xi32>
    %160 = vector.extract_strided_slice %46 {offsets = [0, 1], sizes = [1, 1], strides = [1, 1]} : vector<1x8xi1> to vector<1x1xi1>
    %161 = vector.extract_strided_slice %153 {offsets = [1, 0], sizes = [1, 16], strides = [1, 1]} : vector<8x16xi32> to vector<1x16xi32>
    %cst_47 = arith.constant dense<-2147483648> : vector<1xi32>
    %162 = vector.multi_reduction <maxsi>, %161, %cst_47 [1] : vector<1x16xi32> to vector<1xi32>
    %163 = vector.shape_cast %162 : vector<1xi32> to vector<1x1xi32>
    %164 = arith.cmpi sge, %163, %43 : vector<1x1xi32>
    %165 = arith.andi %160, %164 : vector<1x1xi1>
    %c127_i32_48 = arith.constant 127 : i32
    %166 = vector.broadcast %c127_i32_48 : i32 to vector<1x1xi32>
    %167 = arith.andi %163, %166 : vector<1x1xi32>
    %c127_i32_49 = arith.constant 127 : i32
    %168 = vector.broadcast %c127_i32_49 : i32 to vector<1x1xi32>
    %169 = arith.subi %168, %167 : vector<1x1xi32>
    %170 = vector.broadcast %169 : vector<1x1xi32> to vector<1x16xi32>
    %171 = arith.cmpi eq, %15, %170 : vector<1x16xi32>
    %c0_i32_50 = arith.constant 0 : i32
    %172 = vector.broadcast %c0_i32_50 : i32 to vector<1x16xi32>
    %173 = arith.select %171, %140, %172 : vector<1x16xi1>, vector<1x16xi32>
    %cst_51 = arith.constant dense<0> : vector<1xi32>
    %174 = vector.multi_reduction <add>, %173, %cst_51 [1] : vector<1x16xi32> to vector<1xi32>
    %175 = vector.shape_cast %174 : vector<1xi32> to vector<1x1xi32>
    %cst_52 = arith.constant 0.000000e+00 : f32
    %176 = vector.broadcast %cst_52 : f32 to vector<1x16xf32>
    %177 = arith.cmpf ogt, %147, %176 : vector<1x16xf32>
    %cst_53 = arith.constant 0.000000e+00 : f32
    %178 = vector.broadcast %cst_53 : f32 to vector<1x16xf32>
    %179 = arith.cmpf ogt, %142, %178 : vector<1x16xf32>
    %c0_i32_54 = arith.constant 0 : i32
    %c32767_i32_55 = arith.constant 32767 : i32
    %180 = vector.broadcast %c0_i32_54 : i32 to vector<1x16xi32>
    %181 = arith.maxsi %180, %145 : vector<1x16xi32>
    %182 = vector.broadcast %c32767_i32_55 : i32 to vector<1x16xi32>
    %183 = arith.minsi %182, %181 : vector<1x16xi32>
    %c128_i32_56 = arith.constant 128 : i32
    %184 = vector.broadcast %c128_i32_56 : i32 to vector<1x16xi32>
    %185 = arith.muli %183, %184 : vector<1x16xi32>
    %c16777216_i32_57 = arith.constant 16777216 : i32
    %186 = vector.broadcast %c16777216_i32_57 : i32 to vector<1x16xi32>
    %187 = arith.addi %186, %185 : vector<1x16xi32>
    %188 = arith.addi %187, %15 : vector<1x16xi32>
    %189 = arith.select %179, %188, %15 : vector<1x16xi1>, vector<1x16xi32>
    %c1073741824_i32_58 = arith.constant 1073741824 : i32
    %190 = vector.broadcast %c1073741824_i32_58 : i32 to vector<1x16xi32>
    %191 = arith.select %177, %190, %189 : vector<1x16xi1>, vector<1x16xi32>
    %cst_59 = arith.constant dense<2147483647> : vector<1xi32>
    %192 = vector.multi_reduction <minsi>, %191, %cst_59 [1] : vector<1x16xi32> to vector<1xi32>
    %193 = vector.shape_cast %192 : vector<1xi32> to vector<1x1xi32>
    %c127_i32_60 = arith.constant 127 : i32
    %194 = vector.broadcast %c127_i32_60 : i32 to vector<1x1xi32>
    %195 = arith.andi %193, %194 : vector<1x1xi32>
    %196 = arith.select %165, %169, %195 : vector<1x1xi1>, vector<1x1xi32>
    %197 = vector.broadcast %196 : vector<1x1xi32> to vector<1x16xi32>
    %198 = arith.cmpi eq, %15, %197 : vector<1x16xi32>
    %199 = vector.broadcast %160 : vector<1x1xi1> to vector<1x16xi1>
    %200 = arith.andi %198, %199 : vector<1x16xi1>
    %201 = vector.broadcast %196 : vector<1x1xi32> to vector<16x1xi32>
    %202 = arith.cmpi eq, %47, %201 : vector<16x1xi32>
    %cst_61 = arith.constant 0.000000e+00 : f32
    %203 = vector.shape_cast %202 : vector<16x1xi1> to vector<16x1xi1>
    %204 = vector.broadcast %203 : vector<16x1xi1> to vector<16x32xi1>
    %205 = vector.broadcast %cst_61 : f32 to vector<16x32xf32>
    %206 = arith.select %204, %129, %205 : vector<16x32xi1>, vector<16x32xf32>
    %cst_62 = arith.constant dense<0.000000e+00> : vector<32xf32>
    %207 = vector.multi_reduction <add>, %206, %cst_62 [0] : vector<16x32xf32> to vector<32xf32>
    %208 = vector.shape_cast %207 : vector<32xf32> to vector<1x32xf32>
    %209 = vector.extract_strided_slice %12 {offsets = [1, 0], sizes = [1, 32], strides = [1, 1]} : vector<8x32xf32> to vector<1x32xf32>
    %210 = vector.broadcast %3 : f32 to vector<1x32xf32>
    %211 = arith.mulf %210, %208 : vector<1x32xf32>
    %cst_63 = arith.constant 1.000000e+00 : f32
    %212 = arith.subf %cst_63, %3 : f32
    %213 = vector.broadcast %212 : f32 to vector<1x32xf32>
    %214 = arith.mulf %213, %209 : vector<1x32xf32>
    %215 = arith.addf %211, %214 : vector<1x32xf32>
    %216 = arith.mulf %215, %215 : vector<1x32xf32>
    %cst_64 = arith.constant dense<0.000000e+00> : vector<1xf32>
    %217 = vector.multi_reduction <add>, %216, %cst_64 [1] : vector<1x32xf32> to vector<1xf32>
    %218 = vector.shape_cast %217 : vector<1xf32> to vector<1x1xf32>
    %cst_65 = arith.constant 9.99999996E-13 : f32
    %219 = vector.broadcast %cst_65 : f32 to vector<1x1xf32>
    %220 = arith.addf %218, %219 : vector<1x1xf32>
    %221 = math.rsqrt %220 : vector<1x1xf32>
    %222 = vector.broadcast %221 : vector<1x1xf32> to vector<1x32xf32>
    %223 = arith.mulf %215, %222 : vector<1x32xf32>
    %224 = vector.shape_cast %165 : vector<1x1xi1> to vector<1x1xi1>
    %225 = vector.broadcast %224 : vector<1x1xi1> to vector<1x32xi1>
    %226 = arith.select %225, %223, %209 : vector<1x32xi1>, vector<1x32xf32>
    %227 = vector.broadcast %160 : vector<1x1xi1> to vector<16x1xi1>
    %228 = arith.andi %202, %227 : vector<16x1xi1>
    %229 = vector.shape_cast %228 : vector<16x1xi1> to vector<16x1xi1>
    %230 = vector.broadcast %229 : vector<16x1xi1> to vector<16x32xi1>
    %231 = vector.shape_cast %226 : vector<1x32xf32> to vector<1x32xf32>
    %232 = vector.broadcast %231 : vector<1x32xf32> to vector<16x32xf32>
    %233 = arith.select %230, %232, %129 : vector<16x32xi1>, vector<16x32xf32>
    %234 = arith.select %165, %175, %159 : vector<1x1xi1>, vector<1x1xi32>
    %c1_i32_66 = arith.constant 1 : i32
    %235 = vector.broadcast %c1_i32_66 : i32 to vector<1x8xi32>
    %236 = arith.cmpi eq, %44, %235 : vector<1x8xi32>
    %237 = vector.broadcast %160 : vector<1x1xi1> to vector<1x8xi1>
    %238 = arith.andi %236, %237 : vector<1x8xi1>
    %239 = vector.shape_cast %234 : vector<1x1xi32> to vector<1x1xi32>
    %240 = vector.broadcast %239 : vector<1x1xi32> to vector<1x8xi32>
    %241 = arith.select %238, %240, %137 : vector<1x8xi1>, vector<1x8xi32>
    %242 = vector.shape_cast %234 : vector<1x1xi32> to vector<1x1xi32>
    %243 = vector.broadcast %242 : vector<1x1xi32> to vector<1x16xi32>
    %244 = arith.select %200, %243, %140 : vector<1x16xi1>, vector<1x16xi32>
    %cst_67 = arith.constant 1.000000e+00 : f32
    %245 = vector.broadcast %cst_67 : f32 to vector<1x16xf32>
    %246 = arith.select %200, %245, %142 : vector<1x16xi1>, vector<1x16xf32>
    %247 = vector.shape_cast %53 : vector<1x1xi32> to vector<1x1xi32>
    %248 = vector.broadcast %247 : vector<1x1xi32> to vector<1x16xi32>
    %249 = arith.select %200, %248, %145 : vector<1x16xi1>, vector<1x16xi32>
    %cst_68 = arith.constant 1.000000e+00 : f32
    %250 = vector.broadcast %cst_68 : f32 to vector<1x16xf32>
    %251 = arith.select %200, %250, %147 : vector<1x16xi1>, vector<1x16xf32>
    %252 = vector.broadcast %165 : vector<1x1xi1> to vector<1x16xi1>
    %253 = arith.andi %200, %252 : vector<1x16xi1>
    %c-1073741824_i32_69 = arith.constant -1073741824 : i32
    %254 = vector.shape_cast %253 : vector<1x16xi1> to vector<1x16xi1>
    %255 = vector.broadcast %254 : vector<1x16xi1> to vector<8x16xi1>
    %256 = vector.broadcast %c-1073741824_i32_69 : i32 to vector<8x16xi32>
    %257 = arith.select %255, %256, %153 : vector<8x16xi1>, vector<8x16xi32>
    %cst_70 = arith.constant dense<true> : vector<1x1xi1>
    %258 = arith.xori %165, %cst_70 : vector<1x1xi1>
    %259 = arith.andi %160, %258 : vector<1x1xi1>
    %c1_i32_71 = arith.constant 1 : i32
    %c0_i32_72 = arith.constant 0 : i32
    %260 = vector.broadcast %c1_i32_71 : i32 to vector<1x1xi32>
    %261 = vector.broadcast %c0_i32_72 : i32 to vector<1x1xi32>
    %262 = arith.select %259, %260, %261 : vector<1x1xi1>, vector<1x1xi32>
    %263 = arith.addi %159, %262 : vector<1x1xi32>
    %264 = vector.extract_strided_slice %46 {offsets = [0, 2], sizes = [1, 1], strides = [1, 1]} : vector<1x8xi1> to vector<1x1xi1>
    %265 = vector.extract_strided_slice %257 {offsets = [2, 0], sizes = [1, 16], strides = [1, 1]} : vector<8x16xi32> to vector<1x16xi32>
    %cst_73 = arith.constant dense<-2147483648> : vector<1xi32>
    %266 = vector.multi_reduction <maxsi>, %265, %cst_73 [1] : vector<1x16xi32> to vector<1xi32>
    %267 = vector.shape_cast %266 : vector<1xi32> to vector<1x1xi32>
    %268 = arith.cmpi sge, %267, %43 : vector<1x1xi32>
    %269 = arith.andi %264, %268 : vector<1x1xi1>
    %c127_i32_74 = arith.constant 127 : i32
    %270 = vector.broadcast %c127_i32_74 : i32 to vector<1x1xi32>
    %271 = arith.andi %267, %270 : vector<1x1xi32>
    %c127_i32_75 = arith.constant 127 : i32
    %272 = vector.broadcast %c127_i32_75 : i32 to vector<1x1xi32>
    %273 = arith.subi %272, %271 : vector<1x1xi32>
    %274 = vector.broadcast %273 : vector<1x1xi32> to vector<1x16xi32>
    %275 = arith.cmpi eq, %15, %274 : vector<1x16xi32>
    %c0_i32_76 = arith.constant 0 : i32
    %276 = vector.broadcast %c0_i32_76 : i32 to vector<1x16xi32>
    %277 = arith.select %275, %244, %276 : vector<1x16xi1>, vector<1x16xi32>
    %cst_77 = arith.constant dense<0> : vector<1xi32>
    %278 = vector.multi_reduction <add>, %277, %cst_77 [1] : vector<1x16xi32> to vector<1xi32>
    %279 = vector.shape_cast %278 : vector<1xi32> to vector<1x1xi32>
    %cst_78 = arith.constant 0.000000e+00 : f32
    %280 = vector.broadcast %cst_78 : f32 to vector<1x16xf32>
    %281 = arith.cmpf ogt, %251, %280 : vector<1x16xf32>
    %cst_79 = arith.constant 0.000000e+00 : f32
    %282 = vector.broadcast %cst_79 : f32 to vector<1x16xf32>
    %283 = arith.cmpf ogt, %246, %282 : vector<1x16xf32>
    %c0_i32_80 = arith.constant 0 : i32
    %c32767_i32_81 = arith.constant 32767 : i32
    %284 = vector.broadcast %c0_i32_80 : i32 to vector<1x16xi32>
    %285 = arith.maxsi %284, %249 : vector<1x16xi32>
    %286 = vector.broadcast %c32767_i32_81 : i32 to vector<1x16xi32>
    %287 = arith.minsi %286, %285 : vector<1x16xi32>
    %c128_i32_82 = arith.constant 128 : i32
    %288 = vector.broadcast %c128_i32_82 : i32 to vector<1x16xi32>
    %289 = arith.muli %287, %288 : vector<1x16xi32>
    %c16777216_i32_83 = arith.constant 16777216 : i32
    %290 = vector.broadcast %c16777216_i32_83 : i32 to vector<1x16xi32>
    %291 = arith.addi %290, %289 : vector<1x16xi32>
    %292 = arith.addi %291, %15 : vector<1x16xi32>
    %293 = arith.select %283, %292, %15 : vector<1x16xi1>, vector<1x16xi32>
    %c1073741824_i32_84 = arith.constant 1073741824 : i32
    %294 = vector.broadcast %c1073741824_i32_84 : i32 to vector<1x16xi32>
    %295 = arith.select %281, %294, %293 : vector<1x16xi1>, vector<1x16xi32>
    %cst_85 = arith.constant dense<2147483647> : vector<1xi32>
    %296 = vector.multi_reduction <minsi>, %295, %cst_85 [1] : vector<1x16xi32> to vector<1xi32>
    %297 = vector.shape_cast %296 : vector<1xi32> to vector<1x1xi32>
    %c127_i32_86 = arith.constant 127 : i32
    %298 = vector.broadcast %c127_i32_86 : i32 to vector<1x1xi32>
    %299 = arith.andi %297, %298 : vector<1x1xi32>
    %300 = arith.select %269, %273, %299 : vector<1x1xi1>, vector<1x1xi32>
    %301 = vector.broadcast %300 : vector<1x1xi32> to vector<1x16xi32>
    %302 = arith.cmpi eq, %15, %301 : vector<1x16xi32>
    %303 = vector.broadcast %264 : vector<1x1xi1> to vector<1x16xi1>
    %304 = arith.andi %302, %303 : vector<1x16xi1>
    %305 = vector.broadcast %300 : vector<1x1xi32> to vector<16x1xi32>
    %306 = arith.cmpi eq, %47, %305 : vector<16x1xi32>
    %cst_87 = arith.constant 0.000000e+00 : f32
    %307 = vector.shape_cast %306 : vector<16x1xi1> to vector<16x1xi1>
    %308 = vector.broadcast %307 : vector<16x1xi1> to vector<16x32xi1>
    %309 = vector.broadcast %cst_87 : f32 to vector<16x32xf32>
    %310 = arith.select %308, %233, %309 : vector<16x32xi1>, vector<16x32xf32>
    %cst_88 = arith.constant dense<0.000000e+00> : vector<32xf32>
    %311 = vector.multi_reduction <add>, %310, %cst_88 [0] : vector<16x32xf32> to vector<32xf32>
    %312 = vector.shape_cast %311 : vector<32xf32> to vector<1x32xf32>
    %313 = vector.extract_strided_slice %12 {offsets = [2, 0], sizes = [1, 32], strides = [1, 1]} : vector<8x32xf32> to vector<1x32xf32>
    %314 = vector.broadcast %3 : f32 to vector<1x32xf32>
    %315 = arith.mulf %314, %312 : vector<1x32xf32>
    %cst_89 = arith.constant 1.000000e+00 : f32
    %316 = arith.subf %cst_89, %3 : f32
    %317 = vector.broadcast %316 : f32 to vector<1x32xf32>
    %318 = arith.mulf %317, %313 : vector<1x32xf32>
    %319 = arith.addf %315, %318 : vector<1x32xf32>
    %320 = arith.mulf %319, %319 : vector<1x32xf32>
    %cst_90 = arith.constant dense<0.000000e+00> : vector<1xf32>
    %321 = vector.multi_reduction <add>, %320, %cst_90 [1] : vector<1x32xf32> to vector<1xf32>
    %322 = vector.shape_cast %321 : vector<1xf32> to vector<1x1xf32>
    %cst_91 = arith.constant 9.99999996E-13 : f32
    %323 = vector.broadcast %cst_91 : f32 to vector<1x1xf32>
    %324 = arith.addf %322, %323 : vector<1x1xf32>
    %325 = math.rsqrt %324 : vector<1x1xf32>
    %326 = vector.broadcast %325 : vector<1x1xf32> to vector<1x32xf32>
    %327 = arith.mulf %319, %326 : vector<1x32xf32>
    %328 = vector.shape_cast %269 : vector<1x1xi1> to vector<1x1xi1>
    %329 = vector.broadcast %328 : vector<1x1xi1> to vector<1x32xi1>
    %330 = arith.select %329, %327, %313 : vector<1x32xi1>, vector<1x32xf32>
    %331 = vector.broadcast %264 : vector<1x1xi1> to vector<16x1xi1>
    %332 = arith.andi %306, %331 : vector<16x1xi1>
    %333 = vector.shape_cast %332 : vector<16x1xi1> to vector<16x1xi1>
    %334 = vector.broadcast %333 : vector<16x1xi1> to vector<16x32xi1>
    %335 = vector.shape_cast %330 : vector<1x32xf32> to vector<1x32xf32>
    %336 = vector.broadcast %335 : vector<1x32xf32> to vector<16x32xf32>
    %337 = arith.select %334, %336, %233 : vector<16x32xi1>, vector<16x32xf32>
    %338 = arith.select %269, %279, %263 : vector<1x1xi1>, vector<1x1xi32>
    %c2_i32 = arith.constant 2 : i32
    %339 = vector.broadcast %c2_i32 : i32 to vector<1x8xi32>
    %340 = arith.cmpi eq, %44, %339 : vector<1x8xi32>
    %341 = vector.broadcast %264 : vector<1x1xi1> to vector<1x8xi1>
    %342 = arith.andi %340, %341 : vector<1x8xi1>
    %343 = vector.shape_cast %338 : vector<1x1xi32> to vector<1x1xi32>
    %344 = vector.broadcast %343 : vector<1x1xi32> to vector<1x8xi32>
    %345 = arith.select %342, %344, %241 : vector<1x8xi1>, vector<1x8xi32>
    %346 = vector.shape_cast %338 : vector<1x1xi32> to vector<1x1xi32>
    %347 = vector.broadcast %346 : vector<1x1xi32> to vector<1x16xi32>
    %348 = arith.select %304, %347, %244 : vector<1x16xi1>, vector<1x16xi32>
    %cst_92 = arith.constant 1.000000e+00 : f32
    %349 = vector.broadcast %cst_92 : f32 to vector<1x16xf32>
    %350 = arith.select %304, %349, %246 : vector<1x16xi1>, vector<1x16xf32>
    %351 = vector.shape_cast %53 : vector<1x1xi32> to vector<1x1xi32>
    %352 = vector.broadcast %351 : vector<1x1xi32> to vector<1x16xi32>
    %353 = arith.select %304, %352, %249 : vector<1x16xi1>, vector<1x16xi32>
    %cst_93 = arith.constant 1.000000e+00 : f32
    %354 = vector.broadcast %cst_93 : f32 to vector<1x16xf32>
    %355 = arith.select %304, %354, %251 : vector<1x16xi1>, vector<1x16xf32>
    %356 = vector.broadcast %269 : vector<1x1xi1> to vector<1x16xi1>
    %357 = arith.andi %304, %356 : vector<1x16xi1>
    %c-1073741824_i32_94 = arith.constant -1073741824 : i32
    %358 = vector.shape_cast %357 : vector<1x16xi1> to vector<1x16xi1>
    %359 = vector.broadcast %358 : vector<1x16xi1> to vector<8x16xi1>
    %360 = vector.broadcast %c-1073741824_i32_94 : i32 to vector<8x16xi32>
    %361 = arith.select %359, %360, %257 : vector<8x16xi1>, vector<8x16xi32>
    %cst_95 = arith.constant dense<true> : vector<1x1xi1>
    %362 = arith.xori %269, %cst_95 : vector<1x1xi1>
    %363 = arith.andi %264, %362 : vector<1x1xi1>
    %c1_i32_96 = arith.constant 1 : i32
    %c0_i32_97 = arith.constant 0 : i32
    %364 = vector.broadcast %c1_i32_96 : i32 to vector<1x1xi32>
    %365 = vector.broadcast %c0_i32_97 : i32 to vector<1x1xi32>
    %366 = arith.select %363, %364, %365 : vector<1x1xi1>, vector<1x1xi32>
    %367 = arith.addi %263, %366 : vector<1x1xi32>
    %368 = vector.extract_strided_slice %46 {offsets = [0, 3], sizes = [1, 1], strides = [1, 1]} : vector<1x8xi1> to vector<1x1xi1>
    %369 = vector.extract_strided_slice %361 {offsets = [3, 0], sizes = [1, 16], strides = [1, 1]} : vector<8x16xi32> to vector<1x16xi32>
    %cst_98 = arith.constant dense<-2147483648> : vector<1xi32>
    %370 = vector.multi_reduction <maxsi>, %369, %cst_98 [1] : vector<1x16xi32> to vector<1xi32>
    %371 = vector.shape_cast %370 : vector<1xi32> to vector<1x1xi32>
    %372 = arith.cmpi sge, %371, %43 : vector<1x1xi32>
    %373 = arith.andi %368, %372 : vector<1x1xi1>
    %c127_i32_99 = arith.constant 127 : i32
    %374 = vector.broadcast %c127_i32_99 : i32 to vector<1x1xi32>
    %375 = arith.andi %371, %374 : vector<1x1xi32>
    %c127_i32_100 = arith.constant 127 : i32
    %376 = vector.broadcast %c127_i32_100 : i32 to vector<1x1xi32>
    %377 = arith.subi %376, %375 : vector<1x1xi32>
    %378 = vector.broadcast %377 : vector<1x1xi32> to vector<1x16xi32>
    %379 = arith.cmpi eq, %15, %378 : vector<1x16xi32>
    %c0_i32_101 = arith.constant 0 : i32
    %380 = vector.broadcast %c0_i32_101 : i32 to vector<1x16xi32>
    %381 = arith.select %379, %348, %380 : vector<1x16xi1>, vector<1x16xi32>
    %cst_102 = arith.constant dense<0> : vector<1xi32>
    %382 = vector.multi_reduction <add>, %381, %cst_102 [1] : vector<1x16xi32> to vector<1xi32>
    %383 = vector.shape_cast %382 : vector<1xi32> to vector<1x1xi32>
    %cst_103 = arith.constant 0.000000e+00 : f32
    %384 = vector.broadcast %cst_103 : f32 to vector<1x16xf32>
    %385 = arith.cmpf ogt, %355, %384 : vector<1x16xf32>
    %cst_104 = arith.constant 0.000000e+00 : f32
    %386 = vector.broadcast %cst_104 : f32 to vector<1x16xf32>
    %387 = arith.cmpf ogt, %350, %386 : vector<1x16xf32>
    %c0_i32_105 = arith.constant 0 : i32
    %c32767_i32_106 = arith.constant 32767 : i32
    %388 = vector.broadcast %c0_i32_105 : i32 to vector<1x16xi32>
    %389 = arith.maxsi %388, %353 : vector<1x16xi32>
    %390 = vector.broadcast %c32767_i32_106 : i32 to vector<1x16xi32>
    %391 = arith.minsi %390, %389 : vector<1x16xi32>
    %c128_i32_107 = arith.constant 128 : i32
    %392 = vector.broadcast %c128_i32_107 : i32 to vector<1x16xi32>
    %393 = arith.muli %391, %392 : vector<1x16xi32>
    %c16777216_i32_108 = arith.constant 16777216 : i32
    %394 = vector.broadcast %c16777216_i32_108 : i32 to vector<1x16xi32>
    %395 = arith.addi %394, %393 : vector<1x16xi32>
    %396 = arith.addi %395, %15 : vector<1x16xi32>
    %397 = arith.select %387, %396, %15 : vector<1x16xi1>, vector<1x16xi32>
    %c1073741824_i32_109 = arith.constant 1073741824 : i32
    %398 = vector.broadcast %c1073741824_i32_109 : i32 to vector<1x16xi32>
    %399 = arith.select %385, %398, %397 : vector<1x16xi1>, vector<1x16xi32>
    %cst_110 = arith.constant dense<2147483647> : vector<1xi32>
    %400 = vector.multi_reduction <minsi>, %399, %cst_110 [1] : vector<1x16xi32> to vector<1xi32>
    %401 = vector.shape_cast %400 : vector<1xi32> to vector<1x1xi32>
    %c127_i32_111 = arith.constant 127 : i32
    %402 = vector.broadcast %c127_i32_111 : i32 to vector<1x1xi32>
    %403 = arith.andi %401, %402 : vector<1x1xi32>
    %404 = arith.select %373, %377, %403 : vector<1x1xi1>, vector<1x1xi32>
    %405 = vector.broadcast %404 : vector<1x1xi32> to vector<1x16xi32>
    %406 = arith.cmpi eq, %15, %405 : vector<1x16xi32>
    %407 = vector.broadcast %368 : vector<1x1xi1> to vector<1x16xi1>
    %408 = arith.andi %406, %407 : vector<1x16xi1>
    %409 = vector.broadcast %404 : vector<1x1xi32> to vector<16x1xi32>
    %410 = arith.cmpi eq, %47, %409 : vector<16x1xi32>
    %cst_112 = arith.constant 0.000000e+00 : f32
    %411 = vector.shape_cast %410 : vector<16x1xi1> to vector<16x1xi1>
    %412 = vector.broadcast %411 : vector<16x1xi1> to vector<16x32xi1>
    %413 = vector.broadcast %cst_112 : f32 to vector<16x32xf32>
    %414 = arith.select %412, %337, %413 : vector<16x32xi1>, vector<16x32xf32>
    %cst_113 = arith.constant dense<0.000000e+00> : vector<32xf32>
    %415 = vector.multi_reduction <add>, %414, %cst_113 [0] : vector<16x32xf32> to vector<32xf32>
    %416 = vector.shape_cast %415 : vector<32xf32> to vector<1x32xf32>
    %417 = vector.extract_strided_slice %12 {offsets = [3, 0], sizes = [1, 32], strides = [1, 1]} : vector<8x32xf32> to vector<1x32xf32>
    %418 = vector.broadcast %3 : f32 to vector<1x32xf32>
    %419 = arith.mulf %418, %416 : vector<1x32xf32>
    %cst_114 = arith.constant 1.000000e+00 : f32
    %420 = arith.subf %cst_114, %3 : f32
    %421 = vector.broadcast %420 : f32 to vector<1x32xf32>
    %422 = arith.mulf %421, %417 : vector<1x32xf32>
    %423 = arith.addf %419, %422 : vector<1x32xf32>
    %424 = arith.mulf %423, %423 : vector<1x32xf32>
    %cst_115 = arith.constant dense<0.000000e+00> : vector<1xf32>
    %425 = vector.multi_reduction <add>, %424, %cst_115 [1] : vector<1x32xf32> to vector<1xf32>
    %426 = vector.shape_cast %425 : vector<1xf32> to vector<1x1xf32>
    %cst_116 = arith.constant 9.99999996E-13 : f32
    %427 = vector.broadcast %cst_116 : f32 to vector<1x1xf32>
    %428 = arith.addf %426, %427 : vector<1x1xf32>
    %429 = math.rsqrt %428 : vector<1x1xf32>
    %430 = vector.broadcast %429 : vector<1x1xf32> to vector<1x32xf32>
    %431 = arith.mulf %423, %430 : vector<1x32xf32>
    %432 = vector.shape_cast %373 : vector<1x1xi1> to vector<1x1xi1>
    %433 = vector.broadcast %432 : vector<1x1xi1> to vector<1x32xi1>
    %434 = arith.select %433, %431, %417 : vector<1x32xi1>, vector<1x32xf32>
    %435 = vector.broadcast %368 : vector<1x1xi1> to vector<16x1xi1>
    %436 = arith.andi %410, %435 : vector<16x1xi1>
    %437 = vector.shape_cast %436 : vector<16x1xi1> to vector<16x1xi1>
    %438 = vector.broadcast %437 : vector<16x1xi1> to vector<16x32xi1>
    %439 = vector.shape_cast %434 : vector<1x32xf32> to vector<1x32xf32>
    %440 = vector.broadcast %439 : vector<1x32xf32> to vector<16x32xf32>
    %441 = arith.select %438, %440, %337 : vector<16x32xi1>, vector<16x32xf32>
    %442 = arith.select %373, %383, %367 : vector<1x1xi1>, vector<1x1xi32>
    %c3_i32 = arith.constant 3 : i32
    %443 = vector.broadcast %c3_i32 : i32 to vector<1x8xi32>
    %444 = arith.cmpi eq, %44, %443 : vector<1x8xi32>
    %445 = vector.broadcast %368 : vector<1x1xi1> to vector<1x8xi1>
    %446 = arith.andi %444, %445 : vector<1x8xi1>
    %447 = vector.shape_cast %442 : vector<1x1xi32> to vector<1x1xi32>
    %448 = vector.broadcast %447 : vector<1x1xi32> to vector<1x8xi32>
    %449 = arith.select %446, %448, %345 : vector<1x8xi1>, vector<1x8xi32>
    %450 = vector.shape_cast %442 : vector<1x1xi32> to vector<1x1xi32>
    %451 = vector.broadcast %450 : vector<1x1xi32> to vector<1x16xi32>
    %452 = arith.select %408, %451, %348 : vector<1x16xi1>, vector<1x16xi32>
    %cst_117 = arith.constant 1.000000e+00 : f32
    %453 = vector.broadcast %cst_117 : f32 to vector<1x16xf32>
    %454 = arith.select %408, %453, %350 : vector<1x16xi1>, vector<1x16xf32>
    %455 = vector.shape_cast %53 : vector<1x1xi32> to vector<1x1xi32>
    %456 = vector.broadcast %455 : vector<1x1xi32> to vector<1x16xi32>
    %457 = arith.select %408, %456, %353 : vector<1x16xi1>, vector<1x16xi32>
    %cst_118 = arith.constant 1.000000e+00 : f32
    %458 = vector.broadcast %cst_118 : f32 to vector<1x16xf32>
    %459 = arith.select %408, %458, %355 : vector<1x16xi1>, vector<1x16xf32>
    %460 = vector.broadcast %373 : vector<1x1xi1> to vector<1x16xi1>
    %461 = arith.andi %408, %460 : vector<1x16xi1>
    %c-1073741824_i32_119 = arith.constant -1073741824 : i32
    %462 = vector.shape_cast %461 : vector<1x16xi1> to vector<1x16xi1>
    %463 = vector.broadcast %462 : vector<1x16xi1> to vector<8x16xi1>
    %464 = vector.broadcast %c-1073741824_i32_119 : i32 to vector<8x16xi32>
    %465 = arith.select %463, %464, %361 : vector<8x16xi1>, vector<8x16xi32>
    %cst_120 = arith.constant dense<true> : vector<1x1xi1>
    %466 = arith.xori %373, %cst_120 : vector<1x1xi1>
    %467 = arith.andi %368, %466 : vector<1x1xi1>
    %c1_i32_121 = arith.constant 1 : i32
    %c0_i32_122 = arith.constant 0 : i32
    %468 = vector.broadcast %c1_i32_121 : i32 to vector<1x1xi32>
    %469 = vector.broadcast %c0_i32_122 : i32 to vector<1x1xi32>
    %470 = arith.select %467, %468, %469 : vector<1x1xi1>, vector<1x1xi32>
    %471 = arith.addi %367, %470 : vector<1x1xi32>
    %472 = vector.extract_strided_slice %46 {offsets = [0, 4], sizes = [1, 1], strides = [1, 1]} : vector<1x8xi1> to vector<1x1xi1>
    %473 = vector.extract_strided_slice %465 {offsets = [4, 0], sizes = [1, 16], strides = [1, 1]} : vector<8x16xi32> to vector<1x16xi32>
    %cst_123 = arith.constant dense<-2147483648> : vector<1xi32>
    %474 = vector.multi_reduction <maxsi>, %473, %cst_123 [1] : vector<1x16xi32> to vector<1xi32>
    %475 = vector.shape_cast %474 : vector<1xi32> to vector<1x1xi32>
    %476 = arith.cmpi sge, %475, %43 : vector<1x1xi32>
    %477 = arith.andi %472, %476 : vector<1x1xi1>
    %c127_i32_124 = arith.constant 127 : i32
    %478 = vector.broadcast %c127_i32_124 : i32 to vector<1x1xi32>
    %479 = arith.andi %475, %478 : vector<1x1xi32>
    %c127_i32_125 = arith.constant 127 : i32
    %480 = vector.broadcast %c127_i32_125 : i32 to vector<1x1xi32>
    %481 = arith.subi %480, %479 : vector<1x1xi32>
    %482 = vector.broadcast %481 : vector<1x1xi32> to vector<1x16xi32>
    %483 = arith.cmpi eq, %15, %482 : vector<1x16xi32>
    %c0_i32_126 = arith.constant 0 : i32
    %484 = vector.broadcast %c0_i32_126 : i32 to vector<1x16xi32>
    %485 = arith.select %483, %452, %484 : vector<1x16xi1>, vector<1x16xi32>
    %cst_127 = arith.constant dense<0> : vector<1xi32>
    %486 = vector.multi_reduction <add>, %485, %cst_127 [1] : vector<1x16xi32> to vector<1xi32>
    %487 = vector.shape_cast %486 : vector<1xi32> to vector<1x1xi32>
    %cst_128 = arith.constant 0.000000e+00 : f32
    %488 = vector.broadcast %cst_128 : f32 to vector<1x16xf32>
    %489 = arith.cmpf ogt, %459, %488 : vector<1x16xf32>
    %cst_129 = arith.constant 0.000000e+00 : f32
    %490 = vector.broadcast %cst_129 : f32 to vector<1x16xf32>
    %491 = arith.cmpf ogt, %454, %490 : vector<1x16xf32>
    %c0_i32_130 = arith.constant 0 : i32
    %c32767_i32_131 = arith.constant 32767 : i32
    %492 = vector.broadcast %c0_i32_130 : i32 to vector<1x16xi32>
    %493 = arith.maxsi %492, %457 : vector<1x16xi32>
    %494 = vector.broadcast %c32767_i32_131 : i32 to vector<1x16xi32>
    %495 = arith.minsi %494, %493 : vector<1x16xi32>
    %c128_i32_132 = arith.constant 128 : i32
    %496 = vector.broadcast %c128_i32_132 : i32 to vector<1x16xi32>
    %497 = arith.muli %495, %496 : vector<1x16xi32>
    %c16777216_i32_133 = arith.constant 16777216 : i32
    %498 = vector.broadcast %c16777216_i32_133 : i32 to vector<1x16xi32>
    %499 = arith.addi %498, %497 : vector<1x16xi32>
    %500 = arith.addi %499, %15 : vector<1x16xi32>
    %501 = arith.select %491, %500, %15 : vector<1x16xi1>, vector<1x16xi32>
    %c1073741824_i32_134 = arith.constant 1073741824 : i32
    %502 = vector.broadcast %c1073741824_i32_134 : i32 to vector<1x16xi32>
    %503 = arith.select %489, %502, %501 : vector<1x16xi1>, vector<1x16xi32>
    %cst_135 = arith.constant dense<2147483647> : vector<1xi32>
    %504 = vector.multi_reduction <minsi>, %503, %cst_135 [1] : vector<1x16xi32> to vector<1xi32>
    %505 = vector.shape_cast %504 : vector<1xi32> to vector<1x1xi32>
    %c127_i32_136 = arith.constant 127 : i32
    %506 = vector.broadcast %c127_i32_136 : i32 to vector<1x1xi32>
    %507 = arith.andi %505, %506 : vector<1x1xi32>
    %508 = arith.select %477, %481, %507 : vector<1x1xi1>, vector<1x1xi32>
    %509 = vector.broadcast %508 : vector<1x1xi32> to vector<1x16xi32>
    %510 = arith.cmpi eq, %15, %509 : vector<1x16xi32>
    %511 = vector.broadcast %472 : vector<1x1xi1> to vector<1x16xi1>
    %512 = arith.andi %510, %511 : vector<1x16xi1>
    %513 = vector.broadcast %508 : vector<1x1xi32> to vector<16x1xi32>
    %514 = arith.cmpi eq, %47, %513 : vector<16x1xi32>
    %cst_137 = arith.constant 0.000000e+00 : f32
    %515 = vector.shape_cast %514 : vector<16x1xi1> to vector<16x1xi1>
    %516 = vector.broadcast %515 : vector<16x1xi1> to vector<16x32xi1>
    %517 = vector.broadcast %cst_137 : f32 to vector<16x32xf32>
    %518 = arith.select %516, %441, %517 : vector<16x32xi1>, vector<16x32xf32>
    %cst_138 = arith.constant dense<0.000000e+00> : vector<32xf32>
    %519 = vector.multi_reduction <add>, %518, %cst_138 [0] : vector<16x32xf32> to vector<32xf32>
    %520 = vector.shape_cast %519 : vector<32xf32> to vector<1x32xf32>
    %521 = vector.extract_strided_slice %12 {offsets = [4, 0], sizes = [1, 32], strides = [1, 1]} : vector<8x32xf32> to vector<1x32xf32>
    %522 = vector.broadcast %3 : f32 to vector<1x32xf32>
    %523 = arith.mulf %522, %520 : vector<1x32xf32>
    %cst_139 = arith.constant 1.000000e+00 : f32
    %524 = arith.subf %cst_139, %3 : f32
    %525 = vector.broadcast %524 : f32 to vector<1x32xf32>
    %526 = arith.mulf %525, %521 : vector<1x32xf32>
    %527 = arith.addf %523, %526 : vector<1x32xf32>
    %528 = arith.mulf %527, %527 : vector<1x32xf32>
    %cst_140 = arith.constant dense<0.000000e+00> : vector<1xf32>
    %529 = vector.multi_reduction <add>, %528, %cst_140 [1] : vector<1x32xf32> to vector<1xf32>
    %530 = vector.shape_cast %529 : vector<1xf32> to vector<1x1xf32>
    %cst_141 = arith.constant 9.99999996E-13 : f32
    %531 = vector.broadcast %cst_141 : f32 to vector<1x1xf32>
    %532 = arith.addf %530, %531 : vector<1x1xf32>
    %533 = math.rsqrt %532 : vector<1x1xf32>
    %534 = vector.broadcast %533 : vector<1x1xf32> to vector<1x32xf32>
    %535 = arith.mulf %527, %534 : vector<1x32xf32>
    %536 = vector.shape_cast %477 : vector<1x1xi1> to vector<1x1xi1>
    %537 = vector.broadcast %536 : vector<1x1xi1> to vector<1x32xi1>
    %538 = arith.select %537, %535, %521 : vector<1x32xi1>, vector<1x32xf32>
    %539 = vector.broadcast %472 : vector<1x1xi1> to vector<16x1xi1>
    %540 = arith.andi %514, %539 : vector<16x1xi1>
    %541 = vector.shape_cast %540 : vector<16x1xi1> to vector<16x1xi1>
    %542 = vector.broadcast %541 : vector<16x1xi1> to vector<16x32xi1>
    %543 = vector.shape_cast %538 : vector<1x32xf32> to vector<1x32xf32>
    %544 = vector.broadcast %543 : vector<1x32xf32> to vector<16x32xf32>
    %545 = arith.select %542, %544, %441 : vector<16x32xi1>, vector<16x32xf32>
    %546 = arith.select %477, %487, %471 : vector<1x1xi1>, vector<1x1xi32>
    %c4_i32 = arith.constant 4 : i32
    %547 = vector.broadcast %c4_i32 : i32 to vector<1x8xi32>
    %548 = arith.cmpi eq, %44, %547 : vector<1x8xi32>
    %549 = vector.broadcast %472 : vector<1x1xi1> to vector<1x8xi1>
    %550 = arith.andi %548, %549 : vector<1x8xi1>
    %551 = vector.shape_cast %546 : vector<1x1xi32> to vector<1x1xi32>
    %552 = vector.broadcast %551 : vector<1x1xi32> to vector<1x8xi32>
    %553 = arith.select %550, %552, %449 : vector<1x8xi1>, vector<1x8xi32>
    %554 = vector.shape_cast %546 : vector<1x1xi32> to vector<1x1xi32>
    %555 = vector.broadcast %554 : vector<1x1xi32> to vector<1x16xi32>
    %556 = arith.select %512, %555, %452 : vector<1x16xi1>, vector<1x16xi32>
    %cst_142 = arith.constant 1.000000e+00 : f32
    %557 = vector.broadcast %cst_142 : f32 to vector<1x16xf32>
    %558 = arith.select %512, %557, %454 : vector<1x16xi1>, vector<1x16xf32>
    %559 = vector.shape_cast %53 : vector<1x1xi32> to vector<1x1xi32>
    %560 = vector.broadcast %559 : vector<1x1xi32> to vector<1x16xi32>
    %561 = arith.select %512, %560, %457 : vector<1x16xi1>, vector<1x16xi32>
    %cst_143 = arith.constant 1.000000e+00 : f32
    %562 = vector.broadcast %cst_143 : f32 to vector<1x16xf32>
    %563 = arith.select %512, %562, %459 : vector<1x16xi1>, vector<1x16xf32>
    %564 = vector.broadcast %477 : vector<1x1xi1> to vector<1x16xi1>
    %565 = arith.andi %512, %564 : vector<1x16xi1>
    %c-1073741824_i32_144 = arith.constant -1073741824 : i32
    %566 = vector.shape_cast %565 : vector<1x16xi1> to vector<1x16xi1>
    %567 = vector.broadcast %566 : vector<1x16xi1> to vector<8x16xi1>
    %568 = vector.broadcast %c-1073741824_i32_144 : i32 to vector<8x16xi32>
    %569 = arith.select %567, %568, %465 : vector<8x16xi1>, vector<8x16xi32>
    %cst_145 = arith.constant dense<true> : vector<1x1xi1>
    %570 = arith.xori %477, %cst_145 : vector<1x1xi1>
    %571 = arith.andi %472, %570 : vector<1x1xi1>
    %c1_i32_146 = arith.constant 1 : i32
    %c0_i32_147 = arith.constant 0 : i32
    %572 = vector.broadcast %c1_i32_146 : i32 to vector<1x1xi32>
    %573 = vector.broadcast %c0_i32_147 : i32 to vector<1x1xi32>
    %574 = arith.select %571, %572, %573 : vector<1x1xi1>, vector<1x1xi32>
    %575 = arith.addi %471, %574 : vector<1x1xi32>
    %576 = vector.extract_strided_slice %46 {offsets = [0, 5], sizes = [1, 1], strides = [1, 1]} : vector<1x8xi1> to vector<1x1xi1>
    %577 = vector.extract_strided_slice %569 {offsets = [5, 0], sizes = [1, 16], strides = [1, 1]} : vector<8x16xi32> to vector<1x16xi32>
    %cst_148 = arith.constant dense<-2147483648> : vector<1xi32>
    %578 = vector.multi_reduction <maxsi>, %577, %cst_148 [1] : vector<1x16xi32> to vector<1xi32>
    %579 = vector.shape_cast %578 : vector<1xi32> to vector<1x1xi32>
    %580 = arith.cmpi sge, %579, %43 : vector<1x1xi32>
    %581 = arith.andi %576, %580 : vector<1x1xi1>
    %c127_i32_149 = arith.constant 127 : i32
    %582 = vector.broadcast %c127_i32_149 : i32 to vector<1x1xi32>
    %583 = arith.andi %579, %582 : vector<1x1xi32>
    %c127_i32_150 = arith.constant 127 : i32
    %584 = vector.broadcast %c127_i32_150 : i32 to vector<1x1xi32>
    %585 = arith.subi %584, %583 : vector<1x1xi32>
    %586 = vector.broadcast %585 : vector<1x1xi32> to vector<1x16xi32>
    %587 = arith.cmpi eq, %15, %586 : vector<1x16xi32>
    %c0_i32_151 = arith.constant 0 : i32
    %588 = vector.broadcast %c0_i32_151 : i32 to vector<1x16xi32>
    %589 = arith.select %587, %556, %588 : vector<1x16xi1>, vector<1x16xi32>
    %cst_152 = arith.constant dense<0> : vector<1xi32>
    %590 = vector.multi_reduction <add>, %589, %cst_152 [1] : vector<1x16xi32> to vector<1xi32>
    %591 = vector.shape_cast %590 : vector<1xi32> to vector<1x1xi32>
    %cst_153 = arith.constant 0.000000e+00 : f32
    %592 = vector.broadcast %cst_153 : f32 to vector<1x16xf32>
    %593 = arith.cmpf ogt, %563, %592 : vector<1x16xf32>
    %cst_154 = arith.constant 0.000000e+00 : f32
    %594 = vector.broadcast %cst_154 : f32 to vector<1x16xf32>
    %595 = arith.cmpf ogt, %558, %594 : vector<1x16xf32>
    %c0_i32_155 = arith.constant 0 : i32
    %c32767_i32_156 = arith.constant 32767 : i32
    %596 = vector.broadcast %c0_i32_155 : i32 to vector<1x16xi32>
    %597 = arith.maxsi %596, %561 : vector<1x16xi32>
    %598 = vector.broadcast %c32767_i32_156 : i32 to vector<1x16xi32>
    %599 = arith.minsi %598, %597 : vector<1x16xi32>
    %c128_i32_157 = arith.constant 128 : i32
    %600 = vector.broadcast %c128_i32_157 : i32 to vector<1x16xi32>
    %601 = arith.muli %599, %600 : vector<1x16xi32>
    %c16777216_i32_158 = arith.constant 16777216 : i32
    %602 = vector.broadcast %c16777216_i32_158 : i32 to vector<1x16xi32>
    %603 = arith.addi %602, %601 : vector<1x16xi32>
    %604 = arith.addi %603, %15 : vector<1x16xi32>
    %605 = arith.select %595, %604, %15 : vector<1x16xi1>, vector<1x16xi32>
    %c1073741824_i32_159 = arith.constant 1073741824 : i32
    %606 = vector.broadcast %c1073741824_i32_159 : i32 to vector<1x16xi32>
    %607 = arith.select %593, %606, %605 : vector<1x16xi1>, vector<1x16xi32>
    %cst_160 = arith.constant dense<2147483647> : vector<1xi32>
    %608 = vector.multi_reduction <minsi>, %607, %cst_160 [1] : vector<1x16xi32> to vector<1xi32>
    %609 = vector.shape_cast %608 : vector<1xi32> to vector<1x1xi32>
    %c127_i32_161 = arith.constant 127 : i32
    %610 = vector.broadcast %c127_i32_161 : i32 to vector<1x1xi32>
    %611 = arith.andi %609, %610 : vector<1x1xi32>
    %612 = arith.select %581, %585, %611 : vector<1x1xi1>, vector<1x1xi32>
    %613 = vector.broadcast %612 : vector<1x1xi32> to vector<1x16xi32>
    %614 = arith.cmpi eq, %15, %613 : vector<1x16xi32>
    %615 = vector.broadcast %576 : vector<1x1xi1> to vector<1x16xi1>
    %616 = arith.andi %614, %615 : vector<1x16xi1>
    %617 = vector.broadcast %612 : vector<1x1xi32> to vector<16x1xi32>
    %618 = arith.cmpi eq, %47, %617 : vector<16x1xi32>
    %cst_162 = arith.constant 0.000000e+00 : f32
    %619 = vector.shape_cast %618 : vector<16x1xi1> to vector<16x1xi1>
    %620 = vector.broadcast %619 : vector<16x1xi1> to vector<16x32xi1>
    %621 = vector.broadcast %cst_162 : f32 to vector<16x32xf32>
    %622 = arith.select %620, %545, %621 : vector<16x32xi1>, vector<16x32xf32>
    %cst_163 = arith.constant dense<0.000000e+00> : vector<32xf32>
    %623 = vector.multi_reduction <add>, %622, %cst_163 [0] : vector<16x32xf32> to vector<32xf32>
    %624 = vector.shape_cast %623 : vector<32xf32> to vector<1x32xf32>
    %625 = vector.extract_strided_slice %12 {offsets = [5, 0], sizes = [1, 32], strides = [1, 1]} : vector<8x32xf32> to vector<1x32xf32>
    %626 = vector.broadcast %3 : f32 to vector<1x32xf32>
    %627 = arith.mulf %626, %624 : vector<1x32xf32>
    %cst_164 = arith.constant 1.000000e+00 : f32
    %628 = arith.subf %cst_164, %3 : f32
    %629 = vector.broadcast %628 : f32 to vector<1x32xf32>
    %630 = arith.mulf %629, %625 : vector<1x32xf32>
    %631 = arith.addf %627, %630 : vector<1x32xf32>
    %632 = arith.mulf %631, %631 : vector<1x32xf32>
    %cst_165 = arith.constant dense<0.000000e+00> : vector<1xf32>
    %633 = vector.multi_reduction <add>, %632, %cst_165 [1] : vector<1x32xf32> to vector<1xf32>
    %634 = vector.shape_cast %633 : vector<1xf32> to vector<1x1xf32>
    %cst_166 = arith.constant 9.99999996E-13 : f32
    %635 = vector.broadcast %cst_166 : f32 to vector<1x1xf32>
    %636 = arith.addf %634, %635 : vector<1x1xf32>
    %637 = math.rsqrt %636 : vector<1x1xf32>
    %638 = vector.broadcast %637 : vector<1x1xf32> to vector<1x32xf32>
    %639 = arith.mulf %631, %638 : vector<1x32xf32>
    %640 = vector.shape_cast %581 : vector<1x1xi1> to vector<1x1xi1>
    %641 = vector.broadcast %640 : vector<1x1xi1> to vector<1x32xi1>
    %642 = arith.select %641, %639, %625 : vector<1x32xi1>, vector<1x32xf32>
    %643 = vector.broadcast %576 : vector<1x1xi1> to vector<16x1xi1>
    %644 = arith.andi %618, %643 : vector<16x1xi1>
    %645 = vector.shape_cast %644 : vector<16x1xi1> to vector<16x1xi1>
    %646 = vector.broadcast %645 : vector<16x1xi1> to vector<16x32xi1>
    %647 = vector.shape_cast %642 : vector<1x32xf32> to vector<1x32xf32>
    %648 = vector.broadcast %647 : vector<1x32xf32> to vector<16x32xf32>
    %649 = arith.select %646, %648, %545 : vector<16x32xi1>, vector<16x32xf32>
    %650 = arith.select %581, %591, %575 : vector<1x1xi1>, vector<1x1xi32>
    %c5_i32 = arith.constant 5 : i32
    %651 = vector.broadcast %c5_i32 : i32 to vector<1x8xi32>
    %652 = arith.cmpi eq, %44, %651 : vector<1x8xi32>
    %653 = vector.broadcast %576 : vector<1x1xi1> to vector<1x8xi1>
    %654 = arith.andi %652, %653 : vector<1x8xi1>
    %655 = vector.shape_cast %650 : vector<1x1xi32> to vector<1x1xi32>
    %656 = vector.broadcast %655 : vector<1x1xi32> to vector<1x8xi32>
    %657 = arith.select %654, %656, %553 : vector<1x8xi1>, vector<1x8xi32>
    %658 = vector.shape_cast %650 : vector<1x1xi32> to vector<1x1xi32>
    %659 = vector.broadcast %658 : vector<1x1xi32> to vector<1x16xi32>
    %660 = arith.select %616, %659, %556 : vector<1x16xi1>, vector<1x16xi32>
    %cst_167 = arith.constant 1.000000e+00 : f32
    %661 = vector.broadcast %cst_167 : f32 to vector<1x16xf32>
    %662 = arith.select %616, %661, %558 : vector<1x16xi1>, vector<1x16xf32>
    %663 = vector.shape_cast %53 : vector<1x1xi32> to vector<1x1xi32>
    %664 = vector.broadcast %663 : vector<1x1xi32> to vector<1x16xi32>
    %665 = arith.select %616, %664, %561 : vector<1x16xi1>, vector<1x16xi32>
    %cst_168 = arith.constant 1.000000e+00 : f32
    %666 = vector.broadcast %cst_168 : f32 to vector<1x16xf32>
    %667 = arith.select %616, %666, %563 : vector<1x16xi1>, vector<1x16xf32>
    %668 = vector.broadcast %581 : vector<1x1xi1> to vector<1x16xi1>
    %669 = arith.andi %616, %668 : vector<1x16xi1>
    %c-1073741824_i32_169 = arith.constant -1073741824 : i32
    %670 = vector.shape_cast %669 : vector<1x16xi1> to vector<1x16xi1>
    %671 = vector.broadcast %670 : vector<1x16xi1> to vector<8x16xi1>
    %672 = vector.broadcast %c-1073741824_i32_169 : i32 to vector<8x16xi32>
    %673 = arith.select %671, %672, %569 : vector<8x16xi1>, vector<8x16xi32>
    %cst_170 = arith.constant dense<true> : vector<1x1xi1>
    %674 = arith.xori %581, %cst_170 : vector<1x1xi1>
    %675 = arith.andi %576, %674 : vector<1x1xi1>
    %c1_i32_171 = arith.constant 1 : i32
    %c0_i32_172 = arith.constant 0 : i32
    %676 = vector.broadcast %c1_i32_171 : i32 to vector<1x1xi32>
    %677 = vector.broadcast %c0_i32_172 : i32 to vector<1x1xi32>
    %678 = arith.select %675, %676, %677 : vector<1x1xi1>, vector<1x1xi32>
    %679 = arith.addi %575, %678 : vector<1x1xi32>
    %680 = vector.extract_strided_slice %46 {offsets = [0, 6], sizes = [1, 1], strides = [1, 1]} : vector<1x8xi1> to vector<1x1xi1>
    %681 = vector.extract_strided_slice %673 {offsets = [6, 0], sizes = [1, 16], strides = [1, 1]} : vector<8x16xi32> to vector<1x16xi32>
    %cst_173 = arith.constant dense<-2147483648> : vector<1xi32>
    %682 = vector.multi_reduction <maxsi>, %681, %cst_173 [1] : vector<1x16xi32> to vector<1xi32>
    %683 = vector.shape_cast %682 : vector<1xi32> to vector<1x1xi32>
    %684 = arith.cmpi sge, %683, %43 : vector<1x1xi32>
    %685 = arith.andi %680, %684 : vector<1x1xi1>
    %c127_i32_174 = arith.constant 127 : i32
    %686 = vector.broadcast %c127_i32_174 : i32 to vector<1x1xi32>
    %687 = arith.andi %683, %686 : vector<1x1xi32>
    %c127_i32_175 = arith.constant 127 : i32
    %688 = vector.broadcast %c127_i32_175 : i32 to vector<1x1xi32>
    %689 = arith.subi %688, %687 : vector<1x1xi32>
    %690 = vector.broadcast %689 : vector<1x1xi32> to vector<1x16xi32>
    %691 = arith.cmpi eq, %15, %690 : vector<1x16xi32>
    %c0_i32_176 = arith.constant 0 : i32
    %692 = vector.broadcast %c0_i32_176 : i32 to vector<1x16xi32>
    %693 = arith.select %691, %660, %692 : vector<1x16xi1>, vector<1x16xi32>
    %cst_177 = arith.constant dense<0> : vector<1xi32>
    %694 = vector.multi_reduction <add>, %693, %cst_177 [1] : vector<1x16xi32> to vector<1xi32>
    %695 = vector.shape_cast %694 : vector<1xi32> to vector<1x1xi32>
    %cst_178 = arith.constant 0.000000e+00 : f32
    %696 = vector.broadcast %cst_178 : f32 to vector<1x16xf32>
    %697 = arith.cmpf ogt, %667, %696 : vector<1x16xf32>
    %cst_179 = arith.constant 0.000000e+00 : f32
    %698 = vector.broadcast %cst_179 : f32 to vector<1x16xf32>
    %699 = arith.cmpf ogt, %662, %698 : vector<1x16xf32>
    %c0_i32_180 = arith.constant 0 : i32
    %c32767_i32_181 = arith.constant 32767 : i32
    %700 = vector.broadcast %c0_i32_180 : i32 to vector<1x16xi32>
    %701 = arith.maxsi %700, %665 : vector<1x16xi32>
    %702 = vector.broadcast %c32767_i32_181 : i32 to vector<1x16xi32>
    %703 = arith.minsi %702, %701 : vector<1x16xi32>
    %c128_i32_182 = arith.constant 128 : i32
    %704 = vector.broadcast %c128_i32_182 : i32 to vector<1x16xi32>
    %705 = arith.muli %703, %704 : vector<1x16xi32>
    %c16777216_i32_183 = arith.constant 16777216 : i32
    %706 = vector.broadcast %c16777216_i32_183 : i32 to vector<1x16xi32>
    %707 = arith.addi %706, %705 : vector<1x16xi32>
    %708 = arith.addi %707, %15 : vector<1x16xi32>
    %709 = arith.select %699, %708, %15 : vector<1x16xi1>, vector<1x16xi32>
    %c1073741824_i32_184 = arith.constant 1073741824 : i32
    %710 = vector.broadcast %c1073741824_i32_184 : i32 to vector<1x16xi32>
    %711 = arith.select %697, %710, %709 : vector<1x16xi1>, vector<1x16xi32>
    %cst_185 = arith.constant dense<2147483647> : vector<1xi32>
    %712 = vector.multi_reduction <minsi>, %711, %cst_185 [1] : vector<1x16xi32> to vector<1xi32>
    %713 = vector.shape_cast %712 : vector<1xi32> to vector<1x1xi32>
    %c127_i32_186 = arith.constant 127 : i32
    %714 = vector.broadcast %c127_i32_186 : i32 to vector<1x1xi32>
    %715 = arith.andi %713, %714 : vector<1x1xi32>
    %716 = arith.select %685, %689, %715 : vector<1x1xi1>, vector<1x1xi32>
    %717 = vector.broadcast %716 : vector<1x1xi32> to vector<1x16xi32>
    %718 = arith.cmpi eq, %15, %717 : vector<1x16xi32>
    %719 = vector.broadcast %680 : vector<1x1xi1> to vector<1x16xi1>
    %720 = arith.andi %718, %719 : vector<1x16xi1>
    %721 = vector.broadcast %716 : vector<1x1xi32> to vector<16x1xi32>
    %722 = arith.cmpi eq, %47, %721 : vector<16x1xi32>
    %cst_187 = arith.constant 0.000000e+00 : f32
    %723 = vector.shape_cast %722 : vector<16x1xi1> to vector<16x1xi1>
    %724 = vector.broadcast %723 : vector<16x1xi1> to vector<16x32xi1>
    %725 = vector.broadcast %cst_187 : f32 to vector<16x32xf32>
    %726 = arith.select %724, %649, %725 : vector<16x32xi1>, vector<16x32xf32>
    %cst_188 = arith.constant dense<0.000000e+00> : vector<32xf32>
    %727 = vector.multi_reduction <add>, %726, %cst_188 [0] : vector<16x32xf32> to vector<32xf32>
    %728 = vector.shape_cast %727 : vector<32xf32> to vector<1x32xf32>
    %729 = vector.extract_strided_slice %12 {offsets = [6, 0], sizes = [1, 32], strides = [1, 1]} : vector<8x32xf32> to vector<1x32xf32>
    %730 = vector.broadcast %3 : f32 to vector<1x32xf32>
    %731 = arith.mulf %730, %728 : vector<1x32xf32>
    %cst_189 = arith.constant 1.000000e+00 : f32
    %732 = arith.subf %cst_189, %3 : f32
    %733 = vector.broadcast %732 : f32 to vector<1x32xf32>
    %734 = arith.mulf %733, %729 : vector<1x32xf32>
    %735 = arith.addf %731, %734 : vector<1x32xf32>
    %736 = arith.mulf %735, %735 : vector<1x32xf32>
    %cst_190 = arith.constant dense<0.000000e+00> : vector<1xf32>
    %737 = vector.multi_reduction <add>, %736, %cst_190 [1] : vector<1x32xf32> to vector<1xf32>
    %738 = vector.shape_cast %737 : vector<1xf32> to vector<1x1xf32>
    %cst_191 = arith.constant 9.99999996E-13 : f32
    %739 = vector.broadcast %cst_191 : f32 to vector<1x1xf32>
    %740 = arith.addf %738, %739 : vector<1x1xf32>
    %741 = math.rsqrt %740 : vector<1x1xf32>
    %742 = vector.broadcast %741 : vector<1x1xf32> to vector<1x32xf32>
    %743 = arith.mulf %735, %742 : vector<1x32xf32>
    %744 = vector.shape_cast %685 : vector<1x1xi1> to vector<1x1xi1>
    %745 = vector.broadcast %744 : vector<1x1xi1> to vector<1x32xi1>
    %746 = arith.select %745, %743, %729 : vector<1x32xi1>, vector<1x32xf32>
    %747 = vector.broadcast %680 : vector<1x1xi1> to vector<16x1xi1>
    %748 = arith.andi %722, %747 : vector<16x1xi1>
    %749 = vector.shape_cast %748 : vector<16x1xi1> to vector<16x1xi1>
    %750 = vector.broadcast %749 : vector<16x1xi1> to vector<16x32xi1>
    %751 = vector.shape_cast %746 : vector<1x32xf32> to vector<1x32xf32>
    %752 = vector.broadcast %751 : vector<1x32xf32> to vector<16x32xf32>
    %753 = arith.select %750, %752, %649 : vector<16x32xi1>, vector<16x32xf32>
    %754 = arith.select %685, %695, %679 : vector<1x1xi1>, vector<1x1xi32>
    %c6_i32 = arith.constant 6 : i32
    %755 = vector.broadcast %c6_i32 : i32 to vector<1x8xi32>
    %756 = arith.cmpi eq, %44, %755 : vector<1x8xi32>
    %757 = vector.broadcast %680 : vector<1x1xi1> to vector<1x8xi1>
    %758 = arith.andi %756, %757 : vector<1x8xi1>
    %759 = vector.shape_cast %754 : vector<1x1xi32> to vector<1x1xi32>
    %760 = vector.broadcast %759 : vector<1x1xi32> to vector<1x8xi32>
    %761 = arith.select %758, %760, %657 : vector<1x8xi1>, vector<1x8xi32>
    %762 = vector.shape_cast %754 : vector<1x1xi32> to vector<1x1xi32>
    %763 = vector.broadcast %762 : vector<1x1xi32> to vector<1x16xi32>
    %764 = arith.select %720, %763, %660 : vector<1x16xi1>, vector<1x16xi32>
    %cst_192 = arith.constant 1.000000e+00 : f32
    %765 = vector.broadcast %cst_192 : f32 to vector<1x16xf32>
    %766 = arith.select %720, %765, %662 : vector<1x16xi1>, vector<1x16xf32>
    %767 = vector.shape_cast %53 : vector<1x1xi32> to vector<1x1xi32>
    %768 = vector.broadcast %767 : vector<1x1xi32> to vector<1x16xi32>
    %769 = arith.select %720, %768, %665 : vector<1x16xi1>, vector<1x16xi32>
    %cst_193 = arith.constant 1.000000e+00 : f32
    %770 = vector.broadcast %cst_193 : f32 to vector<1x16xf32>
    %771 = arith.select %720, %770, %667 : vector<1x16xi1>, vector<1x16xf32>
    %772 = vector.broadcast %685 : vector<1x1xi1> to vector<1x16xi1>
    %773 = arith.andi %720, %772 : vector<1x16xi1>
    %c-1073741824_i32_194 = arith.constant -1073741824 : i32
    %774 = vector.shape_cast %773 : vector<1x16xi1> to vector<1x16xi1>
    %775 = vector.broadcast %774 : vector<1x16xi1> to vector<8x16xi1>
    %776 = vector.broadcast %c-1073741824_i32_194 : i32 to vector<8x16xi32>
    %777 = arith.select %775, %776, %673 : vector<8x16xi1>, vector<8x16xi32>
    %cst_195 = arith.constant dense<true> : vector<1x1xi1>
    %778 = arith.xori %685, %cst_195 : vector<1x1xi1>
    %779 = arith.andi %680, %778 : vector<1x1xi1>
    %c1_i32_196 = arith.constant 1 : i32
    %c0_i32_197 = arith.constant 0 : i32
    %780 = vector.broadcast %c1_i32_196 : i32 to vector<1x1xi32>
    %781 = vector.broadcast %c0_i32_197 : i32 to vector<1x1xi32>
    %782 = arith.select %779, %780, %781 : vector<1x1xi1>, vector<1x1xi32>
    %783 = arith.addi %679, %782 : vector<1x1xi32>
    %784 = vector.extract_strided_slice %46 {offsets = [0, 7], sizes = [1, 1], strides = [1, 1]} : vector<1x8xi1> to vector<1x1xi1>
    %785 = vector.extract_strided_slice %777 {offsets = [7, 0], sizes = [1, 16], strides = [1, 1]} : vector<8x16xi32> to vector<1x16xi32>
    %cst_198 = arith.constant dense<-2147483648> : vector<1xi32>
    %786 = vector.multi_reduction <maxsi>, %785, %cst_198 [1] : vector<1x16xi32> to vector<1xi32>
    %787 = vector.shape_cast %786 : vector<1xi32> to vector<1x1xi32>
    %788 = arith.cmpi sge, %787, %43 : vector<1x1xi32>
    %789 = arith.andi %784, %788 : vector<1x1xi1>
    %c127_i32_199 = arith.constant 127 : i32
    %790 = vector.broadcast %c127_i32_199 : i32 to vector<1x1xi32>
    %791 = arith.andi %787, %790 : vector<1x1xi32>
    %c127_i32_200 = arith.constant 127 : i32
    %792 = vector.broadcast %c127_i32_200 : i32 to vector<1x1xi32>
    %793 = arith.subi %792, %791 : vector<1x1xi32>
    %794 = vector.broadcast %793 : vector<1x1xi32> to vector<1x16xi32>
    %795 = arith.cmpi eq, %15, %794 : vector<1x16xi32>
    %c0_i32_201 = arith.constant 0 : i32
    %796 = vector.broadcast %c0_i32_201 : i32 to vector<1x16xi32>
    %797 = arith.select %795, %764, %796 : vector<1x16xi1>, vector<1x16xi32>
    %cst_202 = arith.constant dense<0> : vector<1xi32>
    %798 = vector.multi_reduction <add>, %797, %cst_202 [1] : vector<1x16xi32> to vector<1xi32>
    %799 = vector.shape_cast %798 : vector<1xi32> to vector<1x1xi32>
    %cst_203 = arith.constant 0.000000e+00 : f32
    %800 = vector.broadcast %cst_203 : f32 to vector<1x16xf32>
    %801 = arith.cmpf ogt, %771, %800 : vector<1x16xf32>
    %cst_204 = arith.constant 0.000000e+00 : f32
    %802 = vector.broadcast %cst_204 : f32 to vector<1x16xf32>
    %803 = arith.cmpf ogt, %766, %802 : vector<1x16xf32>
    %c0_i32_205 = arith.constant 0 : i32
    %c32767_i32_206 = arith.constant 32767 : i32
    %804 = vector.broadcast %c0_i32_205 : i32 to vector<1x16xi32>
    %805 = arith.maxsi %804, %769 : vector<1x16xi32>
    %806 = vector.broadcast %c32767_i32_206 : i32 to vector<1x16xi32>
    %807 = arith.minsi %806, %805 : vector<1x16xi32>
    %c128_i32_207 = arith.constant 128 : i32
    %808 = vector.broadcast %c128_i32_207 : i32 to vector<1x16xi32>
    %809 = arith.muli %807, %808 : vector<1x16xi32>
    %c16777216_i32_208 = arith.constant 16777216 : i32
    %810 = vector.broadcast %c16777216_i32_208 : i32 to vector<1x16xi32>
    %811 = arith.addi %810, %809 : vector<1x16xi32>
    %812 = arith.addi %811, %15 : vector<1x16xi32>
    %813 = arith.select %803, %812, %15 : vector<1x16xi1>, vector<1x16xi32>
    %c1073741824_i32_209 = arith.constant 1073741824 : i32
    %814 = vector.broadcast %c1073741824_i32_209 : i32 to vector<1x16xi32>
    %815 = arith.select %801, %814, %813 : vector<1x16xi1>, vector<1x16xi32>
    %cst_210 = arith.constant dense<2147483647> : vector<1xi32>
    %816 = vector.multi_reduction <minsi>, %815, %cst_210 [1] : vector<1x16xi32> to vector<1xi32>
    %817 = vector.shape_cast %816 : vector<1xi32> to vector<1x1xi32>
    %c127_i32_211 = arith.constant 127 : i32
    %818 = vector.broadcast %c127_i32_211 : i32 to vector<1x1xi32>
    %819 = arith.andi %817, %818 : vector<1x1xi32>
    %820 = arith.select %789, %793, %819 : vector<1x1xi1>, vector<1x1xi32>
    %821 = vector.broadcast %820 : vector<1x1xi32> to vector<1x16xi32>
    %822 = arith.cmpi eq, %15, %821 : vector<1x16xi32>
    %823 = vector.broadcast %784 : vector<1x1xi1> to vector<1x16xi1>
    %824 = arith.andi %822, %823 : vector<1x16xi1>
    %825 = vector.broadcast %820 : vector<1x1xi32> to vector<16x1xi32>
    %826 = arith.cmpi eq, %47, %825 : vector<16x1xi32>
    %cst_212 = arith.constant 0.000000e+00 : f32
    %827 = vector.shape_cast %826 : vector<16x1xi1> to vector<16x1xi1>
    %828 = vector.broadcast %827 : vector<16x1xi1> to vector<16x32xi1>
    %829 = vector.broadcast %cst_212 : f32 to vector<16x32xf32>
    %830 = arith.select %828, %753, %829 : vector<16x32xi1>, vector<16x32xf32>
    %cst_213 = arith.constant dense<0.000000e+00> : vector<32xf32>
    %831 = vector.multi_reduction <add>, %830, %cst_213 [0] : vector<16x32xf32> to vector<32xf32>
    %832 = vector.shape_cast %831 : vector<32xf32> to vector<1x32xf32>
    %833 = vector.extract_strided_slice %12 {offsets = [7, 0], sizes = [1, 32], strides = [1, 1]} : vector<8x32xf32> to vector<1x32xf32>
    %834 = vector.broadcast %3 : f32 to vector<1x32xf32>
    %835 = arith.mulf %834, %832 : vector<1x32xf32>
    %cst_214 = arith.constant 1.000000e+00 : f32
    %836 = arith.subf %cst_214, %3 : f32
    %837 = vector.broadcast %836 : f32 to vector<1x32xf32>
    %838 = arith.mulf %837, %833 : vector<1x32xf32>
    %839 = arith.addf %835, %838 : vector<1x32xf32>
    %840 = arith.mulf %839, %839 : vector<1x32xf32>
    %cst_215 = arith.constant dense<0.000000e+00> : vector<1xf32>
    %841 = vector.multi_reduction <add>, %840, %cst_215 [1] : vector<1x32xf32> to vector<1xf32>
    %842 = vector.shape_cast %841 : vector<1xf32> to vector<1x1xf32>
    %cst_216 = arith.constant 9.99999996E-13 : f32
    %843 = vector.broadcast %cst_216 : f32 to vector<1x1xf32>
    %844 = arith.addf %842, %843 : vector<1x1xf32>
    %845 = math.rsqrt %844 : vector<1x1xf32>
    %846 = vector.broadcast %845 : vector<1x1xf32> to vector<1x32xf32>
    %847 = arith.mulf %839, %846 : vector<1x32xf32>
    %848 = vector.shape_cast %789 : vector<1x1xi1> to vector<1x1xi1>
    %849 = vector.broadcast %848 : vector<1x1xi1> to vector<1x32xi1>
    %850 = arith.select %849, %847, %833 : vector<1x32xi1>, vector<1x32xf32>
    %851 = vector.broadcast %784 : vector<1x1xi1> to vector<16x1xi1>
    %852 = arith.andi %826, %851 : vector<16x1xi1>
    %853 = vector.shape_cast %852 : vector<16x1xi1> to vector<16x1xi1>
    %854 = vector.broadcast %853 : vector<16x1xi1> to vector<16x32xi1>
    %855 = vector.shape_cast %850 : vector<1x32xf32> to vector<1x32xf32>
    %856 = vector.broadcast %855 : vector<1x32xf32> to vector<16x32xf32>
    %857 = arith.select %854, %856, %753 : vector<16x32xi1>, vector<16x32xf32>
    %858 = arith.select %789, %799, %783 : vector<1x1xi1>, vector<1x1xi32>
    %c7_i32 = arith.constant 7 : i32
    %859 = vector.broadcast %c7_i32 : i32 to vector<1x8xi32>
    %860 = arith.cmpi eq, %44, %859 : vector<1x8xi32>
    %861 = vector.broadcast %784 : vector<1x1xi1> to vector<1x8xi1>
    %862 = arith.andi %860, %861 : vector<1x8xi1>
    %863 = vector.shape_cast %858 : vector<1x1xi32> to vector<1x1xi32>
    %864 = vector.broadcast %863 : vector<1x1xi32> to vector<1x8xi32>
    %865 = arith.select %862, %864, %761 : vector<1x8xi1>, vector<1x8xi32>
    %866 = vector.shape_cast %858 : vector<1x1xi32> to vector<1x1xi32>
    %867 = vector.broadcast %866 : vector<1x1xi32> to vector<1x16xi32>
    %868 = arith.select %824, %867, %764 : vector<1x16xi1>, vector<1x16xi32>
    %cst_217 = arith.constant 1.000000e+00 : f32
    %869 = vector.broadcast %cst_217 : f32 to vector<1x16xf32>
    %870 = arith.select %824, %869, %766 : vector<1x16xi1>, vector<1x16xf32>
    %871 = vector.shape_cast %53 : vector<1x1xi32> to vector<1x1xi32>
    %872 = vector.broadcast %871 : vector<1x1xi32> to vector<1x16xi32>
    %873 = arith.select %824, %872, %769 : vector<1x16xi1>, vector<1x16xi32>
    %cst_218 = arith.constant dense<true> : vector<1x1xi1>
    %874 = arith.xori %789, %cst_218 : vector<1x1xi1>
    %875 = arith.andi %784, %874 : vector<1x1xi1>
    %c1_i32_219 = arith.constant 1 : i32
    %c0_i32_220 = arith.constant 0 : i32
    %876 = vector.broadcast %c1_i32_219 : i32 to vector<1x1xi32>
    %877 = vector.broadcast %c0_i32_220 : i32 to vector<1x1xi32>
    %878 = arith.select %875, %876, %877 : vector<1x1xi1>, vector<1x1xi32>
    %879 = arith.addi %783, %878 : vector<1x1xi32>
    %c0_221 = arith.constant 0 : index
    %c0_222 = arith.constant 0 : index
    %880 = vector.load %arg8[%c0_221, %c0_222] : memref<1x8xi32, #tpu.memory_space<vmem>>, vector<1x8xi32>
    tpu.vector_store %arg8[%c0_221, %c0_222], %865 {strides = array<i32>} : memref<1x8xi32, #tpu.memory_space<vmem>>, vector<1x8xi32>,
    %c0_223 = arith.constant 0 : index
    %c0_224 = arith.constant 0 : index
    %881 = vector.load %arg9[%c0_223, %c0_224] : memref<16x32xf32, #tpu.memory_space<vmem>>, vector<16x32xf32>
    tpu.vector_store %arg9[%c0_223, %c0_224], %857 {strides = array<i32>} : memref<16x32xf32, #tpu.memory_space<vmem>>, vector<16x32xf32>,
    %c0_225 = arith.constant 0 : index
    %c0_226 = arith.constant 0 : index
    %882 = vector.load %arg10[%c0_225, %c0_226] : memref<1x16xi32, #tpu.memory_space<vmem>>, vector<1x16xi32>
    tpu.vector_store %arg10[%c0_225, %c0_226], %868 {strides = array<i32>} : memref<1x16xi32, #tpu.memory_space<vmem>>, vector<1x16xi32>,
    %c0_227 = arith.constant 0 : index
    %c0_228 = arith.constant 0 : index
    %883 = vector.load %arg11[%c0_227, %c0_228] : memref<1x16xf32, #tpu.memory_space<vmem>>, vector<1x16xf32>
    tpu.vector_store %arg11[%c0_227, %c0_228], %870 {strides = array<i32>} : memref<1x16xf32, #tpu.memory_space<vmem>>, vector<1x16xf32>,
    %c0_229 = arith.constant 0 : index
    %c0_230 = arith.constant 0 : index
    %884 = vector.load %arg12[%c0_229, %c0_230] : memref<1x16xi32, #tpu.memory_space<vmem>>, vector<1x16xi32>
    tpu.vector_store %arg12[%c0_229, %c0_230], %873 {strides = array<i32>} : memref<1x16xi32, #tpu.memory_space<vmem>>, vector<1x16xi32>,
    %c0_231 = arith.constant 0 : index
    %c0_232 = arith.constant 0 : index
    %885 = vector.load %arg13[%c0_231, %c0_232] : memref<1x1xi32, #tpu.memory_space<vmem>>, vector<1x1xi32>
    tpu.vector_store %arg13[%c0_231, %c0_232], %879 {strides = array<i32>} : memref<1x1xi32, #tpu.memory_space<vmem>>, vector<1x1xi32>,
    return
  }
}

</mosaic_0001>

<bundles_post_ra>
// kernel: tpu_custom_call.1
= control target key start
LH: loop header
LB: loop body
LE: loop exit
PB: predicated region body
PF: predicated region fallthrough
CT: control target
= control target key end

     0   :  { %s3670_s0 = inlined_call_operand.vmem [shape: s32[2], index: 0, kind: input, shape index: {}]   ;;  %s3671_s1 = inlined_call_operand.vmem [shape: f32[2], index: 1, kind: input, shape index: {}]   ;;  %s3672_s2 = inlined_call_operand.<no memory space> [shape: s32[1,1], index: 2, kind: input, shape index: {}, may-alias: {2,13}]   ;;  %s3673_s3 = inlined_call_operand.vmem [shape: f32[8,32], index: 3, kind: input, shape index: {}]   ;;  %s3674_s4 = inlined_call_operand.hbm [shape: f32[16,32], index: 4, kind: input, shape index: {}, may-alias: {4,9}]   ;;  %s3675_s5 = inlined_call_operand.hbm [shape: s32[1,16], index: 5, kind: input, shape index: {}, may-alias: {5,10}]   ;;  %s3676_s6 = inlined_call_operand.hbm [shape: f32[1,16], index: 6, kind: input, shape index: {}, may-alias: {6,11}]   ;;  %s3677_s7 = inlined_call_operand.hbm [shape: s32[1,16], index: 7, kind: input, shape index: {}, may-alias: {7,12}]   ;;  %s3678_s8 = inlined_call_operand.hbm [shape: s32[1,8], index: 8, kind: output, shape index: {0}]   ;;  %s3679_s9 = inlined_call_operand.hbm [shape: f32[16,32], index: 9, kind: output, shape index: {1}, may-alias: {4,9}]   ;;  %s3680_s10 = inlined_call_operand.hbm [shape: s32[1,16], index: 10, kind: output, shape index: {2}, may-alias: {5,10}]   ;;  %s3681_s11 = inlined_call_operand.hbm [shape: f32[1,16], index: 11, kind: output, shape index: {3}, may-alias: {6,11}]   ;;  %s3682_s12 = inlined_call_operand.hbm [shape: s32[1,16], index: 12, kind: output, shape index: {4}, may-alias: {7,12}]   ;;  %s3683_s13 = inlined_call_operand.hbm [shape: s32[1,1], index: 13, kind: output, shape index: {5}, may-alias: {2,13}]  }
   0x1   :  { %v19_v0 = vstv %s3672_s2 }
   0x2   :  { %20 = vst [vmem:[#allocation2] sm:$0x1] %v19_v0 }
   0x3   :  { %21 = vsyncpa [#allocation6], 0 }
   0x4   :  { %22 = vsyncpa [#allocation8], 0 }
   0x5   :  { %23 = vsyncpa [#allocation4], 0 }
   0x6   :  { %24 = vsyncpa [#allocation11], 0 }
   0x7   :  { %25 = vsyncpa [#allocation14], 0 }
   0x8   :  { %26 = vsyncpa [#allocation5], 0 }
   0x9   :  { %27 = vsyncpa [#allocation17], 0 }
   0xa   :  { %28 = vsyncpa [#allocation20], 0 }
   0xb   :  { %29 = vsyncpa [#allocation23], 0  ;;  %s36_s29 = sshll.u32 %s3670_s0, 4  ;;  %s2170_s30 = smov [#allocation10]   ;;  %s37_s29 = int_to_ptr.vmem [resolvable:$true] %s36_s29 }
   0xc   :  { %s72_s14 = sshll.u32 %s2170_s30, 4  ;;  %s73_s14 = int_to_ptr.vmem [resolvable:$true] %s72_s14 }
   0xd   :  { %s1936_s15 = scalar_lea.vmem %s73_s14, 16  ;;  %s1940_s2 = scalar_lea.vmem %s73_s14, 32 }
   0xe   :  { %p1937_p0 = scmp.ne.s32.totalorder %s73_s14, %s1936_s15  ;;  %p1941_p1 = scmp.lt.s32.totalorder %s73_s14, %s73_s14 }
   0xf   :  { %p1942_p2 = scmp.lt.s32.totalorder %s1940_s2, %s1936_s15 }
  0x11   :  { %p1943_p3 = por %p1942_p2, %p1941_p1 }
  0x13   :  { %p1944_p4 = pnand %p1943_p3, %p1937_p0 }
  0x15   :  { %1947 = shalt.err (!%p1944_p4)
}
  0x16   :  { %75 = dma.hbm_to_vmem [thread:$0]  %s3675_s5, 16, %s73_s14, [#allocation11]  }
  0x17   :  { %s1948_s18 = scalar_lea.vmem %s37_s29, 16  ;;  %p1953_p6 = scmp.lt.s32.totalorder %s37_s29, %s37_s29 }
  0x18   :  { %p1949_p5 = scmp.ne.s32.totalorder %s37_s29, %s1948_s18  ;;  %p1954_p7 = scmp.lt.s32.totalorder %s1948_s18, %s1948_s18 }
  0x1a   :  { %p1955_p8 = por %p1954_p7, %p1953_p6 }
  0x1c   :  { %p1956_p9 = pnand %p1955_p8, %p1949_p5 }
  0x1e   :  { %1959 = shalt.err (!%p1956_p9)
}
  0x1f   :  { %s2171_s0 = smov [#allocation3]   ;;  %s46_s21 = sshll.u32 %s3671_s1, 4  ;;  %s47_s21 = int_to_ptr.vmem [resolvable:$true] %s46_s21 }
  0x20   :  { %39 = dma.vmem_to_smem %s37_s29, 16, %s2171_s0, [#allocation6]  }
  0x21   :  { %s1960_s22 = scalar_lea.vmem %s47_s21, 16  ;;  %p1965_p11 = scmp.lt.s32.totalorder %s47_s21, %s47_s21 }
  0x22   :  { %p1961_p10 = scmp.ne.s32.totalorder %s47_s21, %s1960_s22  ;;  %p1966_p12 = scmp.lt.s32.totalorder %s1960_s22, %s1960_s22 }
  0x24   :  { %p1967_p13 = por %p1966_p12, %p1965_p11 }
  0x26   :  { %p1968_p0 = pnand %p1967_p13, %p1961_p10 }
  0x28   :  { %1971 = shalt.err (!%p1968_p0)
}
  0x29   :  { %s2172_s5 = smov [#allocation7]   ;;  %s2173_s23 = smov [#allocation9]  }
  0x2a   :  { %49 = dma.vmem_to_smem %s47_s21, 16, %s2172_s5, [#allocation8]  }
  0x2b   :  { %s59_s24 = sshll.u32 %s2173_s23, 4  ;;  %s60_s24 = int_to_ptr.vmem [resolvable:$true] %s59_s24 }
  0x2c   :  { %s1980_s25 = scalar_lea.vmem %s60_s24, 256  ;;  %p1985_p2 = scmp.lt.s32.totalorder %s60_s24, %s60_s24 }
  0x2d   :  { %p1981_p1 = scmp.ne.s32.totalorder %s60_s24, %s1980_s25  ;;  %p1986_p3 = scmp.lt.s32.totalorder %s1980_s25, %s1980_s25 }
  0x2f   :  { %p1987_p4 = por %p1986_p3, %p1985_p2 }
  0x31   :  { %p1988_p5 = pnand %p1987_p4, %p1981_p1 }
  0x33   :  { %1991 = shalt.err (!%p1988_p5)
}
  0x34   :  { %s2174_s1 = smov 128   ;;  %s2175_s26 = smov 8  }
  0x35   :  { %65 = dma.hbm_to_vmem [thread:$0]  %s3674_s4, 256, %s60_s24, [#allocation4], %s2174_s1, %s2174_s1, %s2175_s26  }
  0x36   :  { %s2176_s29 = smov [#allocation12]   ;;  %s2177_s14 = smov [#allocation13]  }
  0x37   :  { %s82_s30 = sshll.u32 %s2176_s29, 4  ;;  %s92_s15 = sshll.u32 %s2177_s14, 4  ;;  %s83_s30 = int_to_ptr.vmem [resolvable:$true] %s82_s30  ;;  %s93_s15 = int_to_ptr.vmem [resolvable:$true] %s92_s15 }
  0x38   :  { %s2000_s2 = scalar_lea.vmem %s83_s30, 16  ;;  %s2004_s16 = scalar_lea.vmem %s83_s30, 32 }
  0x39   :  { %p2001_p6 = scmp.ne.s32.totalorder %s83_s30, %s2000_s2  ;;  %p2005_p7 = scmp.lt.s32.totalorder %s83_s30, %s83_s30 }
  0x3a   :  { %p2006_p8 = scmp.lt.s32.totalorder %s2004_s16, %s2000_s2 }
  0x3c   :  { %p2007_p9 = por %p2006_p8, %p2005_p7 }
  0x3e   :  { %p2008_p10 = pnand %p2007_p9, %p2001_p6 }
  0x40   :  { %2011 = shalt.err (!%p2008_p10)
}
  0x41   :  { %85 = dma.hbm_to_vmem [thread:$0]  %s3676_s6, 16, %s83_s30, [#allocation11]  }
  0x42   :  { %s2020_s0 = scalar_lea.vmem %s93_s15, 16  ;;  %s2024_s4 = scalar_lea.vmem %s93_s15, 32 }
  0x43   :  { %p2021_p11 = scmp.ne.s32.totalorder %s93_s15, %s2020_s0  ;;  %p2025_p12 = scmp.lt.s32.totalorder %s93_s15, %s93_s15 }
  0x44   :  { %p2026_p13 = scmp.lt.s32.totalorder %s2024_s4, %s2020_s0 }
  0x46   :  { %p2027_p0 = por %p2026_p13, %p2025_p12 }
  0x48   :  { %p2028_p1 = pnand %p2027_p0, %p2021_p11 }
  0x4a   :  { %2031 = shalt.err (!%p2028_p1)
}
  0x4b   :  { %95 = dma.hbm_to_vmem [thread:$0]  %s3677_s7, 16, %s93_s15, [#allocation14]  }
  0x4c   :  { %2152 = dma.done.wait [#allocation6], 16  }
  0x4d   :  { %2153 = vsyncadd [#allocation6], 4294967280 }
  0x4e   :  { %2154 = dma.done.wait [#allocation8], 16  }
  0x4f   :  { %2155 = vsyncadd [#allocation8], 4294967280 }
  0x50   :  { %2156 = dma.done.wait [#allocation4], 256  }
  0x51   :  { %2157 = vsyncadd [#allocation4], 4294967040 }
  0x52   :  { %2158 = dma.done.wait [#allocation11], 32  }
  0x53   :  { %2159 = vsyncadd [#allocation11], 4294967264 }
  0x54   :  { %2160 = dma.done.wait [#allocation14], 16  }
  0x55   :  { %2161 = vsyncadd [#allocation14], 4294967280 }
  0x56   :  { %114 = sfence }
  0x57   :  { %v119_v1 = vld [vmem:[%s3673_s3] sm:$0xff]  ;;  %vm3691_vm0 = vcmask 261120   ;;  %v2178_v4 = vmov 0.0   ;;  %v2309_v5 = vld [vmem:[#allocation9 + $0x8] sm:$0xff]  ;;  %vm2179_vm1 = vmmov 0   ;;  %v209_v8 = vlaneseq  ;;  %s115_s3 = sld [smem:[#allocation3]] }
  0x58   :  { %v120_v2 = vmul.f32 %v119_v1, %v119_v1  ;;  %1825 = vmatprep.subr.mxu0 %v2178_v4  ;;  %v2314_v6 = vld [vmem:[#allocation9] sm:$0xff]  ;;  %1829 = vmatprep.mubr.msk.f32.mxu0 %vm2179_vm1, %v2178_v4  ;;  %v2319_v7 = vld [vmem:[#allocation13] sm:$0x1]  ;;  %v2325_v12 = vld [vmem:[#allocation12] sm:$0x1]  ;;  %vm240_vm5 = vcmask 122880  }
  0x59   :  { %1826 = vmatpush3.xpose.msk.msra.mxu0 %vm3691_vm0, %v2309_v5  ;;  %vm276_vm2 = vcmp.gt.s32.totalorder %v2319_v7, 0  ;;  %v2323_v11 = vand.u32 127, %v209_v8  ;;  %vm219_vm4 = vcmp.gt.f32.partialorder %v2325_v12, 0.0  ;;  %v2180_v24 = vmov 0   ;;  %s117_s7 = sld [smem:[#allocation7]]  ;;  %s2186_s5 = smov 1  }
  0x5a   :  { %v122_v3 = vsel %vm3691_vm0, %v120_v2, 0.0  ;;  %1827 = vmatprep.subr.mxu0 %v2178_v4  ;;  %v277_v9 = vsel %vm276_vm2, %v2319_v7, 0  ;;  %1877 = vset.pattern.permute.xlu0 %v2180_v24  ;;  %v2339_v25 = vshrl.u32 %v209_v8, 7  ;;  %v220_v31 = vsel %vm219_vm4, 1, %v2180_v24  ;;  %s1816_s22 = sld [smem:[#allocation3 + $0x1]]  ;;  %s2187_s23 = smov 127  }
  0x5b   :  { %123 = vadd.xlane.f32.xlu0 %v122_v3  ;;  %vm278_vm3 = vcmp.lt.s32.totalorder %v277_v9, 32767  ;;  %1876 = vset.pattern.permute.xlu1 %v2180_v24  ;;  %v216_v35 = vsub.s32 127, %v2323_v11  ;;  %s1817_s24 = sld [smem:[#allocation7 + $0x1]]  ;;  %s2189_s27 = smov 2  }
  0x5c   :  { %v279_v10 = vsel %vm278_vm3, %v277_v9, 32767  ;;  %v2342_v29 = vsub.s32 0, %v2339_v25  ;;  %s2190_s28 = smov 126   ;;  %s2192_s29 = smov 3  }
  0x5d   :  { %1828 = vmatpush3.xpose.msk.msra.mxu0 %vm3691_vm0, %v2314_v6  ;;  %v280_v13 = vmul.u32 128, %v279_v10  ;;  %v232_v50 = vstv %s115_s3  ;;  %s2193_s30 = smov 125   ;;  %s2194_s14 = smov 4  }
  0x5e   :  { %v224_v33 = vrot.slane %v220_v31, %v2342_v29  ;;  %vm2354_vm9 = vcmp.lt.s32.totalorder %v2323_v11, %v232_v50  ;;  %s2195_s15 = smov 124   ;;  %s2197_s2 = smov 123  }
  0x5f   :  { %v281_v14 = vadd.s32 16777216, %v280_v13  ;;  %v2361_v52 = vsel %vm2354_vm9, 1, %v2180_v24  ;;  %v227_v53 = vstv %s117_s7  ;;  %s2198_s16 = smov 5   ;;  %s2199_s17 = smov 6  }
  0x60   :  { %vm225_vm6 = vcmp.eq.s32.totalorder %v224_v33, 1  ;;  %v229_v54 = vmul.f32 1048576.0, %v227_v53  ;;  %s2201_s18 = smov 122   ;;  %s2202_s0 = smov 7  }
  0x61   :  { %v282_v15 = vadd.s32 %v281_v14, %v2323_v11  ;;  %s341_s25 = ssub.f32 1.0, %s1817_s24  ;;  %s2203_s4 = smov [#allocation19]  }
  0x62   :  { %v1834_v55 = vtrunc.f32 %v229_v54  ;;  %s1765_s19 = sshll.u32 %s2203_s4, 4  ;;  %s2204_s20 = smov 121   ;;  %s1766_s19 = int_to_ptr.vmem [resolvable:$true] %s1765_s19 }
  0x63   :  { %v283_v16 = vsel %vm219_vm4, %v282_v15, %v2323_v11  ;;  %vm402_vm4 = vcmask 123905   ;;  %s2205_s6 = smov [#allocation21]   ;;  %s2032_s3 = scalar_lea.vmem %s1766_s19, 16 }
  0x64   :  { %v285_v17 = vsel %vm240_vm5, %v283_v16, 2147483647  ;;  %v1835_v59 = vcvt.f32.s32 %v1834_v55  ;;  %s1775_s21 = sshll.u32 %s2205_s6, 4  ;;  %p2033_p2 = scmp.ne.s32.totalorder %s1766_s19, %s2032_s3  ;;  %s1776_s21 = int_to_ptr.vmem [resolvable:$true] %s1775_s21 }
  0x65   :  { %v287_v18 = vshra.s32 %v285_v17, 16  ;;  %v286_v38 = vand.u32 65535, %v285_v17  ;;  %v2387_v17 = vstv %s1816_s22  ;;  %s2036_s7 = scalar_lea.vmem %s1766_s19, 32  ;;  %p2037_p3 = scmp.lt.s32.totalorder %s1766_s19, %s1766_s19 }
  0x66   :  { %v2364_v0 = vmul.u32 128, %v1835_v59  ;;  %p2038_p4 = scmp.lt.s32.totalorder %s2036_s7, %s2032_s3 }
  0x67   :  { %v289_v19 = vcvt.s32.f32 %v287_v18  ;;  %v288_v43 = vcvt.s32.f32 %v286_v38 }
  0x68   :  { %p2039_p5 = por %p2038_p4, %p2037_p3 }
  0x69   :  { %290 = vmin.xlane.f32.xlu1 %v289_v19 }
  0x6a   :  { %p2040_p6 = pnand %p2039_p5, %p2033_p2 }
  0xe4   :  { %v124_v20 = vpop.xlane.xlu0 %123 }
  0xe5   :  { %v125_v21 = vadd.f32 1e-12, %v124_v20 }
  0xe7   :  { %1908 = vrsqrt.f32 %v125_v21 }
  0xf2   :  { %v291_v41 = vpop.xlane.xlu1 %290 }
  0xf3   :  { %vm292_vm7 = vcmp.eq.f32.partialorder %v289_v19, %v291_v41  ;;  %v297_v56 = vcvt.f32.s32 %v291_v41 }
  0xf4   :  { %v1909_v22 = vpop.eup %1908  ;;  %v293_v45 = vsel %vm292_vm7, %v288_v43, inf }
  0xf5   :  { %v2333_v23 = vmul.f32 %v1909_v22, %v119_v1  ;;  %v298_v60 = vshll.u32 %v297_v56, 16 }
  0xf7   :  { %1830 = vmatmul.mubr.msk.f32.vlgmr.msra.gmra.mxu0 %vm3691_vm0, %v2333_v23 }
 0x1b7   :  { %v205_v26 = vpop.f32.mrf.mxu0 }
 0x1b8   :  { %v1821_v27 = vclamps-f32 %v205_v26, 1.0 }
 0x1b9   :  { %v1831_v28 = vpop.f32.mrf.mxu0 }
 0x1ba   :  { %v213_v30 = vmul.f32 1048576.0, %v1821_v27 }
 0x1bc   :  { %v1832_v32 = vtrunc.f32 %v213_v30 }
 0x1be   :  { %v1833_v34 = vcvt.f32.s32 %v1832_v32 }
 0x1c0   :  { %v215_v36 = vmul.u32 128, %v1833_v34 }
 0x1c2   :  { %v217_v37 = vadd.s32 %v216_v35, %v215_v36 }
 0x1c4   :  { %v2349_v39 = vsel %vm225_vm6, %v217_v37, 3221225472 }
 0x1c5   :  { %v241_v40 = vsel %vm240_vm5, %v2349_v39, 2147483648 }
 0x1c6   :  { %v243_v42 = vshra.s32 %v241_v40, 16  ;;  %v242_v46 = vand.u32 65535, %v241_v40 }
 0x1c8   :  { %v245_v44 = vcvt.s32.f32 %v243_v42  ;;  %v244_v48 = vcvt.s32.f32 %v242_v46 }
 0x1ca   :  { %246 = vmax.xlane.f32.xlu0 %v245_v44 }
 0x1ce   :  { %294 = vmin.xlane.f32.xlu0 %v293_v45 }
 0x1e4   :  { %308 = vperm.xlu0 %1877, %v2361_v52  }
 0x253   :  { %v247_v47 = vpop.xlane.xlu0 %246 }
 0x254   :  { %vm248_vm8 = vcmp.eq.f32.partialorder %v245_v44, %v247_v47  ;;  %v253_v58 = vcvt.f32.s32 %v247_v47 }
 0x255   :  { %v249_v49 = vsel %vm248_vm8, %v244_v48, -inf }
 0x256   :  { %250 = vmax.xlane.f32.xlu1 %v249_v49  ;;  %v254_v63 = vshll.u32 %v253_v58, 16  ;;  %v2181_v49 = vmov 1  }
 0x257   :  { %v295_v57 = vpop.xlane.xlu0 %294  ;;  %1879 = vset.pattern.permute.xlu0 %v2181_v49 }
 0x258   :  { %v296_v61 = vcvt.f32.s32 %v295_v57 }
 0x25a   :  { %v299_v2 = vadd.s32 %v298_v60, %v296_v61 }
 0x25c   :  { %v300_v9 = vand.u32 127, %v299_v2 }
 0x25f   :  { %v2384_v16 = vpop.permute.xlu0 %308 }
 0x260   :  { %vm3686_vm12 = vcmp.eq.s32.totalorder %v2384_v16, 1 }
 0x2df   :  { %v251_v62 = vpop.xlane.xlu1 %250 }
 0x2e0   :  { %v252_v1 = vcvt.f32.s32 %v251_v62 }
 0x2e2   :  { %v255_v3 = vadd.s32 %v254_v63, %v252_v1 }
 0x2e4   :  { %vm256_vm10 = vcmp.ge.s32.totalorder %v255_v3, %v2364_v0  ;;  %v258_v8 = vand.u32 127, %v255_v3 }
 0x2e5   :  { %vm2371_vm11 = vmand %vm2354_vm9, %vm256_vm10 }
 0x2e6   :  { %v2367_v10 = vsub.s32 127, %v258_v8  ;;  %v353_v15 = vsel %vm2371_vm11, 1, %v2180_v24 }
 0x2e8   :  { %v2378_v14 = vsel %vm2371_vm11, %v2367_v10, %v300_v9 }
 0x2e9   :  { %303 = vperm.xlu1 %1876, %v2378_v14  }
 0x2ed   :  { %355 = vperm.xlu1 %1876, %v353_v15  }
 0x2f1   :  { %1878 = vset.pattern.permute.xlu1 %v2181_v49 }
 0x364   :  { %v304_v18 = vpop.permute.xlu1 %303 }
 0x365   :  { %vm305_vm13 = vcmp.eq.s32.totalorder %v2323_v11, %v304_v18 }
 0x366   :  { %vm2392_vm14 = vmand %vm305_vm13, %vm3686_vm12 }
 0x367   :  { %v2400_v20 = vsel %vm2392_vm14, %v2387_v17, %v2319_v7  ;;  %v2416_v30 = vsel %vm2392_vm14, 1.0, %v2325_v12  ;;  %v2424_v33 = vsel %vm2392_vm14, 1.0, %v2178_v4 }
 0x368   :  { %vm440_vm15 = vcmp.gt.s32.totalorder %v2400_v20, 0  ;;  %v2403_v21 = vpop.permute.xlu1 %355  ;;  %vm439_vm7 = vcmp.gt.f32.partialorder %v2416_v30, 0.0  ;;  %vm438_vm8 = vcmp.gt.f32.partialorder %v2424_v33, 0.0 }
 0x369   :  { %v441_v22 = vsel %vm440_vm15, %v2400_v20, 0  ;;  %vm3688_vm1 = vcmp.eq.s32.totalorder %v2403_v21, 1 }
 0x36a   :  { %vm442_vm2 = vcmp.lt.s32.totalorder %v441_v22, 32767  ;;  %vm390_vm3 = vmand %vm2392_vm14, %vm3688_vm1 }
 0x36b   :  { %v391_v26 = vsel %vm390_vm3, 1, %v2180_v24  ;;  %v443_v27 = vsel %vm442_vm2, %v441_v22, 32767  ;;  %v556_v22 = vrot.slane %v2400_v20, 7  ;;  %v2476_v20 = vsub.s32 1, %v2339_v25 }
 0x36c   :  { %v395_v7 = vrot.slane %v391_v26, %v2342_v29  ;;  %v444_v28 = vmul.u32 128, %v443_v27 }
 0x36e   :  { %vm396_vm6 = vcmp.eq.s32.totalorder %v395_v7, 1  ;;  %v445_v31 = vadd.s32 16777216, %v444_v28 }
 0x36f   :  { %v2419_v32 = vsel %vm396_vm6, 3221225472, %v2349_v39 }
 0x370   :  { %v403_v34 = vsel %vm402_vm4, %v2419_v32, 2147483648  ;;  %v446_v35 = vadd.s32 %v445_v31, %v2323_v11 }
 0x371   :  { %v405_v36 = vshra.s32 %v403_v34, 16  ;;  %v404_v41 = vand.u32 65535, %v403_v34 }
 0x372   :  { %v447_v12 = vsel %vm439_vm7, %v446_v35, %v2323_v11  ;;  %v553_v35 = vrot.slane %v2416_v30, 7 }
 0x373   :  { %v407_v37 = vcvt.s32.f32 %v405_v36  ;;  %v448_v38 = vsel %vm438_vm8, 1073741824, %v447_v12  ;;  %v406_v43 = vcvt.s32.f32 %v404_v41 }
 0x374   :  { %v449_v39 = vsel %vm240_vm5, %v448_v38, 2147483647 }
 0x375   :  { %408 = vmax.xlane.f32.xlu1 %v407_v37  ;;  %v451_v40 = vshra.s32 %v449_v39, 16  ;;  %v450_v44 = vand.u32 65535, %v449_v39 }
 0x377   :  { %v453_v4 = vcvt.s32.f32 %v451_v40  ;;  %v452_v47 = vcvt.s32.f32 %v450_v44 }
 0x379   :  { %454 = vmin.xlane.f32.xlu0 %v453_v4 }
 0x38f   :  { %472 = vperm.xlu0 %1879, %v2361_v52  }
 0x3fe   :  { %v409_v42 = vpop.xlane.xlu1 %408 }
 0x3ff   :  { %vm410_vm10 = vcmp.eq.f32.partialorder %v407_v37, %v409_v42  ;;  %v415_v50 = vcvt.f32.s32 %v409_v42  ;;  %v559_v37 = vrot.slane %v2424_v33, 7 }
 0x400   :  { %v411_v45 = vsel %vm410_vm10, %v406_v43, -inf }
 0x401   :  { %412 = vmax.xlane.f32.xlu1 %v411_v45  ;;  %v416_v54 = vshll.u32 %v415_v50, 16 }
 0x402   :  { %v455_v46 = vpop.xlane.xlu0 %454 }
 0x403   :  { %vm456_vm13 = vcmp.eq.f32.partialorder %v453_v4, %v455_v46  ;;  %v461_v55 = vcvt.f32.s32 %v455_v46 }
 0x404   :  { %v457_v48 = vsel %vm456_vm13, %v452_v47, inf }
 0x405   :  { %458 = vmin.xlane.f32.xlu1 %v457_v48  ;;  %v462_v59 = vshll.u32 %v461_v55, 16 }
 0x40a   :  { %v2454_v15 = vpop.permute.xlu0 %472 }
 0x40b   :  { %vm3685_vm3 = vcmp.eq.s32.totalorder %v2454_v15, 1 }
 0x48a   :  { %v413_v53 = vpop.xlane.xlu1 %412 }
 0x48b   :  { %v414_v56 = vcvt.f32.s32 %v413_v53 }
 0x48d   :  { %v417_v57 = vadd.s32 %v416_v54, %v414_v56 }
 0x48e   :  { %v459_v58 = vpop.xlane.xlu1 %458 }
 0x48f   :  { %v460_v60 = vcvt.f32.s32 %v459_v58  ;;  %v420_v61 = vand.u32 127, %v417_v57  ;;  %vm418_vm15 = vcmp.ge.s32.totalorder %v417_v57, %v2364_v0  ;;  %v3699_v58 = vmov 2  }
 0x490   :  { %vm2441_vm2 = vmand %vm2354_vm9, %vm418_vm15 }
 0x491   :  { %v463_v62 = vadd.s32 %v462_v59, %v460_v60  ;;  %v2437_v2 = vsub.s32 127, %v420_v61  ;;  %v513_v9 = vsel %vm2441_vm2, 1, %v2180_v24 }
 0x493   :  { %v464_v63 = vand.u32 127, %v463_v62 }
 0x495   :  { %v465_v1 = vrot.slane %v464_v63, 7 }
 0x497   :  { %v2448_v8 = vsel %vm2441_vm2, %v2437_v2, %v465_v1 }
 0x498   :  { %468 = vperm.xlu1 %1878, %v2448_v8  }
 0x49c   :  { %515 = vperm.xlu1 %1878, %v513_v9  }
 0x4a0   :  { %1880 = vset.pattern.permute.xlu1 %v3699_v58 }
 0x513   :  { %v469_v18 = vpop.permute.xlu1 %468 }
 0x514   :  { %vm470_vm6 = vcmp.eq.s32.totalorder %v2323_v11, %v469_v18 }
 0x515   :  { %vm2461_vm7 = vmand %vm470_vm6, %vm3685_vm3  ;;  %vm3690_vm6 = vcmask 124930  }
 0x516   :  { %v2468_v27 = vsel %vm2461_vm7, %v2387_v17, %v556_v22  ;;  %v2488_v38 = vsel %vm2461_vm7, 1.0, %v553_v35  ;;  %v2495_v4 = vsel %vm2461_vm7, 1.0, %v559_v37 }
 0x517   :  { %vm629_vm8 = vcmp.gt.s32.totalorder %v2468_v27, 0  ;;  %v2471_v7 = vpop.permute.xlu1 %515 }
 0x518   :  { %v630_v28 = vsel %vm629_vm8, %v2468_v27, 0  ;;  %vm3684_vm10 = vcmp.eq.s32.totalorder %v2471_v7, 1 }
 0x519   :  { %vm631_vm13 = vcmp.lt.s32.totalorder %v630_v28, 32767  ;;  %vm562_vm15 = vmand %vm2461_vm7, %vm3684_vm10 }
 0x51a   :  { %v563_v31 = vsel %vm562_vm15, 1, %v2180_v24  ;;  %v632_v34 = vsel %vm631_vm13, %v630_v28, 32767  ;;  %vm628_vm13 = vcmp.gt.f32.partialorder %v2488_v38, 0.0  ;;  %vm627_vm15 = vcmp.gt.f32.partialorder %v2495_v4, 0.0 }
 0x51b   :  { %v567_v36 = vrot.slane %v563_v31, %v2476_v20  ;;  %v633_v12 = vmul.u32 128, %v632_v34 }
 0x51d   :  { %vm568_vm8 = vcmp.eq.s32.totalorder %v567_v36, 1  ;;  %v634_v39 = vadd.s32 16777216, %v633_v12 }
 0x51e   :  { %v2491_v40 = vsel %vm568_vm8, 3221225472, %v2419_v32 }
 0x51f   :  { %v592_v30 = vsel %vm3690_vm6, %v2491_v40, 2147483648  ;;  %v635_v41 = vadd.s32 %v634_v39, %v2323_v11 }
 0x520   :  { %v594_v33 = vshra.s32 %v592_v30, 16  ;;  %v593_v47 = vand.u32 65535, %v592_v30 }
 0x521   :  { %v636_v42 = vsel %vm628_vm13, %v635_v41, %v2323_v11 }
 0x522   :  { %v596_v43 = vcvt.s32.f32 %v594_v33  ;;  %v637_v44 = vsel %vm627_vm15, 1073741824, %v636_v42  ;;  %v595_v50 = vcvt.s32.f32 %v593_v47  ;;  %v745_v33 = vrot.slane %v2468_v27, 7 }
 0x523   :  { %v638_v32 = vsel %vm402_vm4, %v637_v44, 2147483647  ;;  %v742_v47 = vrot.slane %v2488_v38, 7 }
 0x524   :  { %597 = vmax.xlane.f32.xlu1 %v596_v43  ;;  %v640_v45 = vshra.s32 %v638_v32, 16  ;;  %v639_v53 = vand.u32 65535, %v638_v32  ;;  %v2546_v32 = vsub.s32 2, %v2339_v25 }
 0x526   :  { %v642_v46 = vcvt.s32.f32 %v640_v45  ;;  %v641_v56 = vcvt.s32.f32 %v639_v53  ;;  %v748_v53 = vrot.slane %v2495_v4, 7 }
 0x528   :  { %643 = vmin.xlane.f32.xlu1 %v642_v46 }
 0x5ad   :  { %v598_v48 = vpop.xlane.xlu1 %597 }
 0x5ae   :  { %vm599_vm8 = vcmp.eq.f32.partialorder %v596_v43, %v598_v48  ;;  %v604_v59 = vcvt.f32.s32 %v598_v48 }
 0x5af   :  { %v600_v54 = vsel %vm599_vm8, %v595_v50, -inf }
 0x5b0   :  { %601 = vmax.xlane.f32.xlu0 %v600_v54  ;;  %v605_v61 = vshll.u32 %v604_v59, 16 }
 0x5b1   :  { %v644_v55 = vpop.xlane.xlu1 %643 }
 0x5b2   :  { %vm645_vm10 = vcmp.eq.f32.partialorder %v642_v46, %v644_v55  ;;  %v650_v62 = vcvt.f32.s32 %v644_v55 }
 0x5b3   :  { %v646_v57 = vsel %vm645_vm10, %v641_v56, inf }
 0x5b4   :  { %647 = vmin.xlane.f32.xlu1 %v646_v57  ;;  %v651_v18 = vshll.u32 %v650_v62, 16 }
 0x639   :  { %v602_v60 = vpop.xlane.xlu0 %601 }
 0x63a   :  { %v603_v63 = vcvt.f32.s32 %v602_v60 }
 0x63c   :  { %v606_v1 = vadd.s32 %v605_v61, %v603_v63 }
 0x63d   :  { %v648_v9 = vpop.xlane.xlu1 %647 }
 0x63e   :  { %v649_v22 = vcvt.f32.s32 %v648_v9  ;;  %v609_v28 = vand.u32 127, %v606_v1  ;;  %vm607_vm13 = vcmp.ge.s32.totalorder %v606_v1, %v2364_v0 }
 0x63f   :  { %vm2510_vm10 = vmand %vm2354_vm9, %vm607_vm13 }
 0x640   :  { %v652_v31 = vadd.s32 %v651_v18, %v649_v22  ;;  %v2506_v35 = vsub.s32 127, %v609_v28  ;;  %v702_v39 = vsel %vm2510_vm10, 1, %v2180_v24  ;;  %v2574_v18 = vld [vmem:[#allocation10] sm:$0x1] }
 0x642   :  { %v653_v34 = vand.u32 127, %v652_v31 }
 0x644   :  { %v654_v36 = vrot.slane %v653_v34, 7 }
 0x646   :  { %v2517_v37 = vsel %vm2510_vm10, %v2506_v35, %v654_v36 }
 0x647   :  { %657 = vperm.xlu1 %1880, %v2517_v37  }
 0x64b   :  { %661 = vperm.xlu1 %1880, %v2361_v52  }
 0x64f   :  { %704 = vperm.xlu1 %1880, %v702_v39  }
 0x6c2   :  { %v658_v30 = vpop.permute.xlu1 %657 }
 0x6c3   :  { %vm659_vm15 = vcmp.eq.s32.totalorder %v2323_v11, %v658_v30 }
 0x6c6   :  { %v2524_v41 = vpop.permute.xlu1 %661 }
 0x6c7   :  { %vm3687_vm8 = vcmp.eq.s32.totalorder %v2524_v41, 1 }
 0x6c8   :  { %vm2531_vm13 = vmand %vm659_vm15, %vm3687_vm8 }
 0x6c9   :  { %v2538_v43 = vsel %vm2531_vm13, %v2387_v17, %v745_v33  ;;  %v2558_v54 = vsel %vm2531_vm13, 1.0, %v742_v47  ;;  %v2565_v57 = vsel %vm2531_vm13, 1.0, %v748_v53 }
 0x6ca   :  { %vm818_vm3 = vcmp.gt.s32.totalorder %v2538_v43, 0  ;;  %v2541_v44 = vpop.permute.xlu1 %704 }
 0x6cb   :  { %v819_v27 = vsel %vm818_vm3, %v2538_v43, 0  ;;  %vm3689_vm12 = vcmp.eq.s32.totalorder %v2541_v44, 1  ;;  %vm3694_vm3 = vcmask 125955  }
 0x6cc   :  { %vm820_vm15 = vcmp.lt.s32.totalorder %v819_v27, 32767  ;;  %vm751_vm8 = vmand %vm2531_vm13, %vm3689_vm12 }
 0x6cd   :  { %v752_v45 = vsel %vm751_vm8, 1, %v2180_v24  ;;  %v821_v46 = vsel %vm820_vm15, %v819_v27, 32767  ;;  %vm817_vm8 = vcmp.gt.f32.partialorder %v2558_v54, 0.0  ;;  %vm816_vm15 = vcmp.gt.f32.partialorder %v2565_v57, 0.0 }
 0x6ce   :  { %v756_v48 = vrot.slane %v752_v45, %v2546_v32  ;;  %v822_v50 = vmul.u32 128, %v821_v46 }
 0x6d0   :  { %vm757_vm1 = vcmp.eq.s32.totalorder %v756_v48, 1  ;;  %v823_v55 = vadd.s32 16777216, %v822_v50  ;;  %v3697_v48 = vmov 3  }
 0x6d1   :  { %v2561_v56 = vsel %vm757_vm1, 3221225472, %v2491_v40  ;;  %vm260_vm1 = vcmp.eq.s32.totalorder %v2323_v11, %v2367_v10  ;;  %1881 = vset.pattern.permute.xlu1 %v3697_v48  ;;  %1883 = vset.pattern.permute.xlu0 %v3697_v48 }
 0x6d2   :  { %v781_v38 = vsel %vm3694_vm3, %v2561_v56, 2147483648  ;;  %v824_v59 = vadd.s32 %v823_v55, %v2323_v11  ;;  %v261_v22 = vsel %vm260_vm1, %v2574_v18, 0  ;;  %vm422_vm3 = vcmp.eq.s32.totalorder %v2323_v11, %v2437_v2 }
 0x6d3   :  { %v783_v4 = vshra.s32 %v781_v38, 16  ;;  %v782_v9 = vand.u32 65535, %v781_v38  ;;  %v262_v39 = vsel %vm240_vm5, %v261_v22, 0 }
 0x6d4   :  { %v825_v60 = vsel %vm817_vm8, %v824_v59, %v2323_v11  ;;  %v264_v27 = vshrl.u32 %v262_v39, 16  ;;  %v263_v47 = vand.u32 65535, %v262_v39 }
 0x6d5   :  { %v785_v61 = vcvt.s32.f32 %v783_v4  ;;  %v826_v62 = vsel %vm816_vm15, 1073741824, %v825_v60  ;;  %v784_v31 = vcvt.s32.f32 %v782_v9 }
 0x6d6   :  { %v827_v40 = vsel %vm3690_vm6, %v826_v62, 2147483647  ;;  %v266_v46 = vcvt.s32.f32 %v264_v27  ;;  %v265_v10 = vcvt.s32.f32 %v263_v47 }
 0x6d7   :  { %786 = vmax.xlane.f32.xlu0 %v785_v61  ;;  %v829_v63 = vshra.s32 %v827_v40, 16  ;;  %v828_v34 = vand.u32 65535, %v827_v40 }
 0x6d9   :  { %v831_v1 = vcvt.s32.f32 %v829_v63  ;;  %v830_v33 = vcvt.s32.f32 %v828_v34 }
 0x6db   :  { %832 = vmin.xlane.f32.xlu1 %v831_v1 }
 0x6ec   :  { %850 = vperm.xlu1 %1881, %v2361_v52  }
 0x760   :  { %v787_v28 = vpop.xlane.xlu0 %786 }
 0x761   :  { %vm788_vm8 = vcmp.eq.f32.partialorder %v785_v61, %v787_v28  ;;  %v793_v50 = vcvt.f32.s32 %v787_v28 }
 0x762   :  { %v789_v36 = vsel %vm788_vm8, %v784_v31, -inf }
 0x763   :  { %790 = vmax.xlane.f32.xlu0 %v789_v36  ;;  %v794_v55 = vshll.u32 %v793_v50, 16 }
 0x764   :  { %v833_v30 = vpop.xlane.xlu1 %832 }
 0x765   :  { %vm834_vm15 = vcmp.eq.f32.partialorder %v831_v1, %v833_v30  ;;  %v839_v38 = vcvt.f32.s32 %v833_v30 }
 0x766   :  { %v835_v45 = vsel %vm834_vm15, %v830_v33, inf }
 0x767   :  { %836 = vmin.xlane.f32.xlu0 %v835_v45  ;;  %v840_v61 = vshll.u32 %v839_v38, 16 }
 0x76b   :  { %269 = vadd.xlane.f32.xlu0 %v266_v46  ;;  %v239_v46 = vld [vmem:[#allocation2] sm:$0x1] }
 0x76f   :  { %267 = vadd.xlane.f32.xlu0 %v265_v10  ;;  %v2605_v10 = vpop.permute.xlu1 %850 }
 0x770   :  { %vm3692_vm8 = vcmp.eq.s32.totalorder %v2605_v10, 1 }
 0x7ec   :  { %v791_v53 = vpop.xlane.xlu0 %790 }
 0x7ed   :  { %v792_v59 = vcvt.f32.s32 %v791_v53 }
 0x7ef   :  { %v795_v4 = vadd.s32 %v794_v55, %v792_v59  ;;  %v934_v55 = vrot.slane %v2538_v43, 7  ;;  %v2620_v59 = vsub.s32 3, %v2339_v25 }
 0x7f0   :  { %v837_v60 = vpop.xlane.xlu0 %836 }
 0x7f1   :  { %vm796_vm5 = vcmp.ge.s32.totalorder %v795_v4, %v2364_v0  ;;  %v838_v62 = vcvt.f32.s32 %v837_v60  ;;  %v798_v63 = vand.u32 127, %v795_v4 }
 0x7f2   :  { %vm2586_vm1 = vmand %vm2354_vm9, %vm796_vm5 }
 0x7f3   :  { %v841_v1 = vadd.s32 %v840_v61, %v838_v62  ;;  %v891_v9 = vsel %vm2586_vm1, 1, %v2180_v24  ;;  %v2593_v34 = vsub.s32 127, %v798_v63 }
 0x7f4   :  { %893 = vperm.xlu1 %1881, %v891_v9   ;;  %v270_v22 = vpop.xlane.xlu0 %269 }
 0x7f5   :  { %v842_v28 = vand.u32 127, %v841_v1  ;;  %v272_v31 = vcvt.f32.s32 %v270_v22  ;;  %v931_v22 = vrot.slane %v2558_v54, 7 }
 0x7f7   :  { %v843_v36 = vrot.slane %v842_v28, 7  ;;  %v273_v30 = vshll.u32 %v272_v31, 16 }
 0x7f8   :  { %v268_v39 = vpop.xlane.xlu0 %267  ;;  %1882 = vset.pattern.permute.xlu1 %v2180_v24 }
 0x7f9   :  { %v271_v33 = vcvt.f32.s32 %v268_v39  ;;  %v2599_v27 = vsel %vm2586_vm1, %v2593_v34, %v843_v36 }
 0x7fa   :  { %846 = vperm.xlu0 %1883, %v2599_v27  }
 0x7fb   :  { %v274_v45 = vadd.s32 %v273_v30, %v271_v33 }
 0x7fd   :  { %v378_v47 = vsel %vm2371_vm11, %v274_v45, %v239_v46 }
 0x7fe   :  { %382 = vperm.xlu1 %1882, %v378_v47   ;;  %1884 = vset.pattern.permute.xlu0 %v2181_v49 }
 0x86f   :  { %v2607_v50 = vpop.permute.xlu1 %893 }
 0x870   :  { %vm3693_vm5 = vcmp.eq.s32.totalorder %v2607_v50, 1 }
 0x875   :  { %v847_v53 = vpop.permute.xlu0 %846 }
 0x876   :  { %vm848_vm15 = vcmp.eq.s32.totalorder %v2323_v11, %v847_v53 }
 0x877   :  { %vm2615_vm12 = vmand %vm848_vm15, %vm3692_vm8  ;;  %vm3702_vm8 = vcmask 126980  }
 0x878   :  { %v2625_v4 = vsel %vm2615_vm12, %v2387_v17, %v934_v55  ;;  %vm940_vm6 = vmand %vm2615_vm12, %vm3693_vm5  ;;  %v2658_v30 = vsel %vm2615_vm12, 1.0, %v931_v22  ;;  %v2682_v22 = vrot.slane %v2378_v14, %v2342_v29 }
 0x879   :  { %vm1008_vm0 = vcmp.gt.s32.totalorder %v2625_v4, 0  ;;  %v2632_v43 = vpop.permute.xlu1 %382  ;;  %v941_v60 = vsel %vm940_vm6, 1, %v2180_v24 }
 0x87a   :  { %v1009_v61 = vsel %vm1008_vm0, %v2625_v4, 0  ;;  %v385_v62 = vsel %vm2392_vm14, %v2632_v43, %v2574_v18  ;;  %v945_v63 = vrot.slane %v941_v60, %v2620_v59  ;;  %v937_v18 = vrot.slane %v2565_v57, 7 }
 0x87b   :  { %vm1010_vm15 = vcmp.lt.s32.totalorder %v1009_v61, 32767  ;;  %v2641_v1 = vrot.slane %v385_v62, 7  ;;  %vm1007_vm0 = vcmp.gt.f32.partialorder %v2658_v30, 0.0  ;;  %v2185_v62 = vmov 1966171168  }
 0x87c   :  { %v1011_v9 = vsel %vm1010_vm15, %v1009_v61, 32767  ;;  %vm946_vm5 = vcmp.eq.s32.totalorder %v945_v63, 1  ;;  %v574_v63 = vunpack.c.l.s4 %v2185_v62 }
 0x87d   :  { %v1012_v28 = vmul.u32 128, %v1011_v9  ;;  %v2647_v31 = vsel %vm946_vm5, 3221225472, %v2561_v56  ;;  %v424_v19 = vsel %vm422_vm3, %v2641_v1, 0  ;;  %v2663_v56 = vsel %vm2615_vm12, 1.0, %v937_v18 }
 0x87e   :  { %v2653_v36 = vsel %vm3702_vm8, %v2647_v31, 2147483648  ;;  %v425_v39 = vsel %vm402_vm4, %v424_v19, 0  ;;  %vm1006_vm14 = vcmp.gt.f32.partialorder %v2663_v56, 0.0  ;;  %vm3706_vm4 = vmmov 1  }
 0x87f   :  { %v973_v2 = vshra.s32 %v2653_v36, 16  ;;  %v427_v54 = vshrl.u32 %v425_v39, 16  ;;  %v1013_v33 = vadd.s32 16777216, %v1012_v28  ;;  %v426_v47 = vand.u32 65535, %v425_v39  ;;  %vm398_vm6 = vmxor %vm2371_vm11, %vm3706_vm4 }
 0x880   :  { %vm399_vm3 = vmand %vm2354_vm9, %vm398_vm6  ;;  %v575_v9 = vunpack.c.0.s8 %v574_v63  ;;  %vm316_vm11 = vcmp.eq.s32.totalorder %v2339_v25, %v2682_v22  ;;  %v2696_v39 = vadd.s32 8, %v2339_v25 }
 0x881   :  { %v2665_v45 = vcvt.s32.f32 %v973_v2  ;;  %v429_v57 = vcvt.s32.f32 %v427_v54  ;;  %v1014_v53 = vadd.s32 %v1013_v33, %v2323_v11  ;;  %v428_v61 = vcvt.s32.f32 %v426_v47  ;;  %vm570_vm5 = vmxor %vm2441_vm2, %vm3706_vm4 }
 0x882   :  { %v400_v28 = vsel %vm399_vm3, 1, %v2180_v24  ;;  %vm571_vm15 = vmand %vm2354_vm9, %vm570_vm5  ;;  %v2688_v13 = vsub.s32 %v575_v9, %v2339_v25  ;;  %v318_v2 = vsel %vm316_vm11, 1, %v2180_v24  ;;  %vm3734_vm5 = vcmask 261120  }
 0x883   :  { %976 = vmax.xlane.f32.xlu1 %v2665_v45  ;;  %432 = vadd.xlane.f32.xlu0 %v429_v57  ;;  %v1015_v55 = vsel %vm1007_vm0, %v1014_v53, %v2323_v11  ;;  %v2690_v19 = vadd.s32 %v400_v28, %v239_v46  ;;  %v572_v18 = vsel %vm571_vm15, 1, %v2180_v24  ;;  %vm317_vm0 = vcmp.eq.s32.totalorder %v2696_v39, %v2682_v22  ;;  %vm3735_vm15 = vmmov %vm3734_vm5 }
 0x884   :  { %v1016_v60 = vsel %vm1006_vm14, 1073741824, %v1015_v55  ;;  %v579_v14 = vrot.slane %v572_v18, %v2688_v13  ;;  %v319_v33 = vsel %vm317_vm0, 1, %v2180_v24  ;;  %vm3733_vm14 = vcmask 125955  }
 0x885   :  { %v540_v54 = vrot.slane %v2690_v19, %v2342_v29  ;;  %v1017_v47 = vsel %vm3733_vm14, %v1016_v60, 2147483647 }
 0x886   :  { %v580_v46 = vcombine.high %v579_v14, %v579_v14  ;;  %v1019_v53 = vshra.s32 %v1017_v47, 16 }
 0x887   :  { %430 = vadd.xlane.f32.xlu1 %v428_v61 }
 0x888   :  { %v587_v57 = vrot.slane %v580_v46, %v2688_v13  ;;  %v1021_v55 = vcvt.s32.f32 %v1019_v53 }
 0x898   :  { %321 = vperm.xlu1 %1882, %v318_v2  }
 0x899   :  { %541 = vrot.lane.b32.xlu0 %v540_v54, %s2186_s5 }
 0x89c   :  { %324 = vperm.xlu1 %1882, %v319_v33  }
 0x8a0   :  { %588 = vrot.lane.b32.xlu1 %v587_v57, %s2187_s23 }
 0x8b8   :  { %1022 = vmin.xlane.f32.xlu0 %v1021_v55 }
 0x90c   :  { %v433_v61 = vpop.xlane.xlu0 %432  ;;  %v2713_v62 = vpop.xlane.xlu1 %976 }
 0x90d   :  { %v435_v63 = vcvt.f32.s32 %v433_v61  ;;  %vm978_vm14 = vcmp.eq.f32.partialorder %v2665_v45, %v2713_v62 }
 0x90f   :  { %v436_v28 = vshll.u32 %v435_v63, 16 }
 0x910   :  { %v431_v9 = vpop.xlane.xlu1 %430  ;;  %v542_v2 = vpop.permute.xlu0 %541 }
 0x911   :  { %v434_v18 = vcvt.f32.s32 %v431_v9  ;;  %v3695_v9 = vmov 4  }
 0x912   :  { %1886 = vset.pattern.permute.xlu1 %v3695_v9 }
 0x913   :  { %v437_v14 = vadd.s32 %v436_v28, %v434_v18 }
 0x914   :  { %v322_v54 = vpop.permute.xlu1 %321 }
 0x915   :  { %vm326_vm6 = vcmp.eq.s32.totalorder %v322_v54, 1  ;;  %v543_v46 = vsel %vm2441_vm2, %v437_v14, %v542_v2  ;;  %v2723_v2 = vstv %s1817_s24  ;;  %vm346_vm2 = vcmask 253952  }
 0x916   :  { %547 = vperm.xlu0 %1884, %v543_v46   ;;  %v328_v60 = vsel %vm326_vm6, %v2314_v6, 0.0 }
 0x917   :  { %v330_v53 = vsel %vm3734_vm5, %v328_v60, 0.0  ;;  %vm3736_vm5 = vcmask 124930  }
 0x918   :  { %v325_v33 = vpop.permute.xlu1 %324 }
 0x919   :  { %vm327_vm3 = vcmp.eq.s32.totalorder %v325_v33, 1 }
 0x91a   :  { %v329_v57 = vsel %vm327_vm3, %v2309_v5, 0.0  ;;  %1885 = vset.pattern.permute.xlu0 %v3695_v9  ;;  %v342_v5 = vstv %s341_s25  ;;  %vm611_vm3 = vcmp.eq.s32.totalorder %v2323_v11, %v2506_v35  ;;  %v2764_v35 = vrot.slane %v2448_v8, %v2476_v20 }
 0x91b   :  { %v331_v61 = vsel %vm3735_vm15, %v329_v57, 0.0  ;;  %v2727_v60 = vmul.f32 %v342_v5, %v2333_v23  ;;  %vm361_vm15 = vmand %vm317_vm0, %vm2354_vm9  ;;  %v983_v8 = vcvt.f32.s32 %v2713_v62 }
 0x91c   :  { %v332_v63 = vadd.f32 %v331_v61, %v330_v53  ;;  %v972_v53 = vand.u32 65535, %v2653_v36  ;;  %v589_v22 = vpop.permute.xlu1 %588 }
 0x91e   :  { %v333_v3 = vrot.slane %v332_v63, 4 }
 0x920   :  { %v334_v28 = vadd.f32 %v333_v3, %v332_v63  ;;  %v974_v63 = vcvt.s32.f32 %v972_v53 }
 0x922   :  { %v335_v18 = vrot.slane %v334_v28, 2  ;;  %v979_v3 = vsel %vm978_vm14, %v974_v63, -inf  ;;  %vm480_vm14 = vcmp.eq.s32.totalorder %v2339_v25, %v2764_v35 }
 0x924   :  { %v336_v6 = vadd.f32 %v335_v18, %v334_v28  ;;  %v1018_v28 = vand.u32 65535, %v1017_v47 }
 0x926   :  { %v337_v14 = vrot.slane %v336_v6, 1 }
 0x928   :  { %v338_v54 = vadd.f32 %v337_v14, %v336_v6  ;;  %v1020_v6 = vcvt.s32.f32 %v1018_v28 }
 0x92a   :  { %v340_v46 = vmul.f32 %v2723_v2, %v338_v54 }
 0x92c   :  { %v2730_v33 = vadd.f32 %v2727_v60, %v340_v46 }
 0x92e   :  { %v345_v57 = vmul.f32 %v2730_v33, %v2730_v33 }
 0x930   :  { %v347_v61 = vsel %vm346_vm2, %v345_v57, 0.0 }
 0x931   :  { %348 = vadd.xlane.f32.xlu1 %v347_v61 }
 0x935   :  { %980 = vmax.xlane.f32.xlu0 %v979_v3  ;;  %v984_v3 = vshll.u32 %v983_v8, 16 }
 0x941   :  { %v1023_v18 = vpop.xlane.xlu0 %1022 }
 0x942   :  { %vm1024_vm6 = vcmp.eq.f32.partialorder %v1021_v55, %v1023_v18  ;;  %v1029_v28 = vcvt.f32.s32 %v1023_v18 }
 0x943   :  { %v1025_v14 = vsel %vm1024_vm6, %v1020_v6, inf }
 0x944   :  { %1026 = vmin.xlane.f32.xlu1 %v1025_v14 }
 0x991   :  { %v2737_v5 = vpop.permute.xlu0 %547 }
 0x992   :  { %v551_v36 = vsel %vm2461_vm7, %v2737_v5, %v2641_v1  ;;  %vm360_vm7 = vmand %vm316_vm11, %vm2354_vm9  ;;  %v363_v1 = vsel %vm361_vm15, 1, %v2180_v24  ;;  %vm481_vm11 = vcmp.eq.s32.totalorder %v2696_v39, %v2764_v35 }
 0x993   :  { %v2743_v54 = vrot.slane %v551_v36, 7  ;;  %v362_v26 = vsel %vm360_vm7, 1, %v2180_v24  ;;  %v483_v57 = vsel %vm481_vm11, 1, %v2180_v24  ;;  %v1030_v36 = vshll.u32 %v1029_v28, 16 }
 0x995   :  { %v613_v45 = vsel %vm611_vm3, %v2743_v54, 0 }
 0x996   :  { %v614_v47 = vsel %vm3736_vm5, %v613_v45, 0 }
 0x997   :  { %v616_v46 = vshrl.u32 %v614_v47, 16 }
 0x999   :  { %v618_v55 = vcvt.s32.f32 %v616_v46 }
 0x99b   :  { %621 = vadd.xlane.f32.xlu0 %v618_v55 }
 0x9b1   :  { %1040 = vperm.xlu0 %1885, %v2361_v52  }
 0x9b5   :  { %1887 = vset.pattern.permute.xlu0 %v2180_v24 }
 0x9b6   :  { %365 = vperm.xlu0 %1887, %v362_v26  }
 0x9ba   :  { %368 = vperm.xlu0 %1887, %v363_v1   ;;  %v349_v63 = vpop.xlane.xlu1 %348 }
 0x9be   :  { %1889 = vset.pattern.permute.xlu0 %v2181_v49  ;;  %v981_v53 = vpop.xlane.xlu0 %980 }
 0x9bf   :  { %488 = vperm.xlu0 %1889, %v483_v57   ;;  %v982_v61 = vcvt.f32.s32 %v981_v53  ;;  %v615_v53 = vand.u32 65535, %v614_v47  ;;  %v482_v47 = vsel %vm480_vm14, 1, %v2180_v24 }
 0x9c1   :  { %v985_v6 = vadd.s32 %v984_v3, %v982_v61  ;;  %v617_v8 = vcvt.s32.f32 %v615_v53  ;;  %v2797_v3 = vadd.s32 %v589_v22, %v2690_v19  ;;  %v1124_v22 = vrot.slane %v2625_v4, 7 }
 0x9c2   :  { %v1121_v4 = vrot.slane %v2658_v30, 7 }
 0x9c3   :  { %1892 = vset.pattern.permute.xlu0 %v3699_v58  ;;  %v988_v46 = vand.u32 127, %v985_v6  ;;  %vm986_vm0 = vcmp.ge.s32.totalorder %v985_v6, %v2364_v0  ;;  %v729_v28 = vrot.slane %v2797_v3, %v2342_v29 }
 0x9c4   :  { %vm2781_vm2 = vmand %vm2354_vm9, %vm986_vm0 }
 0x9c5   :  { %v2777_v1 = vsub.s32 127, %v988_v46  ;;  %v1081_v61 = vsel %vm2781_vm2, 1, %v2180_v24 }
 0x9cd   :  { %v1027_v14 = vpop.xlane.xlu1 %1026 }
 0x9ce   :  { %v1028_v45 = vcvt.f32.s32 %v1027_v14 }
 0x9d0   :  { %v1031_v55 = vadd.s32 %v1030_v36, %v1028_v45 }
 0x9d2   :  { %v1032_v26 = vand.u32 127, %v1031_v55 }
 0x9d4   :  { %v1033_v57 = vrot.slane %v1032_v26, 7 }
 0x9d6   :  { %v2788_v18 = vsel %vm2781_vm2, %v2777_v1, %v1033_v57  ;;  %v1127_v57 = vrot.slane %v2663_v56, 7 }
 0x9d7   :  { %1036 = vperm.xlu1 %1886, %v2788_v18  }
 0x9fb   :  { %619 = vadd.xlane.f32.xlu1 %v617_v8 }
 0xa0c   :  { %1083 = vperm.xlu1 %1886, %v1081_v61  }
 0xa10   :  { %1888 = vset.pattern.permute.xlu1 %v2181_v49 }
 0xa11   :  { %485 = vperm.xlu1 %1888, %v482_v47  }
 0xa15   :  { %730 = vrot.lane.b32.xlu1 %v729_v28, %s2189_s27 }
 0xa16   :  { %1890 = vset.pattern.permute.xlu1 %v3699_v58  ;;  %v1927_v58 = vld [vmem:[#allocation9] sm:$0xff] }
 0xa24   :  { %v622_v6 = vpop.xlane.xlu0 %621 }
 0xa25   :  { %v624_v9 = vcvt.f32.s32 %v622_v6 }
 0xa27   :  { %v625_v48 = vshll.u32 %v624_v9, 16 }
 0xa2c   :  { %v2807_v14 = vpop.permute.xlu0 %1040 }
 0xa2d   :  { %vm3701_vm6 = vcmp.eq.s32.totalorder %v2807_v14, 1 }
 0xa31   :  { %v366_v56 = vpop.permute.xlu0 %365 }
 0xa52   :  { %v1037_v19 = vpop.permute.xlu1 %1036 }
 0xa53   :  { %vm1038_vm3 = vcmp.eq.s32.totalorder %v2323_v11, %v1037_v19  ;;  %v350_v19 = vadd.f32 1e-12, %v349_v63  ;;  %v1926_v63 = vld [vmem:[#allocation9 + $0x8] sm:$0xff] }
 0xa54   :  { %vm2814_vm5 = vmand %vm1038_vm3, %vm3701_vm6  ;;  %vm3742_vm6 = vcmask 261120  }
 0xa55   :  { %v2821_v45 = vsel %vm2814_vm5, %v2387_v17, %v1124_v22  ;;  %v2829_v53 = vsel %vm2814_vm5, 1.0, %v1121_v4  ;;  %v2833_v61 = vsel %vm2814_vm5, 1.0, %v1127_v57  ;;  %1910 = vrsqrt.f32 %v350_v19  ;;  %vm3743_vm8 = vmmov %vm3742_vm6 }
 0xa56   :  { %vm1197_vm7 = vcmp.gt.s32.totalorder %v2821_v45, 0  ;;  %vm1196_vm0 = vcmp.gt.f32.partialorder %v2829_v53, 0.0  ;;  %vm1195_vm3 = vcmp.gt.f32.partialorder %v2833_v61, 0.0 }
 0xa57   :  { %v1198_v46 = vsel %vm1197_vm7, %v2821_v45, 0  ;;  %vm3741_vm7 = vcmp.eq.s32.totalorder %v2403_v21, 1 }
 0xa58   :  { %vm1199_vm15 = vcmp.lt.s32.totalorder %v1198_v46, 32767 }
 0xa59   :  { %v1200_v55 = vsel %vm1199_vm15, %v1198_v46, 32767  ;;  %v369_v46 = vpop.permute.xlu0 %368 }
 0xa5a   :  { %v1201_v26 = vmul.u32 128, %v1200_v55  ;;  %vm371_vm15 = vcmp.eq.s32.totalorder %v369_v46, 1 }
 0xa5c   :  { %v1202_v8 = vadd.s32 16777216, %v1201_v26 }
 0xa5d   :  { %v489_v57 = vpop.permute.xlu0 %488 }
 0xa5e   :  { %v1203_v47 = vadd.s32 %v1202_v8, %v2323_v11 }
 0xa60   :  { %v1204_v30 = vsel %vm1196_vm0, %v1203_v47, %v2323_v11  ;;  %vm491_vm0 = vcmp.eq.s32.totalorder %v489_v57, 1 }
 0xa61   :  { %v1205_v28 = vsel %vm1195_vm3, 1073741824, %v1204_v30  ;;  %vm370_vm3 = vcmp.eq.s32.totalorder %v366_v56, 1 }
 0xa62   :  { %v1911_v22 = vpop.eup %1910 }
 0xa63   :  { %v352_v55 = vmul.f32 %v1911_v22, %v2730_v33 }
 0xa65   :  { %v358_v26 = vsel %vm3741_vm7, %v352_v55, %v2333_v23 }
 0xa66   :  { %v375_v47 = vrot.slane %v358_v26, %v2342_v29 }
 0xa68   :  { %v2846_v30 = vsel %vm371_vm15, %v375_v47, %v1926_v63  ;;  %v2849_v21 = vsel %vm370_vm3, %v375_v47, %v1927_v58  ;;  %vm519_vm15 = vmand %vm480_vm14, %vm2354_vm9  ;;  %vm506_vm14 = vcmask 254977  }
 0xa69   :  { %v493_v33 = vsel %vm491_vm0, %v2846_v30, 0.0  ;;  %vm3745_vm0 = vcmask 126980  }
 0xa6a   :  { %v495_v6 = vsel %vm3742_vm6, %v493_v33, 0.0 }
 0xa84   :  { %v620_v4 = vpop.xlane.xlu1 %619 }
 0xa85   :  { %v623_v19 = vcvt.f32.s32 %v620_v4 }
 0xa87   :  { %v626_v55 = vadd.s32 %v625_v48, %v623_v19  ;;  %v521_v48 = vsel %vm519_vm15, 1, %v2180_v24 }
 0xa88   :  { %v2843_v8 = vpop.permute.xlu1 %1083 }
 0xa8c   :  { %v486_v22 = vpop.permute.xlu1 %485 }
 0xa8d   :  { %vm490_vm7 = vcmp.eq.s32.totalorder %v486_v22, 1 }
 0xa8e   :  { %v492_v46 = vsel %vm490_vm7, %v2849_v21, 0.0 }
 0xa8f   :  { %v494_v26 = vsel %vm3743_vm8, %v492_v46, 0.0  ;;  %vm520_vm8 = vmand %vm481_vm11, %vm2354_vm9 }
 0xa90   :  { %v496_v56 = vadd.f32 %v495_v6, %v494_v26  ;;  %v731_v57 = vpop.permute.xlu1 %730  ;;  %v522_v19 = vsel %vm520_vm8, 1, %v2180_v24  ;;  %v3744_v6 = vmov 2   ;;  %vm759_vm11 = vmxor %vm2510_vm10, %vm3706_vm4  ;;  %vm3704_vm8 = vcmask 128005  }
 0xa91   :  { %v732_v4 = vsel %vm2510_vm10, %v626_v55, %v731_v57  ;;  %vm760_vm6 = vmand %vm2354_vm9, %vm759_vm11  ;;  %vm3703_vm10 = vcmp.eq.s32.totalorder %v2843_v8, 1  ;;  %vm379_vm11 = vcmp.eq.s32.totalorder %v2323_v11, 0 }
 0xa92   :  { %v497_v63 = vrot.slane %v496_v56, 4  ;;  %736 = vperm.xlu1 %1890, %v732_v4   ;;  %v761_v35 = vsel %vm760_vm6, 1, %v2180_v24  ;;  %v2885_v4 = vsel %vm3745_vm0, %v1205_v28, 2147483647  ;;  %vm1130_vm3 = vmand %vm2814_vm5, %vm3703_vm10  ;;  %v2898_v28 = vsub.s32 4, %v2339_v25 }
 0xa93   :  { %v1131_v12 = vsel %vm1130_vm3, 1, %v2180_v24  ;;  %vm3747_vm6 = vcmp.eq.s32.totalorder %v2384_v16, 1  ;;  %vm544_vm3 = vcmp.eq.s32.totalorder %v2323_v11, 1 }
 0xa94   :  { %v498_v58 = vadd.f32 %v497_v63, %v496_v56  ;;  %v768_v56 = vrot.slane %v761_v35, %v2688_v13  ;;  %vm380_vm0 = vmand %vm379_vm11, %vm3747_vm6 }
 0xa95   :  { %v384_v35 = vsel %vm380_vm0, %v2632_v43, 0 }
 0xa96   :  { %v499_v9 = vrot.slane %v498_v58, 2  ;;  %1891 = vset.pattern.permute.xlu1 %v2181_v49  ;;  %v775_v57 = vrot.slane %v768_v56, %v2688_v13  ;;  %v549_v56 = vrot.slane %v384_v35, 7 }
 0xa97   :  { %524 = vperm.xlu1 %1891, %v521_v48   ;;  %v1135_v48 = vrot.slane %v1131_v12, %v2898_v28 }
 0xa98   :  { %v500_v47 = vadd.f32 %v499_v9, %v498_v58  ;;  %v776_v63 = vcombine.high %v775_v57, %v775_v57  ;;  %v1208_v58 = vshra.s32 %v2885_v4, 16 }
 0xa99   :  { %vm1136_vm7 = vcmp.eq.s32.totalorder %v1135_v48, 1 }
 0xa9a   :  { %v501_v33 = vrot.slane %v500_v47, 1  ;;  %v2888_v9 = vcvt.s32.f32 %v1208_v58 }
 0xa9b   :  { %527 = vperm.xlu1 %1891, %v522_v19   ;;  %v2908_v19 = vsel %vm1136_vm7, 3221225472, %v2647_v31  ;;  %vm3748_vm7 = vcmp.eq.s32.totalorder %v2454_v15, 1 }
 0xa9c   :  { %v502_v22 = vadd.f32 %v501_v33, %v500_v47  ;;  %v2903_v47 = vrot.slane %v2517_v37, %v2546_v32  ;;  %v3708_v37 = vmov 5   ;;  %vm545_vm10 = vmand %vm544_vm3, %vm3748_vm7 }
 0xa9d   :  { %v550_v57 = vsel %vm545_vm10, %v2737_v5, %v549_v56  ;;  %vm800_vm10 = vcmp.eq.s32.totalorder %v2323_v11, %v2593_v34 }
 0xa9e   :  { %v503_v46 = vmul.f32 %v502_v22, %v2723_v2  ;;  %vm3705_vm15 = vcmp.eq.s32.totalorder %v2696_v39, %v2903_v47  ;;  %v1160_v22 = vsel %vm3704_vm8, %v2908_v19, 2147483648  ;;  %vm733_vm8 = vcmp.eq.s32.totalorder %v2323_v11, 2 }
 0xa9f   :  { %1893 = vset.pattern.permute.xlu1 %v3744_v6  ;;  %v672_v33 = vsel %vm3705_vm15, 1, %v2180_v24  ;;  %vm3749_vm15 = vcmp.eq.s32.totalorder %v2524_v41, 1 }
 0xaa0   :  { %v2872_v49 = vadd.f32 %v503_v46, %v2727_v60  ;;  %v1162_v46 = vshra.s32 %v1160_v22, 16  ;;  %vm2937_vm4 = vmand %vm733_vm8, %vm3749_vm15  ;;  %vm3752_vm15 = vcmask 125955   ;;  %vm3753_vm8 = vcmp.eq.s32.totalorder %v2471_v7, 1 }
 0xaa2   :  { %v505_v55 = vmul.f32 %v2872_v49, %v2872_v49 }
 0xaa4   :  { %v507_v26 = vsel %vm506_vm14, %v505_v55, 0.0  ;;  %v1164_v55 = vcvt.s32.f32 %v1162_v46  ;;  %vm669_vm14 = vcmp.eq.s32.totalorder %v2339_v25, %v2903_v47 }
 0xaa5   :  { %508 = vadd.xlane.f32.xlu0 %v507_v26  ;;  %v671_v31 = vsel %vm669_vm14, 1, %v2180_v24  ;;  %v3746_v26 = vmov 3  }
 0xabb   :  { %777 = vrot.lane.b32.xlu0 %v776_v63, %s2190_s28  ;;  %v2933_v63 = vrot.slane %v550_v57, 7 }
 0xabf   :  { %1211 = vmin.xlane.f32.xlu1 %v2888_v9 }
 0xad0   :  { %677 = vperm.xlu1 %1893, %v672_v33  }
 0xad4   :  { %1895 = vset.pattern.permute.xlu1 %v3708_v37 }
 0xada   :  { %1165 = vmax.xlane.f32.xlu0 %v1164_v55 }
 0xaf0   :  { %674 = vperm.xlu0 %1892, %v671_v31  }
 0xaf4   :  { %1894 = vset.pattern.permute.xlu0 %v3746_v26 }
 0xb0d   :  { %v2941_v16 = vpop.permute.xlu1 %736 }
 0xb0e   :  { %v739_v15 = vsel %vm2937_vm4, %v2941_v16, %v2933_v63  ;;  %v740_v43 = vsel %vm2531_vm13, %v2941_v16, %v2743_v54  ;;  %vm708_vm13 = vmand %vm669_vm14, %vm2354_vm9 }
 0xb0f   :  { %v2951_v5 = vrot.slane %v740_v43, 7  ;;  %v710_v34 = vsel %vm708_vm13, 1, %v2180_v24  ;;  %vm695_vm13 = vcmask 256002  }
 0xb11   :  { %v802_v41 = vsel %vm800_vm10, %v2951_v5, 0  ;;  %vm3754_vm10 = vcmask 261120  }
 0xb12   :  { %v803_v12 = vsel %vm3752_vm15, %v802_v41, 0  ;;  %v525_v57 = vpop.permute.xlu1 %524  ;;  %vm3755_vm15 = vmmov %vm3754_vm10 }
 0xb13   :  { %v805_v48 = vshrl.u32 %v803_v12, 16  ;;  %v804_v33 = vand.u32 65535, %v803_v12  ;;  %vm529_vm3 = vcmp.eq.s32.totalorder %v525_v57, 1 }
 0xb15   :  { %v807_v46 = vcvt.s32.f32 %v805_v48  ;;  %v806_v31 = vcvt.s32.f32 %v804_v33  ;;  %v1161_v33 = vand.u32 65535, %v1160_v22 }
 0xb16   :  { %v528_v43 = vpop.permute.xlu1 %527 }
 0xb17   :  { %810 = vadd.xlane.f32.xlu1 %v807_v46  ;;  %808 = vadd.xlane.f32.xlu0 %v806_v31  ;;  %vm530_vm0 = vcmp.eq.s32.totalorder %v528_v43, 1 }
 0xb2e   :  { %v509_v35 = vpop.xlane.xlu0 %508 }
 0xb32   :  { %v778_v56 = vpop.permute.xlu0 %777 }
 0xb33   :  { %v2958_v42 = vadd.s32 %v778_v56, %v2797_v3  ;;  %v510_v3 = vadd.f32 1e-12, %v509_v35  ;;  %v1163_v56 = vcvt.s32.f32 %v1161_v33 }
 0xb35   :  { %v918_v54 = vrot.slane %v2958_v42, %v2342_v29  ;;  %1912 = vrsqrt.f32 %v510_v3 }
 0xb37   :  { %919 = vrot.lane.b32.xlu1 %v918_v54, %s2192_s29  ;;  %v1207_v54 = vand.u32 65535, %v2885_v4 }
 0xb39   :  { %v1209_v3 = vcvt.s32.f32 %v1207_v54 }
 0xb3b   :  { %1229 = vperm.xlu1 %1895, %v2361_v52  }
 0xb3f   :  { %1896 = vset.pattern.permute.xlu1 %v3744_v6 }
 0xb40   :  { %713 = vperm.xlu1 %1896, %v710_v34  }
 0xb42   :  { %v1913_v41 = vpop.eup %1912 }
 0xb43   :  { %v512_v48 = vmul.f32 %v1913_v41, %v2872_v49 }
 0xb44   :  { %1897 = vset.pattern.permute.xlu1 %v3708_v37 }
 0xb45   :  { %v518_v46 = vsel %vm3753_vm8, %v512_v48, %v2333_v23 }
 0xb46   :  { %v534_v35 = vrot.slane %v518_v46, %v2476_v20 }
 0xb48   :  { %v1212_v12 = vpop.xlane.xlu1 %1211  ;;  %v2979_v22 = vsel %vm530_vm0, %v534_v35, %v2846_v30 }
 0xb49   :  { %vm1213_vm11 = vcmp.eq.f32.partialorder %v2888_v9, %v1212_v12 }
 0xb4a   :  { %v1214_v49 = vsel %vm1213_vm11, %v1209_v3, inf  ;;  %vm3758_vm11 = vmmov 1  }
 0xb4c   :  { %v678_v34 = vpop.permute.xlu1 %677 }
 0xb4d   :  { %vm680_vm6 = vcmp.eq.s32.totalorder %v678_v34, 1 }
 0xb4e   :  { %v682_v7 = vsel %vm680_vm6, %v2979_v22, 0.0  ;;  %vm948_vm6 = vmxor %vm2586_vm1, %vm3758_vm11 }
 0xb4f   :  { %v684_v9 = vsel %vm3754_vm10, %v682_v7, 0.0  ;;  %vm949_vm0 = vmand %vm2354_vm9, %vm948_vm6 }
 0xb50   :  { %v950_v40 = vsel %vm949_vm0, 1, %v2180_v24 }
 0xb63   :  { %v1166_v31 = vpop.xlane.xlu0 %1165 }
 0xb64   :  { %vm1167_vm14 = vcmp.eq.f32.partialorder %v1164_v55, %v1166_v31  ;;  %v2983_v55 = vsel %vm529_vm3, %v534_v35, %v2849_v21  ;;  %vm3759_vm3 = vcmp.eq.s32.totalorder %v2696_v39, %v2903_v47 }
 0xb65   :  { %v1168_v37 = vsel %vm1167_vm14, %v1163_v56, -inf }
 0xb66   :  { %1169 = vmax.xlane.f32.xlu0 %v1168_v37 }
 0xb6a   :  { %1215 = vmin.xlane.f32.xlu0 %v1214_v49 }
 0xb6b   :  { %v675_v4 = vpop.permute.xlu0 %674 }
 0xb6c   :  { %vm679_vm7 = vcmp.eq.s32.totalorder %v675_v4, 1 }
 0xb6d   :  { %v681_v20 = vsel %vm679_vm7, %v2983_v55, 0.0 }
 0xb6e   :  { %v683_v37 = vsel %vm3755_vm15, %v681_v20, 0.0  ;;  %vm990_vm15 = vcmp.eq.s32.totalorder %v2323_v11, %v2777_v1  ;;  %v1313_v1 = vrot.slane %v2821_v45, 7 }
 0xb6f   :  { %v685_v43 = vadd.f32 %v684_v9, %v683_v37 }
 0xb71   :  { %v686_v41 = vrot.slane %v685_v43, 4 }
 0xb73   :  { %v687_v48 = vadd.f32 %v686_v41, %v685_v43  ;;  %v1172_v43 = vcvt.f32.s32 %v1166_v31 }
 0xb75   :  { %v688_v30 = vrot.slane %v687_v48, 2 }
 0xb77   :  { %v689_v33 = vadd.f32 %v688_v30, %v687_v48  ;;  %v1218_v48 = vcvt.f32.s32 %v1212_v12  ;;  %v1173_v30 = vshll.u32 %v1172_v43, 16 }
 0xb79   :  { %v690_v46 = vrot.slane %v689_v33, 1 }
 0xb7b   :  { %v691_v57 = vadd.f32 %v690_v46, %v689_v33 }
 0xb7d   :  { %v692_v56 = vmul.f32 %v691_v57, %v2723_v2 }
 0xb7f   :  { %v2990_v54 = vadd.f32 %v692_v56, %v2727_v60  ;;  %v1219_v56 = vshll.u32 %v1218_v48, 16 }
 0xb81   :  { %v694_v21 = vmul.f32 %v2990_v54, %v2990_v54 }
 0xb83   :  { %v696_v34 = vsel %vm695_vm13, %v694_v21, 0.0  ;;  %vm3760_vm13 = vcmask 126980  }
 0xb84   :  { %697 = vadd.xlane.f32.xlu0 %v696_v34 }
 0xba0   :  { %v811_v35 = vpop.xlane.xlu1 %810  ;;  %v809_v49 = vpop.xlane.xlu0 %808 }
 0xba1   :  { %v813_v3 = vcvt.f32.s32 %v811_v35  ;;  %v812_v4 = vcvt.f32.s32 %v809_v49 }
 0xba3   :  { %v814_v7 = vshll.u32 %v813_v3, 16 }
 0xba5   :  { %v815_v20 = vadd.s32 %v814_v7, %v812_v4 }
 0xba9   :  { %v920_v9 = vpop.permute.xlu1 %919 }
 0xbaa   :  { %v921_v37 = vsel %vm2586_vm1, %v815_v20, %v920_v9  ;;  %vm709_vm1 = vmand %vm3759_vm3, %vm2354_vm9  ;;  %v3027_v20 = vrot.slane %v2599_v27, %v2620_v59 }
 0xbab   :  { %925 = vperm.xlu0 %1894, %v921_v37   ;;  %v711_v9 = vsel %vm709_vm1, 1, %v2180_v24  ;;  %v957_v37 = vrot.slane %v950_v40, %v2688_v13 }
 0xbac   :  { %vm3713_vm7 = vcmp.eq.s32.totalorder %v2339_v25, %v3027_v20  ;;  %vm859_vm10 = vcmp.eq.s32.totalorder %v2696_v39, %v3027_v20 }
 0xbad   :  { %v958_v43 = vcombine.high %v957_v37, %v957_v37  ;;  %v860_v47 = vsel %vm3713_vm7, 1, %v2180_v24 }
 0xbaf   :  { %v965_v27 = vrot.slane %v958_v43, %v2688_v13  ;;  %v3074_v43 = vsub.s32 5, %v2339_v25 }
 0xbef   :  { %v1170_v41 = vpop.xlane.xlu0 %1169 }
 0xbf0   :  { %v1171_v33 = vcvt.f32.s32 %v1170_v41  ;;  %v966_v41 = vcombine.high %v965_v27, %v965_v27 }
 0xbf2   :  { %v1174_v46 = vadd.s32 %v1173_v30, %v1171_v33 }
 0xbf3   :  { %v1216_v57 = vpop.xlane.xlu0 %1215 }
 0xbf4   :  { %vm1175_vm8 = vcmp.ge.s32.totalorder %v1174_v46, %v2364_v0  ;;  %v1217_v21 = vcvt.f32.s32 %v1216_v57  ;;  %v1177_v35 = vand.u32 127, %v1174_v46 }
 0xbf5   :  { %vm2999_vm14 = vmand %vm2354_vm9, %vm1175_vm8 }
 0xbf6   :  { %v1220_v3 = vadd.s32 %v1219_v56, %v1217_v21  ;;  %v1270_v12 = vsel %vm2999_vm14, 1, %v2180_v24  ;;  %v3009_v49 = vsub.s32 127, %v1177_v35 }
 0xbf7   :  { %1272 = vperm.xlu1 %1897, %v1270_v12  }
 0xbf8   :  { %v1221_v31 = vand.u32 127, %v1220_v3  ;;  %vm1179_vm4 = vcmp.eq.s32.totalorder %v2323_v11, %v3009_v49 }
 0xbfa   :  { %v1222_v7 = vrot.slane %v1221_v31, 7  ;;  %v3058_v31 = vpop.permute.xlu1 %1229 }
 0xbfc   :  { %v3016_v4 = vsel %vm2999_vm14, %v3009_v49, %v1222_v7 }
 0xbfd   :  { %1225 = vperm.xlu1 %1897, %v3016_v4  }
 0xbfe   :  { %v714_v38 = vpop.permute.xlu1 %713 }
 0xc01   :  { %1898 = vset.pattern.permute.xlu1 %v3744_v6  ;;  %v861_v6 = vsel %vm859_vm10, 1, %v2180_v24 }
 0xc02   :  { %716 = vperm.xlu1 %1898, %v711_v9  }
 0xc06   :  { %1899 = vset.pattern.permute.xlu1 %v3746_v26 }
 0xc07   :  { %863 = vperm.xlu1 %1899, %v860_v47  }
 0xc0b   :  { %866 = vperm.xlu1 %1899, %v861_v6  }
 0xc0d   :  { %v698_v26 = vpop.xlane.xlu0 %697 }
 0xc0e   :  { %v699_v12 = vadd.f32 1e-12, %v698_v26 }
 0xc0f   :  { %967 = vrot.lane.b32.xlu1 %v966_v41, %s2193_s30 }
 0xc10   :  { %1914 = vrsqrt.f32 %v699_v12 }
 0xc1d   :  { %v1915_v7 = vpop.eup %1914 }
 0xc1e   :  { %v701_v37 = vmul.f32 %v1915_v7, %v2990_v54 }
 0xc26   :  { %v3046_v48 = vpop.permute.xlu0 %925 }
 0xc27   :  { %v929_v30 = vsel %vm2615_vm12, %v3046_v48, %v2951_v5  ;;  %vm3710_vm12 = vcmp.eq.s32.totalorder %v3058_v31, 1 }
 0xc28   :  { %v3052_v33 = vrot.slane %v929_v30, 7  ;;  %v1310_v30 = vrot.slane %v2829_v53, 7 }
 0xc2a   :  { %v992_v46 = vsel %vm990_vm15, %v3052_v33, 0 }
 0xc2b   :  { %v993_v57 = vsel %vm3760_vm13, %v992_v46, 0  ;;  %vm3763_vm13 = vcmp.eq.s32.totalorder %v2541_v44, 1 }
 0xc2c   :  { %v994_v56 = vand.u32 65535, %v993_v57  ;;  %v995_v21 = vshrl.u32 %v993_v57, 16  ;;  %v707_v41 = vsel %vm3763_vm13, %v701_v37, %v2333_v23 }
 0xc2e   :  { %v996_v35 = vcvt.s32.f32 %v994_v56  ;;  %v997_v3 = vcvt.s32.f32 %v995_v21  ;;  %v1316_v56 = vrot.slane %v2833_v61, 7  ;;  %v723_v21 = vrot.slane %v707_v41, %v2546_v32 }
 0xc30   :  { %998 = vadd.xlane.f32.xlu0 %v996_v35 }
 0xc33   :  { %1000 = vadd.xlane.f32.xlu1 %v997_v3 }
 0xc72   :  { %v3060_v5 = vpop.permute.xlu1 %1272 }
 0xc73   :  { %vm3711_vm6 = vcmp.eq.s32.totalorder %v3060_v5, 1 }
 0xc78   :  { %v1226_v40 = vpop.permute.xlu1 %1225 }
 0xc79   :  { %vm1227_vm8 = vcmp.eq.s32.totalorder %v2323_v11, %v1226_v40 }
 0xc7a   :  { %vm3068_vm0 = vmand %vm1227_vm8, %vm3710_vm12  ;;  %vm3712_vm8 = vcmask 129030  }
 0xc7b   :  { %v3079_v45 = vsel %vm3068_vm0, %v2387_v17, %v1313_v1  ;;  %vm1319_vm3 = vmand %vm3068_vm0, %vm3711_vm6  ;;  %v3104_v44 = vsel %vm3068_vm0, 1.0, %v1310_v30 }
 0xc7c   :  { %vm1387_vm1 = vcmp.gt.s32.totalorder %v3079_v45, 0  ;;  %v1320_v47 = vsel %vm1319_vm3, 1, %v2180_v24 }
 0xc7d   :  { %v1388_v27 = vsel %vm1387_vm1, %v3079_v45, 0  ;;  %v717_v54 = vpop.permute.xlu1 %716  ;;  %v1324_v6 = vrot.slane %v1320_v47, %v3074_v43 }
 0xc7e   :  { %vm1389_vm15 = vcmp.lt.s32.totalorder %v1388_v27, 32767  ;;  %vm719_vm1 = vcmp.eq.s32.totalorder %v717_v54, 1 }
 0xc7f   :  { %v1390_v26 = vsel %vm1389_vm15, %v1388_v27, 32767  ;;  %vm1325_vm12 = vcmp.eq.s32.totalorder %v1324_v6, 1  ;;  %vm1386_vm15 = vcmp.gt.f32.partialorder %v3104_v44, 0.0 }
 0xc80   :  { %v1391_v46 = vmul.u32 128, %v1390_v26  ;;  %v3094_v57 = vsel %vm1325_vm12, 3221225472, %v2908_v19  ;;  %v3109_v19 = vsel %vm3068_vm0, 1.0, %v1316_v56  ;;  %vm718_vm12 = vcmp.eq.s32.totalorder %v714_v38, 1 }
 0xc81   :  { %v3100_v35 = vsel %vm3712_vm8, %v3094_v57, 2147483648  ;;  %v3115_v7 = vsel %vm718_vm12, %v723_v21, %v2983_v55  ;;  %vm1385_vm13 = vcmp.gt.f32.partialorder %v3109_v19, 0.0  ;;  %v3123_v38 = vsel %vm719_vm1, %v723_v21, %v2979_v22 }
 0xc82   :  { %v864_v3 = vpop.permute.xlu1 %863  ;;  %v1352_v12 = vshra.s32 %v3100_v35, 16  ;;  %v1392_v53 = vadd.s32 16777216, %v1391_v46  ;;  %vm3764_vm12 = vcmask 128005   ;;  %vm3765_vm8 = vcmask 261120  }
 0xc83   :  { %vm868_vm3 = vcmp.eq.s32.totalorder %v864_v3, 1  ;;  %vm3766_vm7 = vmmov %vm3765_vm8 }
 0xc84   :  { %v3111_v32 = vcvt.s32.f32 %v1352_v12  ;;  %v1393_v61 = vadd.s32 %v1392_v53, %v2323_v11  ;;  %v870_v40 = vsel %vm868_vm3, %v3115_v7, 0.0  ;;  %v3141_v12 = vrot.slane %v2788_v18, %v2898_v28 }
 0xc85   :  { %v872_v54 = vsel %vm3765_vm8, %v870_v40, 0.0  ;;  %vm3768_vm8 = vcmp.eq.s32.totalorder %v2339_v25, %v3027_v20 }
 0xc86   :  { %1355 = vmax.xlane.f32.xlu1 %v3111_v32  ;;  %v867_v1 = vpop.permute.xlu1 %866  ;;  %v1394_v37 = vsel %vm1386_vm15, %v1393_v61, %v2323_v11  ;;  %vm897_vm3 = vmand %vm3768_vm8, %vm2354_vm9  ;;  %vm1049_vm1 = vcmp.eq.s32.totalorder %v2696_v39, %v3141_v12 }
 0xc87   :  { %vm869_vm6 = vcmp.eq.s32.totalorder %v867_v1, 1  ;;  %v1395_v47 = vsel %vm1385_vm13, 1073741824, %v1394_v37  ;;  %v3767_v37 = vmov 4  }
 0xc88   :  { %v871_v27 = vsel %vm869_vm6, %v3123_v38, 0.0  ;;  %v1396_v55 = vsel %vm3764_vm12, %v1395_v47, 2147483647  ;;  %vm1048_vm6 = vcmp.eq.s32.totalorder %v2339_v25, %v3141_v12  ;;  %vm1138_vm12 = vmxor %vm2781_vm2, %vm3758_vm11  ;;  %v3779_v12 = vmov 5  }
 0xc89   :  { %v873_v6 = vsel %vm3766_vm7, %v871_v27, 0.0  ;;  %v1398_v41 = vshra.s32 %v1396_v55, 16  ;;  %vm898_vm7 = vmand %vm859_vm10, %vm2354_vm9  ;;  %v1050_v47 = vsel %vm1048_vm6, 1, %v2180_v24  ;;  %vm884_vm10 = vcmask 257027  }
 0xc8a   :  { %v874_v26 = vadd.f32 %v873_v6, %v872_v54  ;;  %v968_v30 = vpop.permute.xlu1 %967  ;;  %v900_v61 = vsel %vm898_vm7, 1, %v2180_v24  ;;  %vm1139_vm7 = vmand %vm2354_vm9, %vm1138_vm12 }
 0xc8b   :  { %v3130_v46 = vadd.s32 %v968_v30, %v2958_v42  ;;  %v1400_v56 = vcvt.s32.f32 %v1398_v41  ;;  %v899_v41 = vsel %vm897_vm3, 1, %v2180_v24  ;;  %vm3769_vm3 = vcmp.eq.s32.totalorder %v2607_v50, 1 }
 0xc8c   :  { %v875_v3 = vrot.slane %v874_v26, 4 }
 0xc8d   :  { %v1108_v22 = vrot.slane %v3130_v46, %v2342_v29  ;;  %1401 = vmin.xlane.f32.xlu1 %v1400_v56 }
 0xc8e   :  { %v876_v21 = vadd.f32 %v875_v3, %v874_v26  ;;  %v1051_v26 = vsel %vm1049_vm1, 1, %v2180_v24 }
 0xc8f   :  { %1109 = vrot.lane.b32.xlu0 %v1108_v22, %s2194_s14 }
 0xc90   :  { %v877_v42 = vrot.slane %v876_v21, 2 }
 0xc92   :  { %v878_v53 = vadd.f32 %v877_v42, %v876_v21 }
 0xc93   :  { %905 = vperm.xlu0 %1894, %v900_v61  }
 0xc94   :  { %v879_v40 = vrot.slane %v878_v53, 1 }
 0xc96   :  { %v880_v1 = vadd.f32 %v879_v40, %v878_v53  ;;  %v1351_v40 = vand.u32 65535, %v3100_v35  ;;  %v1140_v35 = vsel %vm1139_vm7, 1, %v2180_v24  ;;  %vm3770_vm7 = vcmask 261120  }
 0xc97   :  { %1900 = vset.pattern.permute.xlu0 %v3767_v37 }
 0xc98   :  { %1053 = vperm.xlu0 %1900, %v1050_v47   ;;  %v881_v18 = vmul.f32 %v880_v1, %v2723_v2 }
 0xc9a   :  { %v882_v27 = vadd.f32 %v881_v18, %v2727_v60 }
 0xc9c   :  { %v883_v54 = vmul.f32 %v882_v27, %v882_v27 }
 0xc9e   :  { %v885_v6 = vsel %vm884_vm10, %v883_v54, 0.0  ;;  %v1397_v54 = vand.u32 65535, %v1396_v55  ;;  %vm1327_vm10 = vmxor %vm2999_vm14, %vm3758_vm11 }
 0xc9f   :  { %886 = vadd.xlane.f32.xlu1 %v885_v6  ;;  %vm1328_vm8 = vmand %vm2354_vm9, %vm1327_vm10 }
 0xca0   :  { %v1399_v6 = vcvt.s32.f32 %v1397_v54  ;;  %vm3771_vm10 = vmmov %vm3770_vm7 }
 0xcb0   :  { %902 = vperm.xlu1 %1899, %v899_v41  }
 0xcb4   :  { %1901 = vset.pattern.permute.xlu1 %v3767_v37  ;;  %v1353_v37 = vcvt.s32.f32 %v1351_v40 }
 0xcb5   :  { %1056 = vperm.xlu1 %1901, %v1051_v26  }
 0xcb9   :  { %v999_v22 = vpop.xlane.xlu0 %998 }
 0xcba   :  { %v1002_v20 = vcvt.f32.s32 %v999_v22 }
 0xcbc   :  { %v1001_v30 = vpop.xlane.xlu1 %1000 }
 0xcbd   :  { %v1003_v3 = vcvt.f32.s32 %v1001_v30 }
 0xcbf   :  { %v1004_v21 = vshll.u32 %v1003_v3, 16 }
 0xcc1   :  { %v1005_v42 = vadd.s32 %v1004_v21, %v1002_v20 }
 0xd01   :  { %v1110_v53 = vpop.permute.xlu0 %1109 }
 0xd02   :  { %v1111_v61 = vsel %vm2781_vm2, %v1005_v42, %v1110_v53  ;;  %vm1088_vm2 = vmand %vm1049_vm1, %vm2354_vm9  ;;  %v2196_v42 = vmov 6  }
 0xd03   :  { %1115 = vperm.xlu0 %1900, %v1111_v61   ;;  %v1090_v22 = vsel %vm1088_vm2, 1, %v2180_v24  ;;  %vm3772_vm2 = vcmp.eq.s32.totalorder %v2605_v10, 1 }
 0xd0f   :  { %v3169_v1 = vpop.xlane.xlu1 %1355 }
 0xd10   :  { %vm1357_vm15 = vcmp.eq.f32.partialorder %v3111_v32, %v3169_v1  ;;  %v1141_v32 = vcombine.high %v1140_v35, %v1140_v35  ;;  %v1362_v49 = vcvt.f32.s32 %v3169_v1 }
 0xd11   :  { %v1358_v47 = vsel %vm1357_vm15, %v1353_v37, -inf  ;;  %v906_v37 = vpop.permute.xlu0 %905 }
 0xd12   :  { %1359 = vmax.xlane.f32.xlu1 %v1358_v47  ;;  %v1148_v55 = vrot.slane %v1141_v32, %v2688_v13  ;;  %vm908_vm1 = vcmp.eq.s32.totalorder %v906_v37, 1 }
 0xd14   :  { %v1155_v62 = vrot.slane %v1148_v55, %v2688_v13 }
 0xd16   :  { %v3173_v18 = vpop.xlane.xlu1 %1401 }
 0xd17   :  { %vm1403_vm13 = vcmp.eq.f32.partialorder %v1400_v56, %v3173_v18  ;;  %v1329_v56 = vsel %vm1328_vm8, 1, %v2180_v24  ;;  %vm922_vm8 = vcmp.eq.s32.totalorder %v2323_v11, 3 }
 0xd18   :  { %v1404_v41 = vsel %vm1403_vm13, %v1399_v6, inf  ;;  %v1330_v26 = vcombine.high %v1329_v56, %v1329_v56 }
 0xd1a   :  { %v1337_v21 = vrot.slane %v1330_v26, %v2688_v13 }
 0xd1c   :  { %v1338_v20 = vcombine.high %v1337_v21, %v1337_v21 }
 0xd1e   :  { %v1345_v53 = vrot.slane %v1338_v20, %v2688_v13 }
 0xd22   :  { %1405 = vmin.xlane.f32.xlu0 %v1404_v41  ;;  %v1054_v41 = vpop.permute.xlu0 %1053 }
 0xd23   :  { %vm1058_vm13 = vcmp.eq.s32.totalorder %v1054_v41, 1 }
 0xd28   :  { %v887_v30 = vpop.xlane.xlu1 %886 }
 0xd29   :  { %v888_v3 = vadd.f32 1e-12, %v887_v30 }
 0xd2b   :  { %1916 = vrsqrt.f32 %v888_v3 }
 0xd2c   :  { %v903_v54 = vpop.permute.xlu1 %902 }
 0xd2d   :  { %vm907_vm15 = vcmp.eq.s32.totalorder %v903_v54, 1 }
 0xd30   :  { %v1057_v35 = vpop.permute.xlu1 %1056 }
 0xd31   :  { %vm1059_vm12 = vcmp.eq.s32.totalorder %v1057_v35, 1  ;;  %v1363_v35 = vshll.u32 %v1362_v49, 16 }
 0xd38   :  { %1156 = vrot.lane.b32.xlu0 %v1155_v62, %s2195_s15  ;;  %v1917_v61 = vpop.eup %1916 }
 0xd39   :  { %v890_v40 = vmul.f32 %v1917_v61, %v882_v27 }
 0xd3b   :  { %v896_v47 = vsel %vm3769_vm3, %v890_v40, %v2333_v23  ;;  %vm923_vm3 = vmand %vm922_vm8, %vm3772_vm2 }
 0xd3c   :  { %1095 = vperm.xlu0 %1900, %v1090_v22   ;;  %v912_v6 = vrot.slane %v896_v47, %v2620_v59  ;;  %vm1087_vm8 = vmand %vm1048_vm6, %vm2354_vm9 }
 0xd3e   :  { %v3205_v32 = vsel %vm907_vm15, %v912_v6, %v3115_v7  ;;  %v3208_v55 = vsel %vm908_vm1, %v912_v6, %v3123_v38  ;;  %v927_v38 = vrot.slane %v739_v15, 7  ;;  %vm1112_vm1 = vcmp.eq.s32.totalorder %v2323_v11, 4 }
 0xd3f   :  { %v1060_v27 = vsel %vm1058_vm13, %v3205_v32, 0.0  ;;  %v1061_v50 = vsel %vm1059_vm12, %v3208_v55, 0.0  ;;  %vm3773_vm15 = vcmp.eq.s32.totalorder %v2807_v14, 1  ;;  %vm3776_vm12 = vcmask 128005  }
 0xd40   :  { %1902 = vset.pattern.permute.xlu0 %v2196_v42  ;;  %v1062_v56 = vsel %vm3770_vm7, %v1060_v27, 0.0  ;;  %v1063_v59 = vsel %vm3771_vm10, %v1061_v50, 0.0  ;;  %v928_v21 = vsel %vm923_vm3, %v3046_v48, %v927_v38  ;;  %vm3228_vm13 = vmand %vm1112_vm1, %vm3773_vm15 }
 0xd41   :  { %1419 = vperm.xlu0 %1902, %v2361_v52   ;;  %v1064_v62 = vadd.f32 %v1063_v59, %v1062_v56 }
 0xd43   :  { %v1065_v26 = vrot.slane %v1064_v62, 4 }
 0xd45   :  { %1346 = vrot.lane.b32.xlu0 %v1345_v53, %s2197_s2  ;;  %v1066_v30 = vadd.f32 %v1065_v26, %v1064_v62  ;;  %v3224_v53 = vrot.slane %v928_v21, 7  ;;  %v1408_v62 = vcvt.f32.s32 %v3173_v18 }
 0xd47   :  { %v1067_v3 = vrot.slane %v1066_v30, 2  ;;  %v1409_v26 = vshll.u32 %v1408_v62, 16 }
 0xd49   :  { %v1068_v22 = vadd.f32 %v1067_v3, %v1066_v30 }
 0xd4b   :  { %v1069_v7 = vrot.slane %v1068_v22, 1 }
 0xd4d   :  { %v1070_v20 = vadd.f32 %v1069_v7, %v1068_v22 }
 0xd4f   :  { %v1071_v16 = vmul.f32 %v1070_v20, %v2723_v2 }
 0xd51   :  { %v3250_v40 = vadd.f32 %v1071_v16, %v2727_v60 }
 0xd53   :  { %v1073_v36 = vmul.f32 %v3250_v40, %v3250_v40 }
 0xd7e   :  { %v3232_v58 = vpop.permute.xlu0 %1115 }
 0xd7f   :  { %v1118_v10 = vsel %vm3228_vm13, %v3232_v58, %v3224_v53  ;;  %v1119_v63 = vsel %vm2814_vm5, %v3232_v58, %v3052_v33  ;;  %vm1074_vm5 = vcmask 258052  }
 0xd80   :  { %v3243_v15 = vrot.slane %v1119_v63, 7  ;;  %v1075_v54 = vsel %vm1074_vm5, %v1073_v36, 0.0  ;;  %vm3782_vm5 = vcmp.eq.s32.totalorder %v2843_v8, 1 }
 0xd82   :  { %v1181_v14 = vsel %vm1179_vm4, %v3243_v15, 0 }
 0xd83   :  { %v1182_v48 = vsel %vm3776_vm12, %v1181_v14, 0  ;;  %v1089_v14 = vsel %vm1087_vm8, 1, %v2180_v24 }
 0xd84   :  { %v1184_v37 = vshrl.u32 %v1182_v48, 16  ;;  %v1183_v33 = vand.u32 65535, %v1182_v48 }
 0xd86   :  { %v1186_v47 = vcvt.s32.f32 %v1184_v37  ;;  %v1185_v6 = vcvt.s32.f32 %v1183_v33 }
 0xd88   :  { %1189 = vadd.xlane.f32.xlu1 %v1186_v47 }
 0xd8c   :  { %1076 = vadd.xlane.f32.xlu1 %v1075_v54 }
 0xd90   :  { %1187 = vadd.xlane.f32.xlu1 %v1185_v6 }
 0xd9b   :  { %v1360_v41 = vpop.xlane.xlu1 %1359 }
 0xd9c   :  { %v1361_v27 = vcvt.f32.s32 %v1360_v41 }
 0xd9e   :  { %v1364_v50 = vadd.s32 %v1363_v35, %v1361_v27 }
 0xda0   :  { %vm1365_vm7 = vcmp.ge.s32.totalorder %v1364_v50, %v2364_v0  ;;  %v1367_v3 = vand.u32 127, %v1364_v50 }
 0xda1   :  { %vm3258_vm10 = vmand %vm2354_vm9, %vm1365_vm7 }
 0xda2   :  { %v1460_v59 = vsel %vm3258_vm10, 1, %v2180_v24  ;;  %v3269_v20 = vsub.s32 127, %v1367_v3 }
 0xda3   :  { %1462 = vperm.xlu0 %1902, %v1460_v59   ;;  %v1503_v59 = vrot.slane %v3079_v45, 7 }
 0xda4   :  { %vm1369_vm13 = vcmp.eq.s32.totalorder %v2323_v11, %v3269_v20 }
 0xdab   :  { %v1406_v1 = vpop.xlane.xlu0 %1405 }
 0xdac   :  { %v1407_v30 = vcvt.f32.s32 %v1406_v1 }
 0xdae   :  { %v1410_v22 = vadd.s32 %v1409_v26, %v1407_v30 }
 0xdaf   :  { %v1157_v7 = vpop.permute.xlu0 %1156 }
 0xdb0   :  { %v1411_v38 = vand.u32 127, %v1410_v22  ;;  %v3267_v21 = vadd.s32 %v1157_v7, %v3130_v46  ;;  %v3285_v46 = vrot.slane %v3016_v4, %v3074_v43  ;;  %v1500_v7 = vrot.slane %v3104_v44, 7 }
 0xdb2   :  { %v1412_v63 = vrot.slane %v1411_v38, 7  ;;  %v1297_v16 = vrot.slane %v3267_v21, %v2342_v29  ;;  %vm1237_vm2 = vcmp.eq.s32.totalorder %v2339_v25, %v3285_v46  ;;  %vm1238_vm6 = vcmp.eq.s32.totalorder %v2696_v39, %v3285_v46 }
 0xdb3   :  { %v1239_v48 = vsel %vm1237_vm2, 1, %v2180_v24  ;;  %v1240_v4 = vsel %vm1238_vm6, 1, %v2180_v24 }
 0xdb4   :  { %1298 = vrot.lane.b32.xlu1 %v1297_v16, %s2198_s16  ;;  %v3281_v18 = vsel %vm3258_vm10, %v3269_v20, %v1412_v63  ;;  %v1506_v63 = vrot.slane %v3109_v19, 7 }
 0xdb5   :  { %1415 = vperm.xlu0 %1902, %v3281_v18  }
 0xdb7   :  { %v1096_v36 = vpop.permute.xlu0 %1095 }
 0xdb8   :  { %1092 = vperm.xlu1 %1901, %v1089_v14  }
 0xdb9   :  { %1904 = vset.pattern.permute.xlu0 %v3779_v12 }
 0xdbc   :  { %1903 = vset.pattern.permute.xlu1 %v3779_v12  ;;  %v3305_v54 = vpop.permute.xlu0 %1419 }
 0xdbd   :  { %1242 = vperm.xlu1 %1903, %v1239_v48   ;;  %vm3714_vm3 = vcmp.eq.s32.totalorder %v3305_v54, 1 }
 0xdc0   :  { %v3307_v6 = vpop.permute.xlu0 %1346 }
 0xdc1   :  { %1245 = vperm.xlu1 %1903, %v1240_v4  }
 0xe11   :  { %v3303_v37 = vpop.xlane.xlu1 %1189 }
 0xe15   :  { %v1077_v47 = vpop.xlane.xlu1 %1076 }
 0xe16   :  { %v1078_v33 = vadd.f32 1e-12, %v1077_v47 }
 0xe18   :  { %1918 = vrsqrt.f32 %v1078_v33 }
 0xe19   :  { %v3309_v49 = vpop.xlane.xlu1 %1187 }
 0xe1e   :  { %v3311_v41 = vpop.permute.xlu0 %1462 }
 0xe25   :  { %v1919_v35 = vpop.eup %1918 }
 0xe26   :  { %v1299_v27 = vpop.permute.xlu1 %1298  ;;  %v1080_v1 = vmul.f32 %v1919_v35, %v3250_v40 }
 0xe28   :  { %v1086_v3 = vsel %vm3782_vm5, %v1080_v1, %v2333_v23 }
 0xe29   :  { %v1102_v16 = vrot.slane %v1086_v3, %v2898_v28 }
 0xe30   :  { %v1416_v50 = vpop.permute.xlu0 %1415 }
 0xe31   :  { %vm1417_vm1 = vcmp.eq.s32.totalorder %v2323_v11, %v1416_v50 }
 0xe32   :  { %vm3318_vm15 = vmand %vm1417_vm1, %vm3714_vm3  ;;  %vm1098_vm1 = vcmp.eq.s32.totalorder %v1096_v36, 1 }
 0xe33   :  { %v3326_v26 = vsel %vm3318_vm15, %v2387_v17, %v1503_v59  ;;  %v1093_v30 = vpop.permute.xlu1 %1092  ;;  %v3338_v14 = vsel %vm3318_vm15, 1.0, %v1500_v7  ;;  %v1508_v8 = vsel %vm3318_vm15, 1.0, %v1506_v63  ;;  %v3348_v28 = vsel %vm1098_vm1, %v1102_v16, %v3208_v55  ;;  %vm1277_vm1 = vmand %vm1238_vm6, %vm2354_vm9 }
 0xe34   :  { %vm1577_vm4 = vcmp.gt.s32.totalorder %v3326_v26, 0  ;;  %vm1097_vm7 = vcmp.eq.s32.totalorder %v1093_v30, 1  ;;  %vm1575_vm5 = vcmp.gt.f32.partialorder %v1508_v8, 0.0  ;;  %v1279_v8 = vsel %vm1277_vm1, 1, %v2180_v24 }
 0xe35   :  { %v1578_v45 = vsel %vm1577_vm4, %v3326_v26, 0  ;;  %v3341_v48 = vsel %vm1097_vm7, %v1102_v16, %v3205_v32  ;;  %vm3783_vm7 = vcmask 261120   ;;  %vm1464_vm6 = vcmp.eq.s32.totalorder %v3311_v41, 1 }
 0xe36   :  { %vm1579_vm12 = vcmp.lt.s32.totalorder %v1578_v45, 32767  ;;  %vm3784_vm3 = vmmov %vm3783_vm7 }
 0xe37   :  { %v1580_v22 = vsel %vm1579_vm12, %v1578_v45, 32767  ;;  %vm1576_vm12 = vcmp.gt.f32.partialorder %v3338_v14, 0.0 }
 0xe38   :  { %v1581_v38 = vmul.u32 128, %v1580_v22  ;;  %v1243_v40 = vpop.permute.xlu1 %1242 }
 0xe39   :  { %vm1247_vm8 = vcmp.eq.s32.totalorder %v1243_v40, 1 }
 0xe3a   :  { %v1582_v12 = vadd.s32 16777216, %v1581_v38  ;;  %v1249_v44 = vsel %vm1247_vm8, %v3341_v48, 0.0  ;;  %vm3785_vm8 = vcmask 129030  }
 0xe3b   :  { %v1251_v33 = vsel %vm3783_vm7, %v1249_v44, 0.0  ;;  %v1192_v44 = vcvt.f32.s32 %v3303_v37  ;;  %v3392_v37 = vsub.s32 6, %v2339_v25 }
 0xe3c   :  { %v1246_v4 = vpop.permute.xlu1 %1245  ;;  %v1583_v19 = vadd.s32 %v1582_v12, %v2323_v11 }
 0xe3d   :  { %vm1248_vm4 = vcmp.eq.s32.totalorder %v1246_v4, 1  ;;  %v1191_v4 = vcvt.f32.s32 %v3309_v49 }
 0xe3e   :  { %v1250_v47 = vsel %vm1248_vm4, %v3348_v28, 0.0  ;;  %v1584_v32 = vsel %vm1576_vm12, %v1583_v19, %v2323_v11  ;;  %v1193_v19 = vshll.u32 %v1192_v44, 16  ;;  %vm1276_vm4 = vmand %vm1237_vm2, %vm2354_vm9  ;;  %vm1539_vm2 = vcmask 130055  }
 0xe3f   :  { %v1252_v36 = vsel %vm3784_vm3, %v1250_v47, 0.0  ;;  %v1585_v35 = vsel %vm1575_vm5, 1073741824, %v1584_v32  ;;  %vm1263_vm3 = vcmask 259077   ;;  %vm1509_vm12 = vmand %vm3318_vm15, %vm1464_vm6 }
 0xe40   :  { %v1253_v50 = vadd.f32 %v1252_v36, %v1251_v33  ;;  %v3356_v59 = vsel %vm3785_vm8, %v1585_v35, 2147483647  ;;  %v1194_v47 = vadd.s32 %v1193_v19, %v1191_v4  ;;  %v1278_v33 = vsel %vm1276_vm4, 1, %v2180_v24 }
 0xe41   :  { %v1588_v55 = vshra.s32 %v3356_v59, 16  ;;  %v1510_v34 = vsel %vm1509_vm12, 1, %v2180_v24  ;;  %v3399_v35 = vrot.slane %v3281_v18, %v3392_v37  ;;  %vm1301_vm8 = vcmp.eq.s32.totalorder %v2323_v11, 5 }
 0xe42   :  { %v1254_v1 = vrot.slane %v1253_v50, 4  ;;  %v1300_v32 = vsel %vm2999_vm14, %v1194_v47, %v1299_v27  ;;  %v1514_v46 = vrot.slane %v1510_v34, %v3392_v37  ;;  %vm3789_vm4 = vcmask 129030  }
 0xe43   :  { %v3359_v30 = vcvt.s32.f32 %v1588_v55  ;;  %vm1427_vm5 = vcmp.eq.s32.totalorder %v2339_v25, %v3399_v35  ;;  %vm1428_vm7 = vcmp.eq.s32.totalorder %v2696_v39, %v3399_v35  ;;  %v3419_v55 = vrot.slane %v1118_v10, 7 }
 0xe44   :  { %v1255_v45 = vadd.f32 %v1254_v1, %v1253_v50  ;;  %vm1515_vm14 = vcmp.eq.s32.totalorder %v1514_v46, 1  ;;  %v1429_v50 = vsel %vm1427_vm5, 1, %v2180_v24  ;;  %v1587_v44 = vand.u32 65535, %v3356_v59 }
 0xe45   :  { %1591 = vmin.xlane.f32.xlu0 %v3359_v30  ;;  %v1516_v49 = vsel %vm1515_vm14, 3221225472, %v3094_v57  ;;  %v1430_v57 = vsel %vm1428_vm7, 1, %v2180_v24 }
 0xe46   :  { %v1256_v3 = vrot.slane %v1255_v45, 2  ;;  %v1589_v59 = vcvt.s32.f32 %v1587_v44 }
 0xe48   :  { %v1257_v22 = vadd.f32 %v1256_v3, %v1255_v45 }
 0xe4a   :  { %v1258_v7 = vrot.slane %v1257_v22, 1 }
 0xe4c   :  { %v1259_v38 = vadd.f32 %v1258_v7, %v1257_v22 }
 0xe4e   :  { %v1260_v40 = vmul.f32 %v1259_v38, %v2723_v2 }
 0xe50   :  { %v3364_v63 = vadd.f32 %v1260_v40, %v2727_v60  ;;  %v3445_v40 = vadd.s32 %v3307_v6, %v3267_v21 }
 0xe52   :  { %v1262_v16 = vmul.f32 %v3364_v63, %v3364_v63 }
 0xe54   :  { %v1264_v12 = vsel %vm1263_vm3, %v1262_v16, 0.0  ;;  %vm3786_vm3 = vcmp.eq.s32.totalorder %v3058_v31, 1 }
 0xe55   :  { %1265 = vadd.xlane.f32.xlu1 %v1264_v12  ;;  %vm3423_vm1 = vmand %vm1301_vm8, %vm3786_vm3 }
 0xe5b   :  { %1284 = vperm.xlu0 %1904, %v1279_v8  }
 0xe66   :  { %1304 = vperm.xlu1 %1903, %v1300_v32  }
 0xe6a   :  { %1281 = vperm.xlu1 %1903, %v1278_v33  }
 0xe6e   :  { %1905 = vset.pattern.permute.xlu1 %v2196_v42  ;;  %v1540_v42 = vsel %vm1539_vm2, %v1516_v49, 2147483648 }
 0xe6f   :  { %v1542_v27 = vshra.s32 %v1540_v42, 16  ;;  %v1541_v12 = vand.u32 65535, %v1540_v42 }
 0xe71   :  { %v1544_v36 = vcvt.s32.f32 %v1542_v27  ;;  %v1543_v21 = vcvt.s32.f32 %v1541_v12 }
 0xe8e   :  { %1545 = vmax.xlane.f32.xlu1 %v1544_v36 }
 0xe9f   :  { %1432 = vperm.xlu1 %1905, %v1429_v50  }
 0xea3   :  { %1435 = vperm.xlu1 %1905, %v1430_v57  }
 0xece   :  { %v3451_v4 = vpop.xlane.xlu0 %1591 }
 0xecf   :  { %vm1593_vm14 = vcmp.eq.f32.partialorder %v3359_v30, %v3451_v4 }
 0xed0   :  { %v1594_v34 = vsel %vm1593_vm14, %v1589_v59, inf  ;;  %vm1453_vm14 = vcmask 260102  }
 0xed6   :  { %v1285_v33 = vpop.permute.xlu0 %1284 }
 0xede   :  { %v1266_v18 = vpop.xlane.xlu1 %1265 }
 0xedf   :  { %v1267_v9 = vadd.f32 1e-12, %v1266_v18 }
 0xee1   :  { %1920 = vrsqrt.f32 %v1267_v9 }
 0xee2   :  { %v3427_v45 = vpop.permute.xlu1 %1304 }
 0xee3   :  { %v1307_v3 = vsel %vm3423_vm1, %v3427_v45, %v3419_v55  ;;  %v1308_v53 = vsel %vm3068_vm0, %v3427_v45, %v3243_v15  ;;  %v1487_v15 = vrot.slane %v3445_v40, %v2342_v29  ;;  %vm3790_vm0 = vcmp.eq.s32.totalorder %v3060_v5, 1 }
 0xee4   :  { %v3437_v61 = vrot.slane %v1308_v53, 7 }
 0xee6   :  { %v1371_v31 = vsel %vm1369_vm13, %v3437_v61, 0  ;;  %v1282_v16 = vpop.permute.xlu1 %1281  ;;  %vm1287_vm13 = vcmp.eq.s32.totalorder %v1285_v33, 1 }
 0xee7   :  { %v1372_v58 = vsel %vm3789_vm4, %v1371_v31, 0  ;;  %vm1286_vm3 = vcmp.eq.s32.totalorder %v1282_v16, 1 }
 0xee8   :  { %v1373_v10 = vand.u32 65535, %v1372_v58  ;;  %v1374_v22 = vshrl.u32 %v1372_v58, 16  ;;  %v2200_v58 = vmov 7  }
 0xee9   :  { %1907 = vset.pattern.permute.xlu0 %v2200_v58 }
 0xeea   :  { %v1375_v7 = vcvt.s32.f32 %v1373_v10  ;;  %v1376_v38 = vcvt.s32.f32 %v1374_v22 }
 0xeec   :  { %1377 = vadd.xlane.f32.xlu1 %v1375_v7  ;;  %1379 = vadd.xlane.f32.xlu0 %v1376_v38 }
 0xeee   :  { %v1921_v20 = vpop.eup %1920 }
 0xeef   :  { %v1269_v8 = vmul.f32 %v1921_v20, %v3364_v63 }
 0xef1   :  { %v1275_v6 = vsel %vm3790_vm0, %v1269_v8, %v2333_v23  ;;  %vm3791_vm0 = vcmask 261120  }
 0xef2   :  { %v1291_v63 = vrot.slane %v1275_v6, %v3074_v43 }
 0xef4   :  { %v3463_v46 = vsel %vm1286_vm3, %v1291_v63, %v3341_v48  ;;  %v3467_v42 = vsel %vm1287_vm13, %v1291_v63, %v3348_v28  ;;  %vm1466_vm13 = vmand %vm1427_vm5, %vm2354_vm9 }
 0xef5   :  { %v1468_v59 = vsel %vm1466_vm13, 1, %v2180_v24 }
 0xf02   :  { %1488 = vrot.lane.b32.xlu0 %v1487_v15, %s2199_s17 }
 0xf17   :  { %v3453_v19 = vpop.xlane.xlu1 %1545 }
 0xf18   :  { %vm1547_vm12 = vcmp.eq.f32.partialorder %v1544_v36, %v3453_v19  ;;  %v1552_v33 = vcvt.f32.s32 %v3453_v19 }
 0xf19   :  { %v1548_v47 = vsel %vm1547_vm12, %v1543_v21, -inf  ;;  %vm3792_vm12 = vmmov %vm3791_vm0 }
 0xf1a   :  { %1549 = vmax.xlane.f32.xlu1 %v1548_v47 }
 0xf1b   :  { %v1433_v32 = vpop.permute.xlu1 %1432 }
 0xf1c   :  { %vm1437_vm8 = vcmp.eq.s32.totalorder %v1433_v32, 1 }
 0xf1d   :  { %v1439_v5 = vsel %vm1437_vm8, %v3463_v46, 0.0  ;;  %vm1517_vm8 = vmxor %vm3258_vm10, %vm3758_vm11 }
 0xf1e   :  { %1595 = vmin.xlane.f32.xlu1 %v1594_v34  ;;  %v1441_v30 = vsel %vm3791_vm0, %v1439_v5, 0.0  ;;  %vm1518_vm3 = vmand %vm2354_vm9, %vm1517_vm8  ;;  %v1598_v5 = vcvt.f32.s32 %v3451_v4 }
 0xf1f   :  { %v1436_v49 = vpop.permute.xlu1 %1435  ;;  %v1519_v38 = vsel %vm1518_vm3, 1, %v2180_v24 }
 0xf20   :  { %vm1438_vm4 = vcmp.eq.s32.totalorder %v1436_v49, 1  ;;  %v1520_v9 = vcombine.high %v1519_v38, %v1519_v38  ;;  %v1553_v49 = vshll.u32 %v1552_v33, 16 }
 0xf21   :  { %v1440_v43 = vsel %vm1438_vm4, %v3467_v42, 0.0  ;;  %vm1467_vm4 = vmand %vm1428_vm7, %vm2354_vm9 }
 0xf22   :  { %v1442_v27 = vsel %vm3792_vm12, %v1440_v43, 0.0  ;;  %v1527_v12 = vrot.slane %v1520_v9, %v2688_v13  ;;  %v1469_v56 = vsel %vm1467_vm4, 1, %v2180_v24  ;;  %vm1491_vm12 = vcmp.eq.s32.totalorder %v2323_v11, 6 }
 0xf23   :  { %v1443_v36 = vadd.f32 %v1442_v27, %v1441_v30 }
 0xf24   :  { %v1534_v47 = vrot.slane %v1527_v12, %v2688_v13 }
 0xf25   :  { %v1444_v50 = vrot.slane %v1443_v36, 4 }
 0xf26   :  { %v1535_v32 = vcombine.high %v1534_v47, %v1534_v47 }
 0xf27   :  { %v1445_v57 = vadd.f32 %v1444_v50, %v1443_v36  ;;  %v1599_v36 = vshll.u32 %v1598_v5, 16 }
 0xf29   :  { %v1446_v48 = vrot.slane %v1445_v57, 2 }
 0xf2b   :  { %v1447_v18 = vadd.f32 %v1446_v48, %v1445_v57 }
 0xf2d   :  { %v1448_v53 = vrot.slane %v1447_v18, 1 }
 0xf2f   :  { %v1449_v31 = vadd.f32 %v1448_v53, %v1447_v18  ;;  %v1615_v18 = vsub.s32 7, %v2339_v25 }
 0xf31   :  { %v1450_v10 = vmul.f32 %v1449_v31, %v2723_v2 }
 0xf33   :  { %v3474_v28 = vadd.f32 %v1450_v10, %v2727_v60 }
 0xf35   :  { %v1452_v22 = vmul.f32 %v3474_v28, %v3474_v28 }
 0xf37   :  { %v1454_v7 = vsel %vm1453_vm14, %v1452_v22, 0.0  ;;  %v3534_v22 = vrot.slane %v1307_v3, 7  ;;  %vm3795_vm14 = vcmp.eq.s32.totalorder %v3305_v54, 1 }
 0xf38   :  { %1455 = vadd.xlane.f32.xlu0 %v1454_v7  ;;  %vm3538_vm8 = vmand %vm1491_vm12, %vm3795_vm14  ;;  %vm1643_vm12 = vcmask 261127  }
 0xf75   :  { %v1378_v15 = vpop.xlane.xlu1 %1377  ;;  %v1380_v20 = vpop.xlane.xlu0 %1379 }
 0xf76   :  { %v1382_v16 = vcvt.f32.s32 %v1380_v20  ;;  %v1381_v8 = vcvt.f32.s32 %v1378_v15 }
 0xf78   :  { %v1383_v44 = vshll.u32 %v1382_v16, 16 }
 0xf79   :  { %v1489_v6 = vpop.permute.xlu0 %1488 }
 0xf7a   :  { %v1384_v21 = vadd.s32 %v1383_v44, %v1381_v8 }
 0xf7c   :  { %v1490_v63 = vsel %vm3258_vm10, %v1384_v21, %v1489_v6 }
 0xf7d   :  { %1494 = vperm.xlu1 %1905, %v1490_v63  }
 0xf81   :  { %1536 = vrot.lane.b32.xlu1 %v1535_v32, %s2201_s18 }
 0xf85   :  { %1471 = vperm.xlu1 %1905, %v1468_v59  }
 0xf89   :  { %1474 = vperm.xlu1 %1905, %v1469_v56  }
 0xf8d   :  { %1906 = vset.pattern.permute.xlu1 %v2200_v58 }
 0xfa3   :  { %v1550_v34 = vpop.xlane.xlu1 %1549 }
 0xfa4   :  { %v1551_v43 = vcvt.f32.s32 %v1550_v34 }
 0xfa6   :  { %v1554_v30 = vadd.s32 %v1553_v49, %v1551_v43 }
 0xfa7   :  { %v1596_v27 = vpop.xlane.xlu1 %1595 }
 0xfa8   :  { %v1597_v50 = vcvt.f32.s32 %v1596_v27  ;;  %v1557_v57 = vand.u32 127, %v1554_v30  ;;  %vm1555_vm10 = vcmp.ge.s32.totalorder %v1554_v30, %v2364_v0 }
 0xfa9   :  { %vm3506_vm5 = vmand %vm2354_vm9, %vm1555_vm10 }
 0xfaa   :  { %v1600_v48 = vadd.s32 %v1599_v36, %v1597_v50  ;;  %v1558_v53 = vsub.s32 127, %v1557_v57  ;;  %v1650_v62 = vsel %vm3506_vm5, 1, %v2180_v24 }
 0xfac   :  { %v1601_v35 = vand.u32 127, %v1600_v48  ;;  %vm1559_vm1 = vcmp.eq.s32.totalorder %v2323_v11, %v1558_v53 }
 0xfae   :  { %v1602_v31 = vrot.slane %v1601_v35, 7 }
 0xfb0   :  { %v1603_v4 = vsel %vm3506_vm5, %v1558_v53, %v1602_v31 }
 0xfb1   :  { %v3514_v58 = vrot.slane %v1603_v4, %v1615_v18 }
 0xfb3   :  { %vm1617_vm7 = vcmp.eq.s32.totalorder %v2339_v25, %v3514_v58  ;;  %vm1618_vm0 = vcmp.eq.s32.totalorder %v2696_v39, %v3514_v58 }
 0xfb4   :  { %v1619_v0 = vsel %vm1617_vm7, 1, %v2180_v24  ;;  %v1620_v10 = vsel %vm1618_vm0, 1, %v2180_v24  ;;  %vm1656_vm14 = vmand %vm1617_vm7, %vm2354_vm9 }
 0xfb5   :  { %1622 = vperm.xlu1 %1906, %v1619_v0   ;;  %v1658_v35 = vsel %vm1656_vm14, 1, %v2180_v24 }
 0xfb9   :  { %1625 = vperm.xlu1 %1906, %v1620_v10  }
 0xff8   :  { %v3542_v38 = vpop.permute.xlu1 %1494 }
 0xff9   :  { %v1497_v9 = vsel %vm3538_vm8, %v3542_v38, %v3534_v22  ;;  %v1498_v55 = vsel %vm3318_vm15, %v3542_v38, %v3437_v61  ;;  %v1456_v61 = vpop.xlane.xlu0 %1455  ;;  %vm1657_vm15 = vmand %vm1618_vm0, %vm2354_vm9  ;;  %vm3798_vm0 = vcmask 261120  }
 0xffa   :  { %v3552_v1 = vrot.slane %v1498_v55, 7  ;;  %v1457_v44 = vadd.f32 1e-12, %v1456_v61 }
 0xffc   :  { %v1561_v54 = vsel %vm1559_vm1, %v3552_v1, 0  ;;  %v1537_v12 = vpop.permute.xlu1 %1536  ;;  %1922 = vrsqrt.f32 %v1457_v44  ;;  %vm1695_vm1 = vmxor %vm3506_vm5, %vm3758_vm11 }
 0xffd   :  { %v1562_v45 = vsel %vm1539_vm2, %v1561_v54, 0  ;;  %v3558_v8 = vadd.s32 %v1537_v12, %v3445_v40  ;;  %v1659_v40 = vsel %vm1657_vm15, 1, %v2180_v24  ;;  %vm1696_vm15 = vmand %vm2354_vm9, %vm1695_vm1  ;;  %v1690_v12 = vrot.slane %v3338_v14, 7 }
 0xffe   :  { %v1564_v3 = vshrl.u32 %v1562_v45, 16  ;;  %v1563_v15 = vand.u32 65535, %v1562_v45 }
 0xfff   :  { %v1677_v21 = vrot.slane %v3558_v8, %v2342_v29 }
0x1000   :  { %v1566_v20 = vcvt.s32.f32 %v1564_v3  ;;  %v1565_v16 = vcvt.s32.f32 %v1563_v15  ;;  %v1472_v6 = vpop.permute.xlu1 %1471 }
0x1001   :  { %vm1476_vm3 = vcmp.eq.s32.totalorder %v1472_v6, 1 }
0x1002   :  { %1569 = vadd.xlane.f32.xlu1 %v1566_v20  ;;  %1567 = vadd.xlane.f32.xlu0 %v1565_v16 }
0x1004   :  { %v1475_v29 = vpop.permute.xlu1 %1474 }
0x1005   :  { %vm1477_vm4 = vcmp.eq.s32.totalorder %v1475_v29, 1 }
0x1009   :  { %v1923_v47 = vpop.eup %1922 }
0x100a   :  { %v1459_v63 = vmul.f32 %v1923_v47, %v3474_v28 }
0x100c   :  { %v1465_v32 = vsel %vm1464_vm6, %v1459_v63, %v2333_v23  ;;  %vm3799_vm6 = vmmov %vm3798_vm0 }
0x100d   :  { %v1481_v59 = vrot.slane %v1465_v32, %v3392_v37 }
0x100f   :  { %v3578_v39 = vsel %vm1476_vm3, %v1481_v59, %v3463_v46  ;;  %v3582_v34 = vsel %vm1477_vm4, %v1481_v59, %v3467_v42 }
0x1013   :  { %1652 = vperm.xlu1 %1906, %v1650_v62  }
0x1017   :  { %1605 = vperm.xlu1 %1906, %v1603_v4  }
0x1018   :  { %1678 = vrot.lane.b32.xlu0 %v1677_v21, %s2202_s0 }
0x101b   :  { %1609 = vperm.xlu1 %1906, %v2361_v52  }
0x101f   :  { %1664 = vperm.xlu1 %1906, %v1659_v40  }
0x1030   :  { %v1623_v52 = vpop.permute.xlu1 %1622 }
0x1031   :  { %vm1627_vm13 = vcmp.eq.s32.totalorder %v1623_v52, 1 }
0x1032   :  { %v1629_v56 = vsel %vm1627_vm13, %v3578_v39, 0.0 }
0x1033   :  { %v1631_v41 = vsel %vm3798_vm0, %v1629_v56, 0.0 }
0x1034   :  { %v1626_v33 = vpop.permute.xlu1 %1625 }
0x1035   :  { %vm1628_vm10 = vcmp.eq.s32.totalorder %v1626_v33, 1 }
0x1036   :  { %v1630_v28 = vsel %vm1628_vm10, %v3582_v34, 0.0 }
0x1037   :  { %v1632_v5 = vsel %vm3799_vm6, %v1630_v28, 0.0 }
0x1038   :  { %v1633_v49 = vadd.f32 %v1632_v5, %v1631_v41 }
0x103a   :  { %v1634_v37 = vrot.slane %v1633_v49, 4 }
0x103c   :  { %v1635_v43 = vadd.f32 %v1634_v37, %v1633_v49 }
0x103e   :  { %v1636_v30 = vrot.slane %v1635_v43, 2 }
0x1040   :  { %v1637_v27 = vadd.f32 %v1636_v30, %v1635_v43 }
0x1042   :  { %v1638_v46 = vrot.slane %v1637_v27, 1 }
0x1044   :  { %v1639_v36 = vadd.f32 %v1638_v46, %v1637_v27 }
0x1046   :  { %v1640_v50 = vmul.f32 %v1639_v36, %v2723_v2  ;;  %v1697_v2 = vsel %vm1696_vm15, 1, %v2180_v24 }
0x1048   :  { %v3589_v57 = vadd.f32 %v1640_v50, %v2727_v60  ;;  %v1698_v60 = vcombine.high %v1697_v2, %v1697_v2 }
0x104a   :  { %v1642_v42 = vmul.f32 %v3589_v57, %v3589_v57  ;;  %v1705_v53 = vrot.slane %v1698_v60, %v2688_v13 }
0x104c   :  { %v1644_v48 = vsel %vm1643_vm12, %v1642_v42, 0.0  ;;  %v1706_v58 = vcombine.high %v1705_v53, %v1705_v53 }
0x104d   :  { %1645 = vadd.xlane.f32.xlu0 %v1644_v48 }
0x104e   :  { %v1713_v15 = vrot.slane %v1706_v58, %v2688_v13  ;;  %v1693_v13 = vrot.slane %v3326_v26, 7 }
0x1050   :  { %v1714_v24 = vcombine.high %v1713_v15, %v1713_v15 }
0x1063   :  { %1661 = vperm.xlu0 %1907, %v1658_v35  }
0x108b   :  { %v1568_v31 = vpop.xlane.xlu0 %1567  ;;  %v1570_v4 = vpop.xlane.xlu1 %1569 }
0x108c   :  { %v1572_v0 = vcvt.f32.s32 %v1570_v4  ;;  %v1571_v10 = vcvt.f32.s32 %v1568_v31 }
0x108e   :  { %v1573_v55 = vshll.u32 %v1572_v0, 16 }
0x108f   :  { %v1653_v54 = vpop.permute.xlu1 %1652  ;;  %v1679_v3 = vpop.permute.xlu0 %1678 }
0x1090   :  { %v1574_v45 = vadd.s32 %v1573_v55, %v1571_v10 }
0x1092   :  { %v1680_v51 = vsel %vm3506_vm5, %v1574_v45, %v1679_v3 }
0x1093   :  { %1684 = vperm.xlu1 %1906, %v1680_v51   ;;  %v1606_v20 = vpop.permute.xlu1 %1605 }
0x1094   :  { %vm1607_vm9 = vcmp.eq.s32.totalorder %v2323_v11, %v1606_v20 }
0x1097   :  { %1715 = vrot.lane.b32.xlu1 %v1714_v24, %s2204_s20  ;;  %v3609_v16 = vpop.permute.xlu1 %1609 }
0x1098   :  { %vm1611_vm11 = vcmp.eq.s32.totalorder %v3609_v16, 1 }
0x1099   :  { %vm3617_vm5 = vmand %vm1607_vm9, %vm1611_vm11 }
0x109a   :  { %v1692_v62 = vsel %vm3617_vm5, 1.0, %v1690_v12  ;;  %v1694_v61 = vsel %vm3617_vm5, %v2387_v17, %v1693_v13 }
0x109b   :  { %1723 = vst.msk [vmem:[#allocation19 - $0x7] sm:$0x80] %vm1539_vm2, %v1692_v62  ;;  %1724 = vst.msk [vmem:[#allocation21 - $0x7] sm:$0x80] %vm1539_vm2, %v1694_v61 }
0x109c   :  { %2043 = shalt.err (!%p2040_p6)
}
0x109d   :  { %1768 = dma.vmem_to_hbm [thread:$0]  %s1766_s19, 16, %s3681_s11, [#allocation20]  }
0x109e   :  { %s2052_s23 = scalar_lea.vmem %s1776_s21, 16  ;;  %s2056_s24 = scalar_lea.vmem %s1776_s21, 32 }
0x109f   :  { %p2053_p7 = scmp.ne.s32.totalorder %s1776_s21, %s2052_s23  ;;  %p2057_p8 = scmp.lt.s32.totalorder %s1776_s21, %s1776_s21 }
0x10a0   :  { %p2058_p9 = scmp.lt.s32.totalorder %s2056_s24, %s2052_s23 }
0x10a2   :  { %p2059_p10 = por %p2058_p9, %p2057_p8 }
0x10a4   :  { %p2060_p11 = pnand %p2059_p10, %p2053_p7 }
0x10a6   :  { %2063 = shalt.err (!%p2060_p11)
}
0x10a7   :  { %1778 = dma.vmem_to_hbm [thread:$0]  %s1776_s21, 16, %s3682_s12, [#allocation20]   ;;  %vm1654_vm7 = vcmp.eq.s32.totalorder %v1653_v54, 1  ;;  %v1665_v21 = vpop.permute.xlu1 %1664  ;;  %vm3802_vm4 = vmmov %vm3798_vm0 }
0x10a8   :  { %s2206_s11 = smov [#allocation16]   ;;  %vm1667_vm3 = vcmp.eq.s32.totalorder %v1665_v21, 1  ;;  %vm3803_vm10 = vmmov %vm3798_vm0 }
0x10a9   :  { %s1742_s28 = sshll.u32 %s2206_s11, 4  ;;  %s1743_s28 = int_to_ptr.vmem [resolvable:$true] %s1742_s28 }
0x10aa   :  { %s2072_s12 = scalar_lea.vmem %s1743_s28, 256  ;;  %p2077_p13 = scmp.lt.s32.totalorder %s1743_s28, %s1743_s28 }
0x10ab   :  { %p2073_p12 = scmp.ne.s32.totalorder %s1743_s28, %s2072_s12  ;;  %p2078_p0 = scmp.lt.s32.totalorder %s2072_s12, %s2072_s12 }
0x10ad   :  { %p2079_p1 = por %p2078_p0, %p2077_p13 }
0x10af   :  { %p2080_p2 = pnand %p2079_p1, %p2073_p12 }
0x10d6   :  { %v1646_v17 = vpop.xlane.xlu0 %1645 }
0x10d7   :  { %v1647_v26 = vadd.f32 1e-12, %v1646_v17 }
0x10d9   :  { %1924 = vrsqrt.f32 %v1647_v26 }
0x10de   :  { %v1662_v40 = vpop.permute.xlu0 %1661 }
0x10df   :  { %vm1666_vm13 = vcmp.eq.s32.totalorder %v1662_v40, 1 }
0x10e6   :  { %v1925_v14 = vpop.eup %1924 }
0x10e7   :  { %v1649_v44 = vmul.f32 %v1925_v14, %v3589_v57 }
0x10e9   :  { %v1655_v6 = vsel %vm1654_vm7, %v1649_v44, %v2333_v23 }
0x10ea   :  { %v1671_v47 = vrot.slane %v1655_v6, %v1615_v18 }
0x10ec   :  { %v1672_v63 = vsel %vm1666_vm13, %v1671_v47, %v3578_v39  ;;  %v1673_v29 = vsel %vm1667_vm3, %v1671_v47, %v3582_v34 }
0x10ed   :  { %1720 = vst.msk [vmem:[#allocation16] sm:$0xff] %vm3802_vm4, %v1672_v63 }
0x10ee   :  { %1721 = vst.msk [vmem:[#allocation16 + $0x8] sm:$0xff] %vm3803_vm10, %v1673_v29 }
0x10ef   :  { %2083 = shalt.err (!%p2080_p2)
}
0x10f0   :  { %1748 = dma.vmem_to_hbm [thread:$0]  %s1743_s28, 256, %s3679_s9, [#allocation17], %s2174_s1, %s2174_s1, %s2175_s26   ;;  %vm1681_vm0 = vcmp.eq.s32.totalorder %v2323_v11, 7  ;;  %v1686_v23 = vrot.slane %v1497_v9, 7  ;;  %vm1718_vm6 = vcmask 64519  }
0x10f1   :  { %s2207_s14 = smov [#allocation15]   ;;  %s2208_s2 = smov [#allocation18]   ;;  %vm1682_vm12 = vmand %vm1681_vm0, %vm1611_vm11 }
0x10f2   :  { %s1733_s15 = sshll.u32 %s2207_s14, 4  ;;  %s1755_s16 = sshll.u32 %s2208_s2, 4  ;;  %s1734_s15 = int_to_ptr.vmem [resolvable:$true] %s1733_s15  ;;  %s1756_s16 = int_to_ptr.vmem [resolvable:$true] %s1755_s16 }
0x10f3   :  { %s2209_s9 = smov [#allocation22]   ;;  %s2092_s26 = scalar_lea.vmem %s1734_s15, 16 }
0x10f4   :  { %s1785_s1 = sshll.u32 %s2209_s9, 4  ;;  %p2093_p3 = scmp.ne.s32.totalorder %s1734_s15, %s2092_s26  ;;  %s1786_s1 = int_to_ptr.vmem [resolvable:$true] %s1785_s1 }
0x10f5   :  { %s2096_s17 = scalar_lea.vmem %s1734_s15, 32  ;;  %p2097_p4 = scmp.lt.s32.totalorder %s1734_s15, %s1734_s15 }
0x10f6   :  { %p2098_p5 = scmp.lt.s32.totalorder %s2096_s17, %s2092_s26 }
0x10f8   :  { %p2099_p6 = por %p2098_p5, %p2097_p4 }
0x10fa   :  { %p2100_p7 = pnand %p2099_p6, %p2093_p3 }
0x110e   :  { %v1685_v25 = vpop.permute.xlu1 %1684 }
0x110f   :  { %v1688_v11 = vsel %vm3617_vm5, %v1685_v25, %v3552_v1  ;;  %v1687_v18 = vsel %vm1682_vm12, %v1685_v25, %v1686_v23 }
0x1110   :  { %1722 = vst.msk [vmem:[#allocation18 - $0x7] sm:$0x80] %vm1539_vm2, %v1688_v11 }
0x1111   :  { %1719 = vst.msk [vmem:[#allocation15 - $0x7] sm:$0x80] %vm1718_vm6, %v1687_v18 }
0x1112   :  { %2103 = shalt.err (!%p2100_p7)
}
0x1113   :  { %1736 = dma.vmem_to_hbm [thread:$0]  %s1734_s15, 16, %s3678_s8, [#allocation5]   ;;  %v1716_v22 = vpop.permute.xlu1 %1715 }
0x1114   :  { %s2112_s4 = scalar_lea.vmem %s1756_s16, 16  ;;  %s2116_s19 = scalar_lea.vmem %s1756_s16, 32 }
0x1115   :  { %p2113_p8 = scmp.ne.s32.totalorder %s1756_s16, %s2112_s4  ;;  %p2117_p9 = scmp.lt.s32.totalorder %s1756_s16, %s1756_s16 }
0x1116   :  { %p2118_p10 = scmp.lt.s32.totalorder %s2116_s19, %s2112_s4 }
0x1118   :  { %p2119_p11 = por %p2118_p10, %p2117_p9 }
0x111a   :  { %p2120_p12 = pnand %p2119_p11, %p2113_p8 }
0x111c   :  { %2123 = shalt.err (!%p2120_p12)
}
0x111d   :  { %1758 = dma.vmem_to_hbm [thread:$0]  %s1756_s16, 16, %s3680_s10, [#allocation17]   ;;  %vm1725_vm2 = vcmask 0   ;;  %v1717_v7 = vadd.s32 %v1716_v22, %v3558_v8 }
0x111e   :  { %s2132_s21 = scalar_lea.vmem %s1786_s1, 16  ;;  %s2136_s8 = scalar_lea.vmem %s1786_s1, 32 }
0x111f   :  { %1726 = vst.msk [vmem:[#allocation22] sm:$0x1] %vm1725_vm2, %v1717_v7  ;;  %p2133_p13 = scmp.ne.s32.totalorder %s1786_s1, %s2132_s21  ;;  %p2137_p0 = scmp.lt.s32.totalorder %s1786_s1, %s1786_s1 }
0x1120   :  { %p2138_p1 = scmp.lt.s32.totalorder %s2136_s8, %s2132_s21 }
0x1122   :  { %p2139_p2 = por %p2138_p1, %p2137_p0 }
0x1124   :  { %p2140_p3 = pnand %p2139_p2, %p2133_p13 }
0x1126   :  { %2143 = shalt.err (!%p2140_p3)
}
0x1127   :  { %1788 = dma.vmem_to_hbm [thread:$0]  %s1786_s1, 16, %s3683_s13, [#allocation23]  }
0x1128   :  { %2162 = dma.done.wait [#allocation5], 16  }
0x1129   :  { %2163 = vsyncadd [#allocation5], 4294967280 }
0x112a   :  { %2164 = dma.done.wait [#allocation17], 272  }
0x112b   :  { %2165 = vsyncadd [#allocation17], 4294967024 }
0x112c   :  { %2166 = dma.done.wait [#allocation20], 32  }
0x112d   :  { %2167 = vsyncadd [#allocation20], 4294967264 }
0x112e   :  { %2168 = dma.done.wait [#allocation23], 16  }
0x112f   :  { %2169 = vsyncadd [#allocation23], 4294967280 }
0x1130   :  { %1807 = vsyncpa [#allocation4], 1 }
0x1131   :  { %1808 = vsyncpa [#allocation11], 1 }
0x1132   :  { %1809 = vsyncpa [#allocation14], 1 }
0x1133   :  { %1810 = vsyncpa [#allocation5], 1 }
0x1134   :  { %1811 = vsyncpa [#allocation17], 1 }
0x1135   :  { %1812 = vsyncpa [#allocation20], 1 }
0x1136   :  { %1813 = vsyncpa [#allocation23], 1 }
0x1137   :  { %1814 = vsyncpa [#allocation6], 1 }
0x1138   :  { %1815 = vsyncpa [#allocation8], 1 }

</bundles_post_ra>
